<compile_context>
chip_gen: v7x
topology: tpu7x:2x2x1
jax: 0.10.0
libtpu: 0.0.40
codegen_flags: <defaults>
</compile_context>

<pallas_src>
import functools

import jax
import jax.numpy as jnp
from jax.experimental import pallas as pl
from jax.experimental.pallas import tpu as pltpu


# -----------------------------------------------------------------------------
# Fused per-stage Pallas kernel
# -----------------------------------------------------------------------------
def _fused_stage_kernel(*refs, names, st):
    """bottleneck(s) -> graph-conv stack(s) -> output head(s), fully in VMEM.

    refs = [inputs (see `names`)..., out_slab].  `st` holds static config.
    Output slab columns: [vert_offsets(3)? | mesh_tex(C)? | geo_nopos(H)? |
                          sem_nopos(H)?] depending on stage type.
    """
    n_in = len(names)
    r = dict(zip(names, refs[:n_in]))
    out_ref = refs[n_in]
    f32 = jnp.float32
    bf16 = jnp.bfloat16
    hid = st["H"]
    csem = st["C"]
    depth = st["depth"]
    has_geo = st["has_geo"]
    has_sem = st["has_sem"]

    adj = r["adj"][...]                              # (Vt, Vt) bf16, {0,1,2}

    # Bottleneck(s): for hybrid stages `wb` packs [geo | semantic] columns so
    # both bottlenecks are one matmul on the shared vert_align features.
    bott_all = jnp.maximum(
        jnp.dot(r["va"][...], r["wb"][...], preferred_element_type=f32)
        + r["bb"][...], 0.0)

    # One wide matmul for every layer-invariant contribution: the [pos|tex|prev]
    # rows of every gconv layer of both stacks + the pos/tex rows of the output
    # heads + all biases.  Sliced per consumer below (static slices).
    static_all = (jnp.dot(r["stat"][...], r["ws"][...],
                          preferred_element_type=f32) + r["bs"][...])

    def gconv_stack(lead, w_lead_ref, col0):
        # GraphConv: y = relu(x@W0 + b0 + A @ (x@W1 + b1)).  W0|W1 are packed
        # into one (·, 2H) RHS; the h0/h1 split is lane-aligned when H is a
        # multiple of 128 (at the demo H=32 both halves share one lane tile).
        for l in range(depth):
            sl = static_all[:, col0 + l * 2 * hid: col0 + (l + 1) * 2 * hid]
            acc = sl + jnp.dot(lead.astype(bf16), w_lead_ref[l],
                               preferred_element_type=f32)
            h0 = acc[:, :hid]
            h1 = acc[:, hid:]
            lead = jnp.maximum(
                h0 + jnp.dot(adj, h1.astype(bf16), preferred_element_type=f32),
                0.0)
        return lead

    col = 0
    geo_nopos = sem_nopos = None
    if has_geo:
        bott_geo = bott_all[:, :hid] if has_sem else bott_all
        geo_nopos = gconv_stack(bott_geo, r["wlg"], col)
        col += depth * 2 * hid
    if has_sem:
        bott_sem = bott_all[:, hid:] if has_geo else bott_all
        sem_nopos = gconv_stack(bott_sem, r["wls"], col)
        col += depth * 2 * hid

    pieces = []
    if has_geo:
        vo = (jnp.dot(geo_nopos.astype(bf16), r["vo_wh"][...],
                      preferred_element_type=f32)
              + static_all[:, col:col + 3])
        col += 3
        pieces.append(jnp.where(jnp.isnan(vo), 0.0, vo))
    if has_sem:
        vs = (jnp.dot(sem_nopos.astype(bf16), r["vs_wh"][...],
                      preferred_element_type=f32)
              + static_all[:, col:col + csem])
        col += csem
        pieces.append(vs)
    if has_geo:
        pieces.append(geo_nopos)
    if has_sem:
        pieces.append(sem_nopos)

    # Single lane-dense output slab (one store / one output DMA).
    out_ref[...] = (jnp.concatenate(pieces, axis=1) if len(pieces) > 1
                    else pieces[0])


# -----------------------------------------------------------------------------
# Plain-JAX glue (cheap O(V) / O(E) work and parameter plumbing)
# -----------------------------------------------------------------------------
def project_verts(verts, P, eps=0.1):
    """verts: (N, V, 3), P: (N, 4, 4) -> (N, V, 3)."""
    N, V, _ = verts.shape
    ones = jnp.ones((N, V, 1), dtype=verts.dtype)
    verts_hom = jnp.concatenate([verts, ones], axis=2)            # (N, V, 4)
    verts_cam_hom = jnp.einsum("nvk,nlk->nvl", verts_hom, P)      # bmm(v, P^T)
    w = verts_cam_hom[:, :, 2:3]
    w_sign = jnp.where(w == 0, 1.0, jnp.sign(w))
    w = w_sign * jnp.maximum(jnp.abs(w), eps)
    return verts_cam_hom[:, :, :3] / w


def bilinear_corner_indices(vert_pos_padded, hf, wf):
    """4 flat corner indices into (N*H*W) rows + bilinear weights.

    Matches grid_sample(bilinear, padding='zeros', align_corners=True): OOB
    corners are clipped (aliasing an in-bounds row) but carry ZERO weight.
    """
    N, V, _ = vert_pos_padded.shape
    x = vert_pos_padded[:, :, 0]
    y = vert_pos_padded[:, :, 1]
    ix = (x + 1.0) * 0.5 * (wf - 1)
    iy = (y + 1.0) * 0.5 * (hf - 1)
    x0 = jnp.floor(ix)
    y0 = jnp.floor(iy)
    x1 = x0 + 1.0
    y1 = y0 + 1.0
    wx1 = ix - x0
    wx0 = 1.0 - wx1
    wy1 = iy - y0
    wy0 = 1.0 - wy1
    batch_off = (jnp.arange(N, dtype=jnp.int32) * (hf * wf))[:, None]
    idx_parts, w_parts = [], []
    for cx, cy, cw in ((x0, y0, wx0 * wy0), (x1, y0, wx1 * wy0),
                       (x0, y1, wx0 * wy1), (x1, y1, wx1 * wy1)):
        inb = (cx >= 0) & (cx <= wf - 1) & (cy >= 0) & (cy <= hf - 1)
        xi = jnp.clip(cx, 0, wf - 1).astype(jnp.int32)
        yi = jnp.clip(cy, 0, hf - 1).astype(jnp.int32)
        idx_parts.append(batch_off + yi * wf + xi)
        w_parts.append(jnp.where(inb, cw, 0.0))
    idx = jnp.stack(idx_parts, axis=-1).reshape(N * V, 4)
    wts = jnp.stack(w_parts, axis=-1).reshape(N * V, 4).astype(jnp.float32)
    return idx, wts


def bilinear_sample(slab, idx, wts):
    """vert_align: gather 4 corner rows of slab (NHW, C) and blend -> (Vt, C)."""
    gathered = slab[idx]                              # (Vt, 4, C) XLA gather
    return jnp.einsum("vk,vkc->vc", wts, gathered)


def nchw_to_slab(x):
    n, c, h, w = x.shape
    return jnp.transpose(x, (0, 2, 3, 1)).reshape(n * h * w, c)


def build_adjacency(edges, vt):
    adj = jnp.zeros((vt, vt), jnp.float32)
    adj = adj.at[edges[:, 0], edges[:, 1]].add(1.0)
    adj = adj.at[edges[:, 1], edges[:, 0]].add(1.0)
    return adj


# -----------------------------------------------------------------------------
# Parameter initialization (mirrors the PyTorch __init__, stored pre-split)
# Params contain ONLY arrays (jit-safe); stage types live in cfg["stage_list"].
# -----------------------------------------------------------------------------
def _normal(key, shape, std=0.01):
    return std * jax.random.normal(key, shape, dtype=jnp.float32)


def _zeros(shape):
    return jnp.zeros(shape, jnp.float32)


def _gconv_split_params(key, hidden, vfd, use_tex, num_classes, layer0):
    """GraphConv weights pre-split per input segment, W0|W1 fused per segment.

    Segment order matches the reference cat order: wh=hidden, wp=3,
    [wt=num_classes], [wx=vert_feat_dim (layer 0 only)].  Each weight is
    (seg, 2*hidden) packing [W0 | W1]; bias packs [b0 | b1].
    """
    segs = [("wh", hidden), ("wp", 3)]
    if use_tex:
        segs.append(("wt", num_classes))
    if layer0 and vfd > 0:
        segs.append(("wx", vfd))
    din = sum(d for _, d in segs)
    k0, k1 = jax.random.split(key)
    w01 = jnp.concatenate(
        [_normal(k0, (din, hidden)), _normal(k1, (din, hidden))], axis=1)
    out = {}
    off = 0
    for name, d in segs:
        out[name] = w01[off:off + d]
        off += d
    out["b"] = _zeros((1, 2 * hidden))
    return out


def init_geo_stage(key, cfg, vfd):
    H = cfg["hidden_dim"]
    Ci = cfg["input_channels"]
    depth = cfg["stage_depth"]
    keys = jax.random.split(key, 1 + depth)
    return {
        "wb": _normal(keys[0], (Ci, H)),
        "bb": _zeros((1, H)),
        "gconvs": [_gconv_split_params(keys[1 + l], H, vfd, False, 0, l == 0)
                   for l in range(depth)],
        "vo_wh": _zeros((H, 3)), "vo_wp": _zeros((3, 3)), "vo_b": _zeros((1, 3)),
    }


def init_hybrid_stage(key, cfg, vfd):
    H = cfg["hidden_dim"]
    Ci = cfg["input_channels"]
    C = cfg["num_classes"]
    depth = cfg["stage_depth"]
    keys = jax.random.split(key, 2 + 2 * depth)
    return {
        # [bottleneck | bottleneck_semantic] share the same vert_align input ->
        # one (Ci, 2H) matmul in-kernel.
        "wb": jnp.concatenate(
            [_normal(keys[0], (Ci, H)), _normal(keys[1], (Ci, H))], axis=1),
        "bb": _zeros((1, 2 * H)),
        "gconvs": [_gconv_split_params(keys[2 + l], H, vfd, True, C, l == 0)
                   for l in range(depth)],
        "gconvs_sem": [_gconv_split_params(keys[2 + depth + l], H, vfd, True, C, l == 0)
                       for l in range(depth)],
        "vo_wh": _zeros((H, 3)), "vo_wp": _zeros((3, 3)), "vo_wt": _zeros((C, 3)),
        "vo_b": _zeros((1, 3)),
        "vs_wh": _zeros((H, C)), "vs_wp": _zeros((3, C)), "vs_wt": _zeros((C, C)),
        "vs_b": _zeros((1, C)),
    }


def init_sem_stage(key, cfg, vfd):
    H = cfg["hidden_dim"]
    Ci = cfg["input_channels"]
    C = cfg["num_classes"]
    depth = cfg["stage_depth"]
    keys = jax.random.split(key, 1 + depth)
    return {
        "wb": _normal(keys[0], (Ci, H)),
        "bb": _zeros((1, H)),
        "gconvs_sem": [_gconv_split_params(keys[1 + l], H, vfd, True, C, l == 0)
                       for l in range(depth)],
        "vs_wh": _zeros((H, C)), "vs_wp": _zeros((3, C)), "vs_wt": _zeros((C, C)),
        "vs_b": _zeros((1, C)),
    }


def init_head_params(key, cfg):
    stages = []
    for i, name in enumerate(cfg["stage_list"]):
        vfd = 0 if i == 0 else cfg["hidden_dim"]
        key, sub = jax.random.split(key)
        if name == "geo":
            stages.append(init_geo_stage(sub, cfg, vfd))
        elif name == "hybrid":
            stages.append(init_hybrid_stage(sub, cfg, vfd))
        elif name == "sem":
            stages.append(init_sem_stage(sub, cfg, vfd))
        else:
            raise ValueError("Error in stage name!")
    return {"stages": stages}


# -----------------------------------------------------------------------------
# Stage forward: one fused pallas_call per stage
# -----------------------------------------------------------------------------
def run_refinement_stage(sp, stage_type, cfg, verts_padded, adj_bf16,
                         slab_img, slab_sem, slab_full,
                         prev, semprev, P, hf, wf):
    N, V, _ = verts_padded.shape
    vt = N * V
    H = cfg["hidden_dim"]
    C = cfg["num_classes"]
    depth = cfg["stage_depth"]
    cimg = slab_img.shape[1]
    has_geo = stage_type in ("geo", "hybrid")
    has_sem = stage_type in ("sem", "hybrid")
    use_tex = stage_type != "geo"
    if prev is not None and semprev is not None:
        raise ValueError("both vert_feats and vert_sem_feats set; gconv "
                         "input_dim would not match (as in the reference).")
    extra = prev if prev is not None else semprev
    vfd = extra.shape[1] if extra is not None else 0

    # vert_align: project + 4-corner gather + bilinear blend (wrapper-side).
    vert_pos_padded = project_verts(verts_padded, P)
    idx, wts = bilinear_corner_indices(vert_pos_padded, hf, wf)
    slab = slab_full if use_tex else slab_img
    sampled = bilinear_sample(slab, idx, wts)               # (Vt, Cimg[+Csem])
    va_img = sampled[:, :cimg]
    tex = sampled[:, cimg:] if use_tex else None
    pos = verts_padded.reshape(vt, 3)

    # Static LHS shared by both stacks and the heads: [pos | tex | prev].
    static_parts = [pos]
    if use_tex:
        static_parts.append(tex)
    if extra is not None:
        static_parts.append(extra)
    static_lhs = jnp.concatenate(static_parts, axis=1)

    # Pack every layer-invariant weight block (and all biases) into one RHS.
    col_blocks, bias_blocks = [], []

    def add_stack_static(gparams):
        leads = []
        for l, gp in enumerate(gparams):
            rows = [gp["wp"]]
            if use_tex:
                rows.append(gp["wt"])
            if extra is not None:
                rows.append(gp["wx"] if (l == 0 and "wx" in gp)
                            else jnp.zeros((vfd, 2 * H), jnp.float32))
            col_blocks.append(jnp.concatenate(rows, axis=0))
            bias_blocks.append(gp["b"])
            leads.append(gp["wh"])
        return jnp.stack(leads, axis=0)                     # (depth, H, 2H)

    wlg = add_stack_static(sp["gconvs"]) if has_geo else None
    wls = add_stack_static(sp["gconvs_sem"]) if has_sem else None
    if has_geo:
        rows = [sp["vo_wp"]]
        if use_tex:
            rows.append(sp["vo_wt"])
        if extra is not None:
            rows.append(jnp.zeros((vfd, 3), jnp.float32))
        col_blocks.append(jnp.concatenate(rows, axis=0))
        bias_blocks.append(sp["vo_b"])
    if has_sem:
        rows = [sp["vs_wp"], sp["vs_wt"]]
        if extra is not None:
            rows.append(jnp.zeros((vfd, C), jnp.float32))
        col_blocks.append(jnp.concatenate(rows, axis=0))
        bias_blocks.append(sp["vs_b"])
    w_static = jnp.concatenate(col_blocks, axis=1)
    b_static = jnp.concatenate(bias_blocks, axis=1)

    names, arrays = [], []

    def add(n, a):
        names.append(n)
        arrays.append(a)

    add("va", va_img.astype(jnp.bfloat16))
    add("stat", static_lhs.astype(jnp.bfloat16))
    add("adj", adj_bf16)
    add("wb", sp["wb"].astype(jnp.bfloat16))
    add("bb", sp["bb"])
    add("ws", w_static.astype(jnp.bfloat16))
    add("bs", b_static)
    if has_geo:
        add("wlg", wlg.astype(jnp.bfloat16))
        add("vo_wh", sp["vo_wh"].astype(jnp.bfloat16))
    if has_sem:
        add("wls", wls.astype(jnp.bfloat16))
        add("vs_wh", sp["vs_wh"].astype(jnp.bfloat16))

    st = dict(Vt=vt, H=H, C=C, depth=depth, has_geo=has_geo, has_sem=has_sem)
    out_cols = (3 if has_geo else 0) + (C if has_sem else 0) \
        + (H if has_geo else 0) + (H if has_sem else 0)

    # Advisory cost estimate so XLA schedules the surrounding cheap ops sanely.
    n_stacks = int(has_geo) + int(has_sem)
    flops = 2 * vt * (cimg * sp["wb"].shape[1]
                      + static_lhs.shape[1] * w_static.shape[1])
    flops += n_stacks * depth * 2 * vt * (H * 2 * H + vt * H)
    flops += 2 * vt * H * (int(has_geo) * 3 + int(has_sem) * C)
    bytes_accessed = sum(int(a.size) * a.dtype.itemsize for a in arrays) \
        + vt * out_cols * 4
    cost = pl.CostEstimate(flops=int(flops), transcendentals=0,
                           bytes_accessed=int(bytes_accessed))

    out_slab = pl.pallas_call(
        functools.partial(_fused_stage_kernel, names=tuple(names), st=st),
        out_shape=jax.ShapeDtypeStruct((vt, out_cols), jnp.float32),
        compiler_params=pltpu.CompilerParams(vmem_limit_bytes=64 * 1024 * 1024),
        cost_estimate=cost,
    )(*arrays)

    # Split the lane-dense slab: [vo | mesh_tex | geo_nopos | sem_nopos].
    off = 0
    vo = mesh_tex = geo_nopos = sem_nopos = None
    if has_geo:
        vo = out_slab[:, off:off + 3]
        off += 3
    if has_sem:
        mesh_tex = out_slab[:, off:off + C]
        off += C
    if has_geo:
        geo_nopos = out_slab[:, off:off + H]
        off += H
    if has_sem:
        sem_nopos = out_slab[:, off:off + H]
        off += H

    if stage_type == "geo":
        verts_out = verts_padded + vo.reshape(N, V, 3)
        return verts_out, None, geo_nopos, None

    if stage_type == "hybrid":
        verts_out = verts_padded + vo.reshape(N, V, 3)
        mesh_tex_p = mesh_tex.reshape(N, V, C)
        if cfg["sem_residual"]:
            # residual texture sampled at the OFFSET verts (tiny wrapper gather).
            idx2, wts2 = bilinear_corner_indices(project_verts(verts_out, P), hf, wf)
            va_sem = bilinear_sample(slab_sem, idx2, wts2).reshape(N, V, C)
            textures = va_sem + mesh_tex_p
        else:
            textures = mesh_tex_p
        return verts_out, textures, geo_nopos, sem_nopos

    # sem stage: verts unchanged -> residual sampling equals `tex`.
    textures = mesh_tex.reshape(N, V, C)
    if cfg["sem_residual"]:
        textures = textures + tex.reshape(N, V, C)
    return verts_padded, textures, None, sem_nopos


def mesh_refinement_head_forward(params, cfg, img_feats, verts_padded,
                                 edges_packed, sem_2d, P):
    """Returns a list of (verts_padded, textures) per refinement stage."""
    N, _, hf, wf = img_feats.shape
    V = verts_padded.shape[1]
    vt = N * V

    # Hoisted once per forward: channels-last slabs + bf16 adjacency.
    slab_img = nchw_to_slab(img_feats)
    slab_sem = nchw_to_slab(sem_2d)
    slab_full = jnp.concatenate([slab_img, slab_sem], axis=1)
    adj_bf16 = build_adjacency(edges_packed, vt).astype(jnp.bfloat16)

    outputs = []
    vert_feats = None
    vert_sem_feats = None
    verts = verts_padded
    for stage_type, sp in zip(cfg["stage_list"], params["stages"]):
        verts, tex, vert_feats, vert_sem_feats = run_refinement_stage(
            sp, stage_type, cfg, verts, adj_bf16, slab_img, slab_sem, slab_full,
            vert_feats, vert_sem_feats, P, hf, wf)
        outputs.append((verts, tex))
    return outputs


# -----------------------------------------------------------------------------
# Demo
# -----------------------------------------------------------------------------
if __name__ == "__main__":
    cfg = {
        "input_channels": 16,   # img_feat_dim
        "hidden_dim": 32,
        "stage_depth": 2,       # NUM_GRAPH_CONVS
        "num_classes": 4,
        "num_vertices": 64,
        "num_stages": 2,
        "stage_list": ["geo", "hybrid"],
        "sem_residual": True,
    }

    N, C, Hf, Wf = 2, cfg["input_channels"], 8, 8
    V = cfg["num_vertices"]

    key = jax.random.PRNGKey(0)
    k_img, k_sem, k_verts, k_params = jax.random.split(key, 4)

    img_feats = jax.random.normal(k_img, (N, C, Hf, Wf), dtype=jnp.float32)     # NCHW
    sem_2d = jax.random.normal(k_sem, (N, cfg["num_classes"], Hf, Wf),
                               dtype=jnp.float32)
    verts_padded = 0.9 * (2.0 * jax.random.uniform(k_verts, (N, V, 3),
                                                   dtype=jnp.float32) - 1.0)

    # projection matrices: pass-through xy, homogeneous w = 1 (keeps samples in-grid)
    P_single = jnp.array([[1.0, 0.0, 0.0, 0.0],
                          [0.0, 1.0, 0.0, 0.0],
                          [0.0, 0.0, 0.0, 1.0],
                          [0.0, 0.0, 1.0, 0.0]], dtype=jnp.float32)
    P = jnp.broadcast_to(P_single, (N, 4, 4))

    # packed edges: per-mesh ring + chords (unique undirected pairs)
    base = jnp.arange(V, dtype=jnp.int32)
    ring = jnp.stack([base, (base + 1) % V], axis=1)
    chords = jnp.stack([base, (base + 5) % V], axis=1)
    per_mesh = jnp.concatenate([ring, chords], axis=0)
    edges_packed = jnp.concatenate([per_mesh + n * V for n in range(N)], axis=0)

    params = init_head_params(k_params, cfg)

    fwd = jax.jit(lambda prm, a, b, c, d, e:
                  mesh_refinement_head_forward(prm, cfg, a, b, c, d, e))
    outputs = fwd(params, img_feats, verts_padded, edges_packed, sem_2d, P)
    outputs = jax.block_until_ready(outputs)

    # sanity on shapes
    assert outputs[0][0].shape == (N, V, 3)
    assert outputs[0][1] is None
    assert outputs[1][0].shape == (N, V, 3)
    assert outputs[1][1].shape == (N, V, cfg["num_classes"])
    print("KERNEL_OK")
</pallas_src>

<mosaic_0001>
module attributes {stable_mosaic.version = 11 : i64} {
  func.func private @main(%arg0: i32) attributes {dimension_semantics = [#tpu.dimension_semantics<core_parallel>], iteration_bounds = array<i64: 2>, tpu.core_type = #tpu.core_type<sc_scalar_subcore>, window_params = []} {
    return
  }
}

module attributes {stable_mosaic.version = 11 : i64} {
  func.func private @main(%arg0: i32) attributes {dimension_semantics = [#tpu.dimension_semantics<core_parallel>], iteration_bounds = array<i64: 2>, tpu.core_type = #tpu.core_type<sc_scalar_subcore>, window_params = []} {
    return
  }
}

module attributes {stable_mosaic.version = 11 : i64} {
  func.func @_fused_stage_kernel(%arg0: memref<128x16xbf16, #tpu.memory_space<vmem>>, %arg1: memref<128x3xbf16, #tpu.memory_space<vmem>>, %arg2: memref<128x128xbf16, #tpu.memory_space<vmem>>, %arg3: memref<16x32xbf16, #tpu.memory_space<vmem>>, %arg4: memref<1x32xf32, #tpu.memory_space<vmem>>, %arg5: memref<3x131xbf16, #tpu.memory_space<vmem>>, %arg6: memref<1x131xf32, #tpu.memory_space<vmem>>, %arg7: memref<2x32x64xbf16, #tpu.memory_space<vmem>>, %arg8: memref<32x3xbf16, #tpu.memory_space<vmem>>, %arg9: memref<128x35xf32, #tpu.memory_space<vmem>>) attributes {dimension_semantics = [], scalar_prefetch = 0 : i64, scratch_operands = 0 : i64, tpu.core_type = #tpu.core_type<tc>} {
    %c0 = arith.constant 0 : index
    %c0_0 = arith.constant 0 : index
    %0 = vector.load %arg2[%c0, %c0_0] : memref<128x128xbf16, #tpu.memory_space<vmem>>, vector<128x128xbf16>
    %c0_1 = arith.constant 0 : index
    %c0_2 = arith.constant 0 : index
    %1 = vector.load %arg0[%c0_1, %c0_2] : memref<128x16xbf16, #tpu.memory_space<vmem>>, vector<128x16xbf16>
    %c0_3 = arith.constant 0 : index
    %c0_4 = arith.constant 0 : index
    %2 = vector.load %arg3[%c0_3, %c0_4] : memref<16x32xbf16, #tpu.memory_space<vmem>>, vector<16x32xbf16>
    %cst = arith.constant dense<0.000000e+00> : vector<128x32xf32>
    %3 = tpu.matmul %1, %2, %cst {dimension_numbers = #tpu.dot_dimension_numbers<[1], [0], [0], [1], [0, 0, 1, 1], [], []>} : vector<128x16xbf16>, vector<16x32xbf16>, vector<128x32xf32> -> vector<128x32xf32>
    %c0_5 = arith.constant 0 : index
    %c0_6 = arith.constant 0 : index
    %4 = vector.load %arg4[%c0_5, %c0_6] : memref<1x32xf32, #tpu.memory_space<vmem>>, vector<1x32xf32>
    %5 = vector.broadcast %4 : vector<1x32xf32> to vector<128x32xf32>
    %6 = arith.addf %3, %5 : vector<128x32xf32>
    %cst_7 = arith.constant 0.000000e+00 : f32
    %7 = vector.broadcast %cst_7 : f32 to vector<128x32xf32>
    %8 = arith.maximumf %6, %7 : vector<128x32xf32>
    %c0_8 = arith.constant 0 : index
    %c0_9 = arith.constant 0 : index
    %9 = vector.load %arg1[%c0_8, %c0_9] : memref<128x3xbf16, #tpu.memory_space<vmem>>, vector<128x3xbf16>
    %c0_10 = arith.constant 0 : index
    %c0_11 = arith.constant 0 : index
    %10 = vector.load %arg5[%c0_10, %c0_11] : memref<3x131xbf16, #tpu.memory_space<vmem>>, vector<3x131xbf16>
    %cst_12 = arith.constant dense<0.000000e+00> : vector<128x131xf32>
    %11 = tpu.matmul %9, %10, %cst_12 {dimension_numbers = #tpu.dot_dimension_numbers<[1], [0], [0], [1], [0, 0, 1, 1], [], []>} : vector<128x3xbf16>, vector<3x131xbf16>, vector<128x131xf32> -> vector<128x131xf32>
    %c0_13 = arith.constant 0 : index
    %c0_14 = arith.constant 0 : index
    %12 = vector.load %arg6[%c0_13, %c0_14] : memref<1x131xf32, #tpu.memory_space<vmem>>, vector<1x131xf32>
    %13 = vector.broadcast %12 : vector<1x131xf32> to vector<128x131xf32>
    %14 = arith.addf %11, %13 : vector<128x131xf32>
    %15 = vector.extract_strided_slice %14 {offsets = [0, 0], sizes = [128, 64], strides = [1, 1]} : vector<128x131xf32> to vector<128x64xf32>
    %16 = arith.truncf %8 : vector<128x32xf32> to vector<128x32xbf16>
    %c0_15 = arith.constant 0 : index
    %c0_16 = arith.constant 0 : index
    %c0_17 = arith.constant 0 : index
    %17 = vector.load %arg7[%c0_15, %c0_16, %c0_17] : memref<2x32x64xbf16, #tpu.memory_space<vmem>>, vector<1x32x64xbf16>
    %18 = vector.shape_cast %17 : vector<1x32x64xbf16> to vector<32x64xbf16>
    %cst_18 = arith.constant dense<0.000000e+00> : vector<128x64xf32>
    %19 = tpu.matmul %16, %18, %cst_18 {dimension_numbers = #tpu.dot_dimension_numbers<[1], [0], [0], [1], [0, 0, 1, 1], [], []>} : vector<128x32xbf16>, vector<32x64xbf16>, vector<128x64xf32> -> vector<128x64xf32>
    %20 = arith.addf %15, %19 : vector<128x64xf32>
    %21 = vector.extract_strided_slice %20 {offsets = [0, 0], sizes = [128, 32], strides = [1, 1]} : vector<128x64xf32> to vector<128x32xf32>
    %22 = vector.extract_strided_slice %20 {offsets = [0, 32], sizes = [128, 32], strides = [1, 1]} : vector<128x64xf32> to vector<128x32xf32>
    %23 = arith.truncf %22 : vector<128x32xf32> to vector<128x32xbf16>
    %cst_19 = arith.constant dense<0.000000e+00> : vector<128x32xf32>
    %24 = tpu.matmul %0, %23, %cst_19 {dimension_numbers = #tpu.dot_dimension_numbers<[1], [0], [0], [1], [0, 0, 1, 1], [], []>} : vector<128x128xbf16>, vector<128x32xbf16>, vector<128x32xf32> -> vector<128x32xf32>
    %25 = arith.addf %21, %24 : vector<128x32xf32>
    %cst_20 = arith.constant 0.000000e+00 : f32
    %26 = vector.broadcast %cst_20 : f32 to vector<128x32xf32>
    %27 = arith.maximumf %25, %26 : vector<128x32xf32>
    %28 = vector.extract_strided_slice %14 {offsets = [0, 64], sizes = [128, 64], strides = [1, 1]} : vector<128x131xf32> to vector<128x64xf32>
    %29 = arith.truncf %27 : vector<128x32xf32> to vector<128x32xbf16>
    %c1 = arith.constant 1 : index
    %c0_21 = arith.constant 0 : index
    %c0_22 = arith.constant 0 : index
    %30 = vector.load %arg7[%c1, %c0_21, %c0_22] : memref<2x32x64xbf16, #tpu.memory_space<vmem>>, vector<1x32x64xbf16>
    %31 = vector.shape_cast %30 : vector<1x32x64xbf16> to vector<32x64xbf16>
    %cst_23 = arith.constant dense<0.000000e+00> : vector<128x64xf32>
    %32 = tpu.matmul %29, %31, %cst_23 {dimension_numbers = #tpu.dot_dimension_numbers<[1], [0], [0], [1], [0, 0, 1, 1], [], []>} : vector<128x32xbf16>, vector<32x64xbf16>, vector<128x64xf32> -> vector<128x64xf32>
    %33 = arith.addf %28, %32 : vector<128x64xf32>
    %34 = vector.extract_strided_slice %33 {offsets = [0, 0], sizes = [128, 32], strides = [1, 1]} : vector<128x64xf32> to vector<128x32xf32>
    %35 = vector.extract_strided_slice %33 {offsets = [0, 32], sizes = [128, 32], strides = [1, 1]} : vector<128x64xf32> to vector<128x32xf32>
    %36 = arith.truncf %35 : vector<128x32xf32> to vector<128x32xbf16>
    %cst_24 = arith.constant dense<0.000000e+00> : vector<128x32xf32>
    %37 = tpu.matmul %0, %36, %cst_24 {dimension_numbers = #tpu.dot_dimension_numbers<[1], [0], [0], [1], [0, 0, 1, 1], [], []>} : vector<128x128xbf16>, vector<128x32xbf16>, vector<128x32xf32> -> vector<128x32xf32>
    %38 = arith.addf %34, %37 : vector<128x32xf32>
    %cst_25 = arith.constant 0.000000e+00 : f32
    %39 = vector.broadcast %cst_25 : f32 to vector<128x32xf32>
    %40 = arith.maximumf %38, %39 : vector<128x32xf32>
    %41 = arith.truncf %40 : vector<128x32xf32> to vector<128x32xbf16>
    %c0_26 = arith.constant 0 : index
    %c0_27 = arith.constant 0 : index
    %42 = vector.load %arg8[%c0_26, %c0_27] : memref<32x3xbf16, #tpu.memory_space<vmem>>, vector<32x3xbf16>
    %cst_28 = arith.constant dense<0.000000e+00> : vector<128x3xf32>
    %43 = tpu.matmul %41, %42, %cst_28 {dimension_numbers = #tpu.dot_dimension_numbers<[1], [0], [0], [1], [0, 0, 1, 1], [], []>} : vector<128x32xbf16>, vector<32x3xbf16>, vector<128x3xf32> -> vector<128x3xf32>
    %44 = vector.extract_strided_slice %14 {offsets = [0, 128], sizes = [128, 3], strides = [1, 1]} : vector<128x131xf32> to vector<128x3xf32>
    %45 = arith.addf %43, %44 : vector<128x3xf32>
    %46 = arith.cmpf one, %45, %45 : vector<128x3xf32>
    %cst_29 = arith.constant 0.000000e+00 : f32
    %47 = vector.broadcast %cst_29 : f32 to vector<128x3xf32>
    %48 = arith.select %46, %47, %45 : vector<128x3xi1>, vector<128x3xf32>
    %49 = tpu.concatenate %48, %40 in 1 : vector<128x3xf32>, vector<128x32xf32> -> vector<128x35xf32>
    %c0_30 = arith.constant 0 : index
    %c0_31 = arith.constant 0 : index
    %50 = vector.load %arg9[%c0_30, %c0_31] : memref<128x35xf32, #tpu.memory_space<vmem>>, vector<128x35xf32>
    tpu.vector_store %arg9[%c0_30, %c0_31], %49 {strides = array<i32>} : memref<128x35xf32, #tpu.memory_space<vmem>>, vector<128x35xf32>,
    return
  }
}

module attributes {stable_mosaic.version = 11 : i64} {
  func.func @_fused_stage_kernel(%arg0: memref<128x16xbf16, #tpu.memory_space<vmem>>, %arg1: memref<128x39xbf16, #tpu.memory_space<vmem>>, %arg2: memref<128x128xbf16, #tpu.memory_space<vmem>>, %arg3: memref<16x64xbf16, #tpu.memory_space<vmem>>, %arg4: memref<1x64xf32, #tpu.memory_space<vmem>>, %arg5: memref<39x263xbf16, #tpu.memory_space<vmem>>, %arg6: memref<1x263xf32, #tpu.memory_space<vmem>>, %arg7: memref<2x32x64xbf16, #tpu.memory_space<vmem>>, %arg8: memref<32x3xbf16, #tpu.memory_space<vmem>>, %arg9: memref<2x32x64xbf16, #tpu.memory_space<vmem>>, %arg10: memref<32x4xbf16, #tpu.memory_space<vmem>>, %arg11: memref<128x71xf32, #tpu.memory_space<vmem>>) attributes {dimension_semantics = [], scalar_prefetch = 0 : i64, scratch_operands = 0 : i64, tpu.core_type = #tpu.core_type<tc>} {
    %c0 = arith.constant 0 : index
    %c0_0 = arith.constant 0 : index
    %0 = vector.load %arg2[%c0, %c0_0] : memref<128x128xbf16, #tpu.memory_space<vmem>>, vector<128x128xbf16>
    %c0_1 = arith.constant 0 : index
    %c0_2 = arith.constant 0 : index
    %1 = vector.load %arg0[%c0_1, %c0_2] : memref<128x16xbf16, #tpu.memory_space<vmem>>, vector<128x16xbf16>
    %c0_3 = arith.constant 0 : index
    %c0_4 = arith.constant 0 : index
    %2 = vector.load %arg3[%c0_3, %c0_4] : memref<16x64xbf16, #tpu.memory_space<vmem>>, vector<16x64xbf16>
    %cst = arith.constant dense<0.000000e+00> : vector<128x64xf32>
    %3 = tpu.matmul %1, %2, %cst {dimension_numbers = #tpu.dot_dimension_numbers<[1], [0], [0], [1], [0, 0, 1, 1], [], []>} : vector<128x16xbf16>, vector<16x64xbf16>, vector<128x64xf32> -> vector<128x64xf32>
    %c0_5 = arith.constant 0 : index
    %c0_6 = arith.constant 0 : index
    %4 = vector.load %arg4[%c0_5, %c0_6] : memref<1x64xf32, #tpu.memory_space<vmem>>, vector<1x64xf32>
    %5 = vector.broadcast %4 : vector<1x64xf32> to vector<128x64xf32>
    %6 = arith.addf %3, %5 : vector<128x64xf32>
    %cst_7 = arith.constant 0.000000e+00 : f32
    %7 = vector.broadcast %cst_7 : f32 to vector<128x64xf32>
    %8 = arith.maximumf %6, %7 : vector<128x64xf32>
    %c0_8 = arith.constant 0 : index
    %c0_9 = arith.constant 0 : index
    %9 = vector.load %arg1[%c0_8, %c0_9] : memref<128x39xbf16, #tpu.memory_space<vmem>>, vector<128x39xbf16>
    %c0_10 = arith.constant 0 : index
    %c0_11 = arith.constant 0 : index
    %10 = vector.load %arg5[%c0_10, %c0_11] : memref<39x263xbf16, #tpu.memory_space<vmem>>, vector<39x263xbf16>
    %cst_12 = arith.constant dense<0.000000e+00> : vector<128x263xf32>
    %11 = tpu.matmul %9, %10, %cst_12 {dimension_numbers = #tpu.dot_dimension_numbers<[1], [0], [0], [1], [0, 0, 1, 1], [], []>} : vector<128x39xbf16>, vector<39x263xbf16>, vector<128x263xf32> -> vector<128x263xf32>
    %c0_13 = arith.constant 0 : index
    %c0_14 = arith.constant 0 : index
    %12 = vector.load %arg6[%c0_13, %c0_14] : memref<1x263xf32, #tpu.memory_space<vmem>>, vector<1x263xf32>
    %13 = vector.broadcast %12 : vector<1x263xf32> to vector<128x263xf32>
    %14 = arith.addf %11, %13 : vector<128x263xf32>
    %15 = vector.extract_strided_slice %8 {offsets = [0, 0], sizes = [128, 32], strides = [1, 1]} : vector<128x64xf32> to vector<128x32xf32>
    %16 = vector.extract_strided_slice %14 {offsets = [0, 0], sizes = [128, 64], strides = [1, 1]} : vector<128x263xf32> to vector<128x64xf32>
    %17 = arith.truncf %15 : vector<128x32xf32> to vector<128x32xbf16>
    %c0_15 = arith.constant 0 : index
    %c0_16 = arith.constant 0 : index
    %c0_17 = arith.constant 0 : index
    %18 = vector.load %arg7[%c0_15, %c0_16, %c0_17] : memref<2x32x64xbf16, #tpu.memory_space<vmem>>, vector<1x32x64xbf16>
    %19 = vector.shape_cast %18 : vector<1x32x64xbf16> to vector<32x64xbf16>
    %cst_18 = arith.constant dense<0.000000e+00> : vector<128x64xf32>
    %20 = tpu.matmul %17, %19, %cst_18 {dimension_numbers = #tpu.dot_dimension_numbers<[1], [0], [0], [1], [0, 0, 1, 1], [], []>} : vector<128x32xbf16>, vector<32x64xbf16>, vector<128x64xf32> -> vector<128x64xf32>
    %21 = arith.addf %16, %20 : vector<128x64xf32>
    %22 = vector.extract_strided_slice %21 {offsets = [0, 0], sizes = [128, 32], strides = [1, 1]} : vector<128x64xf32> to vector<128x32xf32>
    %23 = vector.extract_strided_slice %21 {offsets = [0, 32], sizes = [128, 32], strides = [1, 1]} : vector<128x64xf32> to vector<128x32xf32>
    %24 = arith.truncf %23 : vector<128x32xf32> to vector<128x32xbf16>
    %cst_19 = arith.constant dense<0.000000e+00> : vector<128x32xf32>
    %25 = tpu.matmul %0, %24, %cst_19 {dimension_numbers = #tpu.dot_dimension_numbers<[1], [0], [0], [1], [0, 0, 1, 1], [], []>} : vector<128x128xbf16>, vector<128x32xbf16>, vector<128x32xf32> -> vector<128x32xf32>
    %26 = arith.addf %22, %25 : vector<128x32xf32>
    %cst_20 = arith.constant 0.000000e+00 : f32
    %27 = vector.broadcast %cst_20 : f32 to vector<128x32xf32>
    %28 = arith.maximumf %26, %27 : vector<128x32xf32>
    %29 = vector.extract_strided_slice %14 {offsets = [0, 64], sizes = [128, 64], strides = [1, 1]} : vector<128x263xf32> to vector<128x64xf32>
    %30 = arith.truncf %28 : vector<128x32xf32> to vector<128x32xbf16>
    %c1 = arith.constant 1 : index
    %c0_21 = arith.constant 0 : index
    %c0_22 = arith.constant 0 : index
    %31 = vector.load %arg7[%c1, %c0_21, %c0_22] : memref<2x32x64xbf16, #tpu.memory_space<vmem>>, vector<1x32x64xbf16>
    %32 = vector.shape_cast %31 : vector<1x32x64xbf16> to vector<32x64xbf16>
    %cst_23 = arith.constant dense<0.000000e+00> : vector<128x64xf32>
    %33 = tpu.matmul %30, %32, %cst_23 {dimension_numbers = #tpu.dot_dimension_numbers<[1], [0], [0], [1], [0, 0, 1, 1], [], []>} : vector<128x32xbf16>, vector<32x64xbf16>, vector<128x64xf32> -> vector<128x64xf32>
    %34 = arith.addf %29, %33 : vector<128x64xf32>
    %35 = vector.extract_strided_slice %34 {offsets = [0, 0], sizes = [128, 32], strides = [1, 1]} : vector<128x64xf32> to vector<128x32xf32>
    %36 = vector.extract_strided_slice %34 {offsets = [0, 32], sizes = [128, 32], strides = [1, 1]} : vector<128x64xf32> to vector<128x32xf32>
    %37 = arith.truncf %36 : vector<128x32xf32> to vector<128x32xbf16>
    %cst_24 = arith.constant dense<0.000000e+00> : vector<128x32xf32>
    %38 = tpu.matmul %0, %37, %cst_24 {dimension_numbers = #tpu.dot_dimension_numbers<[1], [0], [0], [1], [0, 0, 1, 1], [], []>} : vector<128x128xbf16>, vector<128x32xbf16>, vector<128x32xf32> -> vector<128x32xf32>
    %39 = arith.addf %35, %38 : vector<128x32xf32>
    %cst_25 = arith.constant 0.000000e+00 : f32
    %40 = vector.broadcast %cst_25 : f32 to vector<128x32xf32>
    %41 = arith.maximumf %39, %40 : vector<128x32xf32>
    %42 = vector.extract_strided_slice %8 {offsets = [0, 32], sizes = [128, 32], strides = [1, 1]} : vector<128x64xf32> to vector<128x32xf32>
    %43 = vector.extract_strided_slice %14 {offsets = [0, 128], sizes = [128, 64], strides = [1, 1]} : vector<128x263xf32> to vector<128x64xf32>
    %44 = arith.truncf %42 : vector<128x32xf32> to vector<128x32xbf16>
    %c0_26 = arith.constant 0 : index
    %c0_27 = arith.constant 0 : index
    %c0_28 = arith.constant 0 : index
    %45 = vector.load %arg9[%c0_26, %c0_27, %c0_28] : memref<2x32x64xbf16, #tpu.memory_space<vmem>>, vector<1x32x64xbf16>
    %46 = vector.shape_cast %45 : vector<1x32x64xbf16> to vector<32x64xbf16>
    %cst_29 = arith.constant dense<0.000000e+00> : vector<128x64xf32>
    %47 = tpu.matmul %44, %46, %cst_29 {dimension_numbers = #tpu.dot_dimension_numbers<[1], [0], [0], [1], [0, 0, 1, 1], [], []>} : vector<128x32xbf16>, vector<32x64xbf16>, vector<128x64xf32> -> vector<128x64xf32>
    %48 = arith.addf %43, %47 : vector<128x64xf32>
    %49 = vector.extract_strided_slice %48 {offsets = [0, 0], sizes = [128, 32], strides = [1, 1]} : vector<128x64xf32> to vector<128x32xf32>
    %50 = vector.extract_strided_slice %48 {offsets = [0, 32], sizes = [128, 32], strides = [1, 1]} : vector<128x64xf32> to vector<128x32xf32>
    %51 = arith.truncf %50 : vector<128x32xf32> to vector<128x32xbf16>
    %cst_30 = arith.constant dense<0.000000e+00> : vector<128x32xf32>
    %52 = tpu.matmul %0, %51, %cst_30 {dimension_numbers = #tpu.dot_dimension_numbers<[1], [0], [0], [1], [0, 0, 1, 1], [], []>} : vector<128x128xbf16>, vector<128x32xbf16>, vector<128x32xf32> -> vector<128x32xf32>
    %53 = arith.addf %49, %52 : vector<128x32xf32>
    %cst_31 = arith.constant 0.000000e+00 : f32
    %54 = vector.broadcast %cst_31 : f32 to vector<128x32xf32>
    %55 = arith.maximumf %53, %54 : vector<128x32xf32>
    %56 = vector.extract_strided_slice %14 {offsets = [0, 192], sizes = [128, 64], strides = [1, 1]} : vector<128x263xf32> to vector<128x64xf32>
    %57 = arith.truncf %55 : vector<128x32xf32> to vector<128x32xbf16>
    %c1_32 = arith.constant 1 : index
    %c0_33 = arith.constant 0 : index
    %c0_34 = arith.constant 0 : index
    %58 = vector.load %arg9[%c1_32, %c0_33, %c0_34] : memref<2x32x64xbf16, #tpu.memory_space<vmem>>, vector<1x32x64xbf16>
    %59 = vector.shape_cast %58 : vector<1x32x64xbf16> to vector<32x64xbf16>
    %cst_35 = arith.constant dense<0.000000e+00> : vector<128x64xf32>
    %60 = tpu.matmul %57, %59, %cst_35 {dimension_numbers = #tpu.dot_dimension_numbers<[1], [0], [0], [1], [0, 0, 1, 1], [], []>} : vector<128x32xbf16>, vector<32x64xbf16>, vector<128x64xf32> -> vector<128x64xf32>
    %61 = arith.addf %56, %60 : vector<128x64xf32>
    %62 = vector.extract_strided_slice %61 {offsets = [0, 0], sizes = [128, 32], strides = [1, 1]} : vector<128x64xf32> to vector<128x32xf32>
    %63 = vector.extract_strided_slice %61 {offsets = [0, 32], sizes = [128, 32], strides = [1, 1]} : vector<128x64xf32> to vector<128x32xf32>
    %64 = arith.truncf %63 : vector<128x32xf32> to vector<128x32xbf16>
    %cst_36 = arith.constant dense<0.000000e+00> : vector<128x32xf32>
    %65 = tpu.matmul %0, %64, %cst_36 {dimension_numbers = #tpu.dot_dimension_numbers<[1], [0], [0], [1], [0, 0, 1, 1], [], []>} : vector<128x128xbf16>, vector<128x32xbf16>, vector<128x32xf32> -> vector<128x32xf32>
    %66 = arith.addf %62, %65 : vector<128x32xf32>
    %cst_37 = arith.constant 0.000000e+00 : f32
    %67 = vector.broadcast %cst_37 : f32 to vector<128x32xf32>
    %68 = arith.maximumf %66, %67 : vector<128x32xf32>
    %69 = arith.truncf %41 : vector<128x32xf32> to vector<128x32xbf16>
    %c0_38 = arith.constant 0 : index
    %c0_39 = arith.constant 0 : index
    %70 = vector.load %arg8[%c0_38, %c0_39] : memref<32x3xbf16, #tpu.memory_space<vmem>>, vector<32x3xbf16>
    %cst_40 = arith.constant dense<0.000000e+00> : vector<128x3xf32>
    %71 = tpu.matmul %69, %70, %cst_40 {dimension_numbers = #tpu.dot_dimension_numbers<[1], [0], [0], [1], [0, 0, 1, 1], [], []>} : vector<128x32xbf16>, vector<32x3xbf16>, vector<128x3xf32> -> vector<128x3xf32>
    %72 = vector.extract_strided_slice %14 {offsets = [0, 256], sizes = [128, 3], strides = [1, 1]} : vector<128x263xf32> to vector<128x3xf32>
    %73 = arith.addf %71, %72 : vector<128x3xf32>
    %74 = arith.cmpf one, %73, %73 : vector<128x3xf32>
    %cst_41 = arith.constant 0.000000e+00 : f32
    %75 = vector.broadcast %cst_41 : f32 to vector<128x3xf32>
    %76 = arith.select %74, %75, %73 : vector<128x3xi1>, vector<128x3xf32>
    %77 = arith.truncf %68 : vector<128x32xf32> to vector<128x32xbf16>
    %c0_42 = arith.constant 0 : index
    %c0_43 = arith.constant 0 : index
    %78 = vector.load %arg10[%c0_42, %c0_43] : memref<32x4xbf16, #tpu.memory_space<vmem>>, vector<32x4xbf16>
    %cst_44 = arith.constant dense<0.000000e+00> : vector<128x4xf32>
    %79 = tpu.matmul %77, %78, %cst_44 {dimension_numbers = #tpu.dot_dimension_numbers<[1], [0], [0], [1], [0, 0, 1, 1], [], []>} : vector<128x32xbf16>, vector<32x4xbf16>, vector<128x4xf32> -> vector<128x4xf32>
    %80 = vector.extract_strided_slice %14 {offsets = [0, 259], sizes = [128, 4], strides = [1, 1]} : vector<128x263xf32> to vector<128x4xf32>
    %81 = arith.addf %79, %80 : vector<128x4xf32>
    %82 = tpu.concatenate %76, %81, %41, %68 in 1 : vector<128x3xf32>, vector<128x4xf32>, vector<128x32xf32>, vector<128x32xf32> -> vector<128x71xf32>
    %c0_45 = arith.constant 0 : index
    %c0_46 = arith.constant 0 : index
    %83 = vector.load %arg11[%c0_45, %c0_46] : memref<128x71xf32, #tpu.memory_space<vmem>>, vector<128x71xf32>
    tpu.vector_store %arg11[%c0_45, %c0_46], %82 {strides = array<i32>} : memref<128x71xf32, #tpu.memory_space<vmem>>, vector<128x71xf32>,
    return
  }
}

</mosaic_0001>

<bundles_post_ra>
// kernel: _lambda_.2
= control target key start
LH: loop header
LB: loop body
LE: loop exit
PB: predicated region body
PF: predicated region fallthrough
CT: control target
= control target key end

     0   :  { %14 = vsyncpa [#allocation3], 0  ;;  %s3021_s0 = inlined_call_operand.hbm [shape: bf16[128,16], index: 0, kind: input, shape index: {}]   ;;  %s3022_s1 = inlined_call_operand.hbm [shape: bf16[128,3], index: 1, kind: input, shape index: {}]   ;;  %s3023_s2 = inlined_call_operand.hbm [shape: bf16[128,128], index: 2, kind: input, shape index: {}]   ;;  %s3024_s3 = inlined_call_operand.hbm [shape: bf16[16,32], index: 3, kind: input, shape index: {}]   ;;  %s3025_s4 = inlined_call_operand.hbm [shape: f32[1,32], index: 4, kind: input, shape index: {}]   ;;  %s3026_s5 = inlined_call_operand.hbm [shape: bf16[3,131], index: 5, kind: input, shape index: {}]   ;;  %s3027_s6 = inlined_call_operand.hbm [shape: f32[1,131], index: 6, kind: input, shape index: {}]   ;;  %s3028_s7 = inlined_call_operand.hbm [shape: bf16[2,32,64], index: 7, kind: input, shape index: {}]   ;;  %s3029_s8 = inlined_call_operand.hbm [shape: bf16[32,3], index: 8, kind: input, shape index: {}]   ;;  %s3030_s9 = inlined_call_operand.hbm [shape: f32[128,35], index: 9, kind: output, shape index: {}]  }
   0x1   :  { %15 = vsyncpa [#allocation6], 0 }
   0x2   :  { %16 = vsyncpa [#allocation9], 0 }
   0x3   :  { %17 = vsyncpa [#allocation12], 0 }
   0x4   :  { %18 = vsyncpa [#allocation15], 0 }
   0x5   :  { %19 = vsyncpa [#allocation4], 0  ;;  %s2326_s30 = smov [#allocation5]   ;;  %s2327_s11 = smov [#allocation8]  }
   0x6   :  { %s37_s10 = sshll.u32 %s2326_s30, 4  ;;  %s61_s12 = sshll.u32 %s2327_s11, 4  ;;  %s38_s10 = int_to_ptr.vmem [resolvable:$true] %s37_s10  ;;  %s2395_s12 = int_to_ptr.vmem [resolvable:$true] %s61_s12 }
   0x7   :  { %s2094_s15 = scalar_lea.hbm %s3022_s1, 1024 }
   0x8   :  { %p2095_p0 = scmp.ne.s32.totalorder %s3022_s1, %s2094_s15  ;;  %p2098_p1 = scmp.lt.u32.totalorder %s2094_s15, %s3022_s1 }
   0xa   :  { %p2100_p2 = pnand %p2098_p1, %p2095_p0 }
   0xc   :  { %2103 = shalt.err (!%p2100_p2)
}
   0xd   :  { %s2104_s20 = scalar_lea.vmem %s38_s10, 1024  ;;  %p2109_p4 = scmp.lt.s32.totalorder %s38_s10, %s38_s10 }
   0xe   :  { %p2105_p3 = scmp.ne.s32.totalorder %s38_s10, %s2104_s20  ;;  %p2110_p5 = scmp.lt.s32.totalorder %s2104_s20, %s2104_s20 }
  0x10   :  { %p2111_p6 = por %p2110_p5, %p2109_p4 }
  0x12   :  { %p2112_p7 = pnand %p2111_p6, %p2105_p3 }
  0x14   :  { %2115 = shalt.err (!%p2112_p7)
}
  0x15   :  { %s2328_s21 = smov 64   ;;  %s2329_s22 = smov 4  }
  0x16   :  { %43 = dma.hbm_to_vmem [thread:$0]  %s3022_s1, 1024, %s38_s10, [#allocation6], %s2328_s21, %s2328_s21, %s2329_s22  }
  0x17   :  { %s2116_s27 = scalar_lea.hbm %s3024_s3, 128 }
  0x18   :  { %p2117_p8 = scmp.ne.s32.totalorder %s3024_s3, %s2116_s27  ;;  %p2120_p9 = scmp.lt.u32.totalorder %s2116_s27, %s3024_s3 }
  0x1a   :  { %p2122_p10 = pnand %p2120_p9, %p2117_p8 }
  0x1c   :  { %2125 = shalt.err (!%p2122_p10)
}
  0x1d   :  { %s2126_s13 = scalar_lea.vmem %s2395_s12, 128  ;;  %p2131_p12 = scmp.lt.s32.totalorder %s2395_s12, %s2395_s12 }
  0x1e   :  { %p2127_p11 = scmp.ne.s32.totalorder %s2395_s12, %s2126_s13  ;;  %p2132_p13 = scmp.lt.s32.totalorder %s2126_s13, %s2126_s13 }
  0x20   :  { %p2133_p0 = por %p2132_p13, %p2131_p12 }
  0x22   :  { %p2134_p1 = pnand %p2133_p0, %p2127_p11 }
  0x24   :  { %2137 = shalt.err (!%p2134_p1)
}
  0x25   :  { %67 = dma.hbm_to_vmem [thread:$0]  %s3024_s3, 128, %s2395_s12, [#allocation9], %s2328_s21, %s2328_s21, %s2329_s22  }
  0x26   :  { %s2330_s14 = smov [#allocation11]   ;;  %s2331_s16 = smov [#allocation14]  }
  0x27   :  { %s84_s15 = sshll.u32 %s2330_s14, 4  ;;  %s103_s17 = sshll.u32 %s2331_s16, 4  ;;  %s85_s15 = int_to_ptr.vmem [resolvable:$true] %s84_s15  ;;  %s2432_s17 = int_to_ptr.vmem [resolvable:$true] %s103_s17 }
  0x28   :  { %s2138_s20 = scalar_lea.hbm %s3026_s5, 64 }
  0x29   :  { %p2139_p2 = scmp.ne.s32.totalorder %s3026_s5, %s2138_s20  ;;  %p2142_p3 = scmp.lt.u32.totalorder %s2138_s20, %s3026_s5 }
  0x2b   :  { %p2144_p4 = pnand %p2142_p3, %p2139_p2 }
  0x2d   :  { %2147 = shalt.err (!%p2144_p4)
}
  0x2e   :  { %s2148_s3 = scalar_lea.vmem %s85_s15, 64  ;;  %p2153_p6 = scmp.lt.s32.totalorder %s85_s15, %s85_s15 }
  0x2f   :  { %p2149_p5 = scmp.ne.s32.totalorder %s85_s15, %s2148_s3  ;;  %p2154_p7 = scmp.lt.s32.totalorder %s2148_s3, %s2148_s3 }
  0x31   :  { %p2155_p8 = por %p2154_p7, %p2153_p6 }
  0x33   :  { %p2156_p9 = pnand %p2155_p8, %p2149_p5 }
  0x35   :  { %2159 = shalt.err (!%p2156_p9)
}
  0x36   :  { %87 = dma.hbm_to_vmem [thread:$0]  %s3026_s5, 64, %s85_s15, [#allocation12]  }
  0x37   :  { %s2160_s30 = scalar_lea.hbm %s3028_s7, 512 }
  0x38   :  { %p2161_p10 = scmp.ne.s32.totalorder %s3028_s7, %s2160_s30  ;;  %p2164_p11 = scmp.lt.u32.totalorder %s2160_s30, %s3028_s7 }
  0x3a   :  { %p2166_p12 = pnand %p2164_p11, %p2161_p10 }
  0x3c   :  { %2169 = shalt.err (!%p2166_p12)
}
  0x3d   :  { %s2170_s14 = scalar_lea.vmem %s2432_s17, 512  ;;  %p2175_p0 = scmp.lt.s32.totalorder %s2432_s17, %s2432_s17 }
  0x3e   :  { %p2171_p13 = scmp.ne.s32.totalorder %s2432_s17, %s2170_s14  ;;  %p2176_p1 = scmp.lt.s32.totalorder %s2170_s14, %s2170_s14 }
  0x40   :  { %p2177_p2 = por %p2176_p1, %p2175_p0 }
  0x42   :  { %p2178_p3 = pnand %p2177_p2, %p2171_p13 }
  0x44   :  { %2181 = shalt.err (!%p2178_p3)
}
  0x45   :  { %109 = dma.hbm_to_vmem [thread:$0]  %s3028_s7, 512, %s2432_s17, [#allocation15], %s2328_s21, %s2328_s21, %s2329_s22  }
  0x46   :  { %s2332_s16 = smov [#allocation2]   ;;  %s2333_s19 = smov [#allocation7]  }
  0x47   :  { %s25_s18 = sshll.u32 %s2332_s16, 4  ;;  %s49_s20 = sshll.u32 %s2333_s19, 4  ;;  %s26_s18 = int_to_ptr.vmem [resolvable:$true] %s25_s18  ;;  %s2466_s20 = int_to_ptr.vmem [resolvable:$true] %s49_s20 }
  0x48   :  { %s2182_s25 = scalar_lea.hbm %s3021_s0, 1024 }
  0x49   :  { %p2183_p4 = scmp.ne.s32.totalorder %s3021_s0, %s2182_s25  ;;  %p2186_p5 = scmp.lt.u32.totalorder %s2182_s25, %s3021_s0 }
  0x4b   :  { %p2188_p6 = pnand %p2186_p5, %p2183_p4 }
  0x4d   :  { %2191 = shalt.err (!%p2188_p6)
}
  0x4e   :  { %s2192_s7 = scalar_lea.vmem %s26_s18, 1024  ;;  %p2197_p8 = scmp.lt.s32.totalorder %s26_s18, %s26_s18 }
  0x4f   :  { %p2193_p7 = scmp.ne.s32.totalorder %s26_s18, %s2192_s7  ;;  %p2198_p9 = scmp.lt.s32.totalorder %s2192_s7, %s2192_s7 }
  0x51   :  { %p2199_p10 = por %p2198_p9, %p2197_p8 }
  0x53   :  { %p2200_p11 = pnand %p2199_p10, %p2193_p7 }
  0x55   :  { %2203 = shalt.err (!%p2200_p11)
}
  0x56   :  { %31 = dma.hbm_to_vmem [thread:$0]  %s3021_s0, 1024, %s26_s18, [#allocation3], %s2328_s21, %s2328_s21, %s2329_s22  }
  0x57   :  { %s2204_s11 = scalar_lea.hbm %s3023_s2, 1024 }
  0x58   :  { %p2205_p12 = scmp.ne.s32.totalorder %s3023_s2, %s2204_s11  ;;  %p2208_p13 = scmp.lt.u32.totalorder %s2204_s11, %s3023_s2 }
  0x5a   :  { %p2210_p0 = pnand %p2208_p13, %p2205_p12 }
  0x5c   :  { %2213 = shalt.err (!%p2210_p0)
}
  0x5d   :  { %s2214_s5 = scalar_lea.vmem %s2466_s20, 1024  ;;  %p2219_p2 = scmp.lt.s32.totalorder %s2466_s20, %s2466_s20 }
  0x5e   :  { %p2215_p1 = scmp.ne.s32.totalorder %s2466_s20, %s2214_s5  ;;  %p2220_p3 = scmp.lt.s32.totalorder %s2214_s5, %s2214_s5 }
  0x60   :  { %p2221_p4 = por %p2220_p3, %p2219_p2 }
  0x62   :  { %p2222_p5 = pnand %p2221_p4, %p2215_p1 }
  0x64   :  { %2225 = shalt.err (!%p2222_p5)
}
  0x65   :  { %55 = dma.hbm_to_vmem [thread:$0]  %s3023_s2, 1024, %s2466_s20, [#allocation6], %s2328_s21, %s2328_s21, %s2329_s22  }
  0x66   :  { %s2334_s16 = smov [#allocation10]   ;;  %s2335_s19 = smov [#allocation13]  }
  0x67   :  { %s74_s18 = sshll.u32 %s2334_s16, 4  ;;  %s94_s23 = sshll.u32 %s2335_s19, 4  ;;  %s75_s18 = int_to_ptr.vmem [resolvable:$true] %s74_s18  ;;  %s95_s23 = int_to_ptr.vmem [resolvable:$true] %s94_s23 }
  0x68   :  { %s2226_s26 = scalar_lea.hbm %s3025_s4, 16 }
  0x69   :  { %p2227_p6 = scmp.ne.s32.totalorder %s3025_s4, %s2226_s26  ;;  %p2230_p7 = scmp.lt.u32.totalorder %s2226_s26, %s3025_s4 }
  0x6b   :  { %p2232_p8 = pnand %p2230_p7, %p2227_p6 }
  0x6d   :  { %2235 = shalt.err (!%p2232_p8)
}
  0x6e   :  { %s2236_s2 = scalar_lea.vmem %s75_s18, 16  ;;  %s2240_s20 = scalar_lea.vmem %s75_s18, 32 }
  0x6f   :  { %p2237_p9 = scmp.ne.s32.totalorder %s75_s18, %s2236_s2  ;;  %p2241_p10 = scmp.lt.s32.totalorder %s75_s18, %s75_s18 }
  0x70   :  { %p2242_p11 = scmp.lt.s32.totalorder %s2240_s20, %s2236_s2 }
  0x72   :  { %p2243_p12 = por %p2242_p11, %p2241_p10 }
  0x74   :  { %p2244_p13 = pnand %p2243_p12, %p2237_p9 }
  0x76   :  { %2247 = shalt.err (!%p2244_p13)
}
  0x77   :  { %77 = dma.hbm_to_vmem [thread:$0]  %s3025_s4, 16, %s75_s18, [#allocation9]  }
  0x78   :  { %s2248_s11 = scalar_lea.hbm %s3027_s6, 32 }
  0x79   :  { %p2249_p0 = scmp.ne.s32.totalorder %s3027_s6, %s2248_s11  ;;  %p2252_p1 = scmp.lt.u32.totalorder %s2248_s11, %s3027_s6 }
  0x7b   :  { %p2254_p2 = pnand %p2252_p1, %p2249_p0 }
  0x7d   :  { %2257 = shalt.err (!%p2254_p2)
}
  0x7e   :  { %s2258_s5 = scalar_lea.vmem %s95_s23, 32  ;;  %p2263_p4 = scmp.lt.s32.totalorder %s95_s23, %s95_s23 }
  0x7f   :  { %p2259_p3 = scmp.ne.s32.totalorder %s95_s23, %s2258_s5  ;;  %p2264_p5 = scmp.lt.s32.totalorder %s2258_s5, %s2258_s5 }
  0x81   :  { %p2265_p6 = por %p2264_p5, %p2263_p4 }
  0x83   :  { %p2266_p7 = pnand %p2265_p6, %p2259_p3 }
  0x85   :  { %2269 = shalt.err (!%p2266_p7)
}
  0x86   :  { %97 = dma.hbm_to_vmem [thread:$0]  %s3027_s6, 32, %s95_s23, [#allocation12]  }
  0x87   :  { %s2336_s15 = smov [#allocation16]   ;;  %s2270_s24 = scalar_lea.hbm %s3029_s8, 256 }
  0x88   :  { %s115_s16 = sshll.u32 %s2336_s15, 4  ;;  %p2271_p8 = scmp.ne.s32.totalorder %s3029_s8, %s2270_s24  ;;  %s116_s16 = int_to_ptr.vmem [resolvable:$true] %s115_s16 }
  0x89   :  { %p2274_p9 = scmp.lt.u32.totalorder %s2270_s24, %s3029_s8 }
  0x8b   :  { %p2276_p10 = pnand %p2274_p9, %p2271_p8 }
  0x8d   :  { %2279 = shalt.err (!%p2276_p10)
}
  0x8e   :  { %s2280_s27 = scalar_lea.vmem %s116_s16, 256  ;;  %p2285_p12 = scmp.lt.s32.totalorder %s116_s16, %s116_s16 }
  0x8f   :  { %p2281_p11 = scmp.ne.s32.totalorder %s116_s16, %s2280_s27  ;;  %p2286_p13 = scmp.lt.s32.totalorder %s2280_s27, %s2280_s27 }
  0x91   :  { %p2287_p0 = por %p2286_p13, %p2285_p12 }
  0x93   :  { %p2288_p1 = pnand %p2287_p0, %p2281_p11 }
  0x95   :  { %2291 = shalt.err (!%p2288_p1)
}
  0x96   :  { %121 = dma.hbm_to_vmem [thread:$0]  %s3029_s8, 256, %s116_s16, [#allocation15], %s2328_s21, %s2328_s21, %s2329_s22  }
  0x97   :  { %2314 = dma.done.wait [#allocation3], 1024  }
  0x98   :  { %2315 = vsyncadd [#allocation3], 4294966272 }
  0x99   :  { %2316 = dma.done.wait [#allocation6], 2048  }
  0x9a   :  { %2317 = vsyncadd [#allocation6], 4294965248 }
  0x9b   :  { %2318 = dma.done.wait [#allocation9], 144  }
  0x9c   :  { %2319 = vsyncadd [#allocation9], 4294967152 }
  0x9d   :  { %2320 = dma.done.wait [#allocation12], 96  }
  0x9e   :  { %2321 = vsyncadd [#allocation12], 4294967200 }
  0x9f   :  { %2322 = dma.done.wait [#allocation15], 768  }
  0xa0   :  { %2323 = vsyncadd [#allocation15], 4294966528  ;;  %v2337_v0 = vmov 0   ;;  %v2063_v1 = vld [vmem:[#allocation8] sm:$0xff]   ;;  %vm237_vm0 = vcmask 130048   ;;  %vm478_vm1 = vcmask 1040384   ;;  %v394_v27 = vlaneseq }
  0xa1   :  { %520 = vmatprep.mubr.bf16.mxu1 %v2337_v0  ;;  %v2064_v2 = vld [vmem:[#allocation2] sm:$0xff]   ;;  %1902 = vmatprep.subr.bf16.mxu0 %v2063_v1  ;;  %v2065_v3 = vld [vmem:[#allocation2 + $0x8] sm:$0xff]   ;;  %v2066_v4 = vld [vmem:[#allocation2 + $0x10] sm:$0xff]   ;;  %vm479_vm2 = vcmask 1041408   ;;  %v2338_v5 = vmov 65535   ;;  %vm453_vm3 = vcmask 23552  }
  0xa2   :  { %1903 = vmatpush3.bf16.msra.mxu0 %v2063_v1  ;;  %1904 = vmatprep.mubr.msk.bf16.mxu0 %vm237_vm0, %v2064_v2  ;;  %v480_v6 = vsel %vm478_vm1, 4294967295, %v2338_v5  ;;  %v2067_v7 = vld [vmem:[#allocation2 + $0x18] sm:$0xff]   ;;  %v1784_v9 = vld.sshfl [vmem:[#allocation11] sm:$0x33 pattern:$0x76325410] }
  0xa3   :  { %v481_v8 = vsel %vm479_vm2, %v480_v6, 0  ;;  %v2068_v10 = vld [vmem:[#allocation2 + $0x20] sm:$0xff]   ;;  %v452_v11 = vcombine.high %v1784_v9, %v1784_v9  ;;  %v2073_v13 = vld [vmem:[#allocation14] sm:$0xff]   ;;  %v2076_v16 = vld [vmem:[#allocation14 + $0x8] sm:$0xff]   ;;  %v2558_v28 = vshrl.u32 %v394_v27, 7  ;;  %vm625_vm4 = vcmask 261120  }
  0xa4   :  { %v483_v12 = vand.u32 %v1784_v9, %v481_v8  ;;  %v2072_v15 = vld [vmem:[#allocation5] sm:$0xff]   ;;  %1920 = vmatprep.subr.bf16.mxu0 %v2073_v13  ;;  %v2069_v17 = vld [vmem:[#allocation2 + $0x28] sm:$0xff]   ;;  %v2070_v18 = vld [vmem:[#allocation2 + $0x30] sm:$0xff]   ;;  %s2339_s8 = smov 96   ;;  %s2340_s22 = smov 32   ;;  %vm1720_vm6 = vcmask 285696  }
  0xa5   :  { %1905 = vmatmul.mubr.msk.bf16.vlgmr.msra.gmra.mrb[0].mxu0 %vm237_vm0, %v2065_v3  ;;  %v486_v14 = vand.u32 %v481_v8, %v452_v11  ;;  %v2074_v19 = vld [vmem:[#allocation5 + $0x8] sm:$0xff]   ;;  %v2071_v20 = vld [vmem:[#allocation2 + $0x38] sm:$0xff]   ;;  %v2075_v21 = vld [vmem:[#allocation5 + $0x10] sm:$0xff]   ;;  %v400_v30 = vsub.s32 1, %v2558_v28  ;;  %s2341_s7 = smov 67  }
  0xa6   :  { %1908 = vmatprep.mubr.msk.bf16.mxu0 %vm237_vm0, %v2066_v4  ;;  %1921 = vmatpush3.bf16.msra.mxu0 %v2073_v13  ;;  %v2077_v22 = vld [vmem:[#allocation5 + $0x18] sm:$0xff]   ;;  %v2078_v23 = vld [vmem:[#allocation5 + $0x20] sm:$0xff]   ;;  %v2079_v24 = vld [vmem:[#allocation5 + $0x28] sm:$0xff]  }
  0xa7   :  { %488 = vmatprep.subr.bf16.mxu1 %v486_v14  ;;  %1922 = vmatprep.subr.bf16.mxu0 %v2076_v16  ;;  %v2080_v25 = vld [vmem:[#allocation5 + $0x30] sm:$0xff]   ;;  %v2081_v26 = vld [vmem:[#allocation5 + $0x38] sm:$0xff]   ;;  %v2560_v29 = vld [vmem:[#allocation13] sm:$0x3] }
  0xa8   :  { %489 = vmatpush1.bf16.msra.mxu1 %v483_v12  ;;  %v2564_v31 = vrot.slane %v2560_v29, %v400_v30  ;;  %v2566_v32 = vld [vmem:[#allocation10] ss:$0 sm:$0xff] }
  0xaa   :  { %1923 = vmatpush3.bf16.msra.mxu0 %v2076_v16 }
  0xab   :  { %1785 = vmatmul.mubr.msk.bf16.vlgmr.msra.gmra.mrb[0].mxu1 %vm453_vm3, %v2072_v15 }
  0xac   :  { %530 = vmatprep.mubr.bf16.mxu1 %v2337_v0 }
  0xad   :  { %1909 = vmatmul.mubr.msk.bf16.gmra.mrb[4].mxu0 %vm237_vm0, %v2067_v7 }
  0xae   :  { %1912 = vmatprep.mubr.msk.bf16.mxu0 %vm237_vm0, %v2068_v10 }
  0xb3   :  { %1786 = vmatmul.mubr.msk.bf16.gmra.mrb[4].mxu1 %vm453_vm3, %v2074_v19 }
  0xb4   :  { %540 = vmatprep.mubr.bf16.mxu1 %v2337_v0 }
  0xb5   :  { %1913 = vmatmul.mubr.msk.bf16.gmra.mrb[8].mxu0 %vm237_vm0, %v2069_v17 }
  0xb6   :  { %1916 = vmatprep.mubr.msk.bf16.mxu0 %vm237_vm0, %v2070_v18 }
  0xbb   :  { %1787 = vmatmul.mubr.msk.bf16.gmra.mrb[8].mxu1 %vm453_vm3, %v2075_v21 }
  0xbc   :  { %550 = vmatprep.mubr.bf16.mxu1 %v2337_v0 }
  0xbd   :  { %1917 = vmatmul.mubr.msk.bf16.gmra.mrb[12].mxu0 %vm237_vm0, %v2071_v20 }
  0xc3   :  { %1788 = vmatmul.mubr.msk.bf16.gmra.mrb[12].mxu1 %vm453_vm3, %v2077_v22 }
  0xc4   :  { %560 = vmatprep.mubr.bf16.mxu1 %v2337_v0 }
  0xcb   :  { %1789 = vmatmul.mubr.msk.bf16.gmra.mrb[16].mxu1 %vm453_vm3, %v2078_v23 }
  0xcc   :  { %570 = vmatprep.mubr.bf16.mxu1 %v2337_v0 }
  0xd3   :  { %1790 = vmatmul.mubr.msk.bf16.gmra.mrb[20].mxu1 %vm453_vm3, %v2079_v24 }
  0xd4   :  { %580 = vmatprep.mubr.bf16.mxu1 %v2337_v0 }
  0xdb   :  { %1791 = vmatmul.mubr.msk.bf16.gmra.mrb[24].mxu1 %vm453_vm3, %v2080_v25 }
  0xdc   :  { %590 = vmatprep.mubr.bf16.mxu1 %v2337_v0 }
  0xe3   :  { %1792 = vmatmul.mubr.msk.bf16.gmra.mrb[28].mxu1 %vm453_vm3, %v2081_v26 }
 0x178   :  { %v1906_v33 = vpop.f32.mrb[0].mxu0 }
 0x179   :  { %v305_v34 = vadd.f32 %v1906_v33, %v2566_v32  ;;  %v296_v35 = vpop.f32.mrb[1].mxu0 }
 0x17a   :  { %v297_v36 = vadd.f32 %v2566_v32, %v296_v35  ;;  %v1907_v37 = vpop.f32.mrb[2].mxu0 }
 0x17b   :  { %v308_v38 = vadd.f32 %v1907_v37, %v2566_v32  ;;  %v299_v39 = vpop.f32.mrb[3].mxu0  ;;  %v361_v41 = vmax.f32 %v305_v34, 0.0 }
 0x17c   :  { %v300_v40 = vadd.f32 %v2566_v32, %v299_v39  ;;  %v359_v43 = vmax.f32 %v297_v36, 0.0 }
 0x17d   :  { %v362_v42 = vmax.f32 %v308_v38, 0.0 }
 0x17e   :  { %v360_v44 = vmax.f32 %v300_v40, 0.0  ;;  %v2578_v55 = vpop.f32.mrb[0].mxu1 }
 0x17f   :  { %v602_v45 = vpack.c.bf16 %v362_v42, %v361_v41  ;;  %v524_v58 = vpop.f32.mrb[1].mxu1 }
 0x180   :  { %v601_v46 = vpack.c.bf16 %v360_v44, %v359_v43  ;;  %v1910_v47 = vpop.f32.mrb[4].mxu0  ;;  %v2581_v61 = vadd.f32 %v524_v58, %v2564_v31  ;;  %v2583_v62 = vpop.f32.mrb[2].mxu1 }
 0x181   :  { %v321_v48 = vadd.f32 %v1910_v47, %v2566_v32  ;;  %v312_v49 = vpop.f32.mrb[5].mxu0  ;;  %v528_v0 = vpop.f32.mrb[3].mxu1 }
 0x182   :  { %v313_v50 = vadd.f32 %v2566_v32, %v312_v49  ;;  %v1911_v51 = vpop.f32.mrb[6].mxu0  ;;  %1924 = vmatprep.mubr.msk.bf16.mxu0 %vm625_vm4, %v601_v46  ;;  %v2586_v3 = vadd.f32 %v528_v0, %v2564_v31 }
 0x183   :  { %v324_v52 = vadd.f32 %v1911_v51, %v2566_v32  ;;  %v315_v53 = vpop.f32.mrb[7].mxu0  ;;  %1925 = vmatmul.mubr.msk.bf16.vlgmr.msra.gmra.mrb[16].mxu0 %vm625_vm4, %v602_v45  ;;  %v365_v56 = vmax.f32 %v321_v48, 0.0 }
 0x184   :  { %v316_v54 = vadd.f32 %v2566_v32, %v315_v53  ;;  %v363_v59 = vmax.f32 %v313_v50, 0.0 }
 0x185   :  { %v366_v57 = vmax.f32 %v324_v52, 0.0 }
 0x186   :  { %v364_v60 = vmax.f32 %v316_v54, 0.0  ;;  %v2594_v11 = vpop.f32.mrb[4].mxu1 }
 0x187   :  { %v604_v63 = vpack.c.bf16 %v366_v57, %v365_v56  ;;  %v534_v14 = vpop.f32.mrb[5].mxu1 }
 0x188   :  { %v603_v1 = vpack.c.bf16 %v364_v60, %v363_v59  ;;  %v1914_v2 = vpop.f32.mrb[8].mxu0  ;;  %v2597_v17 = vadd.f32 %v534_v14, %v2564_v31  ;;  %v2599_v18 = vpop.f32.mrb[6].mxu1 }
 0x189   :  { %v337_v4 = vadd.f32 %v1914_v2, %v2566_v32  ;;  %v328_v5 = vpop.f32.mrb[9].mxu0  ;;  %v538_v20 = vpop.f32.mrb[7].mxu1 }
 0x18a   :  { %v329_v6 = vadd.f32 %v2566_v32, %v328_v5  ;;  %v1915_v7 = vpop.f32.mrb[10].mxu0  ;;  %1928 = vmatprep.mubr.msk.bf16.mxu0 %vm625_vm4, %v603_v1  ;;  %v2602_v23 = vadd.f32 %v538_v20, %v2564_v31 }
 0x18b   :  { %v340_v8 = vadd.f32 %v1915_v7, %v2566_v32  ;;  %v331_v9 = vpop.f32.mrb[11].mxu0  ;;  %1929 = vmatmul.mubr.msk.bf16.gmra.mrb[20].mxu0 %vm625_vm4, %v604_v63  ;;  %v369_v12 = vmax.f32 %v337_v4, 0.0 }
 0x18c   :  { %v332_v10 = vadd.f32 %v2566_v32, %v331_v9  ;;  %v367_v15 = vmax.f32 %v329_v6, 0.0 }
 0x18d   :  { %v370_v13 = vmax.f32 %v340_v8, 0.0 }
 0x18e   :  { %v368_v16 = vmax.f32 %v332_v10, 0.0  ;;  %v2610_v35 = vpop.f32.mrb[8].mxu1 }
 0x18f   :  { %v606_v19 = vpack.c.bf16 %v370_v13, %v369_v12  ;;  %v544_v38 = vpop.f32.mrb[9].mxu1 }
 0x190   :  { %v605_v21 = vpack.c.bf16 %v368_v16, %v367_v15  ;;  %v1918_v22 = vpop.f32.mrb[12].mxu0  ;;  %v2613_v41 = vadd.f32 %v544_v38, %v2564_v31  ;;  %v546_v42 = vpop.f32.mrb[10].mxu1 }
 0x191   :  { %v353_v24 = vadd.f32 %v1918_v22, %v2566_v32  ;;  %v344_v25 = vpop.f32.mrb[13].mxu0  ;;  %v548_v44 = vpop.f32.mrb[11].mxu1 }
 0x192   :  { %v345_v26 = vadd.f32 %v2566_v32, %v344_v25  ;;  %v1919_v27 = vpop.f32.mrb[14].mxu0  ;;  %1932 = vmatprep.mubr.msk.bf16.mxu0 %vm625_vm4, %v605_v21  ;;  %v2616_v46 = vadd.f32 %v548_v44, %v2564_v31 }
 0x193   :  { %v356_v30 = vadd.f32 %v1919_v27, %v2566_v32  ;;  %v347_v33 = vpop.f32.mrb[15].mxu0  ;;  %1933 = vmatmul.mubr.msk.bf16.gmra.mrb[24].mxu0 %vm625_vm4, %v606_v19  ;;  %v373_v36 = vmax.f32 %v353_v24, 0.0  ;;  %v396_v19 = vsub.s32 0, %v2558_v28 }
 0x194   :  { %v348_v34 = vadd.f32 %v2566_v32, %v347_v33  ;;  %v371_v39 = vmax.f32 %v345_v26, 0.0 }
 0x195   :  { %v374_v37 = vmax.f32 %v356_v30, 0.0  ;;  %v397_v20 = vrot.slane %v2560_v29, %v396_v19 }
 0x196   :  { %v372_v40 = vmax.f32 %v348_v34, 0.0  ;;  %v552_v32 = vpop.f32.mrb[12].mxu1 }
 0x197   :  { %v608_v43 = vpack.c.bf16 %v374_v37, %v373_v36  ;;  %v554_v47 = vpop.f32.mrb[13].mxu1  ;;  %v2657_v24 = vadd.f32 %v2578_v55, %v397_v20  ;;  %v2660_v25 = vadd.f32 %v2583_v62, %v397_v20  ;;  %v2663_v30 = vadd.f32 %v2599_v18, %v397_v20 }
 0x198   :  { %v607_v45 = vpack.c.bf16 %v372_v40, %v371_v39  ;;  %v2621_v48 = vadd.f32 %v554_v47, %v2564_v31  ;;  %v556_v49 = vpop.f32.mrb[14].mxu1  ;;  %v2672_v29 = vadd.f32 %v2594_v11, %v397_v20  ;;  %v2684_v36 = vadd.f32 %v2610_v35, %v397_v20 }
 0x199   :  { %v558_v50 = vpop.f32.mrb[15].mxu1  ;;  %v2686_v37 = vadd.f32 %v546_v42, %v397_v20  ;;  %v2690_v40 = vadd.f32 %v556_v49, %v397_v20 }
 0x19a   :  { %1936 = vmatprep.mubr.msk.bf16.mxu0 %vm625_vm4, %v607_v45  ;;  %v2624_v51 = vadd.f32 %v558_v50, %v2564_v31  ;;  %v2699_v45 = vadd.f32 %v552_v32, %v397_v20 }
 0x19b   :  { %1937 = vmatmul.mubr.msk.bf16.gmra.mrb[28].mxu0 %vm625_vm4, %v608_v43 }
 0x19e   :  { %v562_v52 = vpop.f32.mrb[16].mxu1 }
 0x19f   :  { %v564_v53 = vpop.f32.mrb[17].mxu1 }
 0x1a0   :  { %v2627_v54 = vadd.f32 %v564_v53, %v2564_v31  ;;  %v566_v56 = vpop.f32.mrb[18].mxu1 }
 0x1a1   :  { %v568_v57 = vpop.f32.mrb[19].mxu1  ;;  %v2716_v32 = vadd.f32 %v566_v56, %v397_v20 }
 0x1a2   :  { %3031 = vst [vmem:[#allocation24_spill] sm:$0xff] %v2627_v54  ;;  %v2630_v58 = vadd.f32 %v568_v57, %v2564_v31 }
 0x1a4   :  { %3032 = vst [vmem:[#allocation25_spill] sm:$0xff] %v2630_v58 }
 0x1a6   :  { %v572_v59 = vpop.f32.mrb[20].mxu1 }
 0x1a7   :  { %v574_v60 = vpop.f32.mrb[21].mxu1  ;;  %v2710_v50 = vadd.f32 %v572_v59, %v397_v20 }
 0x1a8   :  { %v2633_v63 = vadd.f32 %v574_v60, %v2564_v31  ;;  %v576_v0 = vpop.f32.mrb[22].mxu1  ;;  %v2714_v60 = vadd.f32 %v562_v52, %v397_v20 }
 0x1a9   :  { %v578_v1 = vpop.f32.mrb[23].mxu1  ;;  %v2712_v53 = vadd.f32 %v576_v0, %v397_v20 }
 0x1aa   :  { %3033 = vst [vmem:[#allocation26_spill] sm:$0xff] %v2633_v63  ;;  %v2636_v2 = vadd.f32 %v578_v1, %v2564_v31 }
 0x1ac   :  { %3034 = vst [vmem:[#allocation27_spill] sm:$0xff] %v2636_v2 }
 0x1ae   :  { %v2638_v4 = vpop.f32.mrb[24].mxu1 }
 0x1af   :  { %v584_v5 = vpop.f32.mrb[25].mxu1 }
 0x1b0   :  { %v2641_v6 = vadd.f32 %v584_v5, %v2564_v31  ;;  %v2643_v7 = vpop.f32.mrb[26].mxu1 }
 0x1b1   :  { %v588_v8 = vpop.f32.mrb[27].mxu1 }
 0x1b2   :  { %3035 = vst [vmem:[#allocation28_spill] sm:$0xff] %v2641_v6  ;;  %v2646_v9 = vadd.f32 %v588_v8, %v2564_v31 }
 0x1b4   :  { %3036 = vst [vmem:[#allocation29_spill] sm:$0xff] %v2646_v9 }
 0x1b6   :  { %v592_v10 = vpop.f32.mrb[28].mxu1 }
 0x1b7   :  { %v594_v12 = vpop.f32.mrb[29].mxu1  ;;  %v2737_v19 = vadd.f32 %v592_v10, %v397_v20 }
 0x1b8   :  { %v2649_v13 = vadd.f32 %v594_v12, %v2564_v31  ;;  %v596_v14 = vpop.f32.mrb[30].mxu1 }
 0x1b9   :  { %v598_v15 = vpop.f32.mrb[31].mxu1 }
 0x1ba   :  { %3037 = vst [vmem:[#allocation30_spill] sm:$0xff] %v2649_v13  ;;  %v2652_v16 = vadd.f32 %v598_v15, %v2564_v31 }
 0x1bc   :  { %3038 = vst [vmem:[#allocation31_spill] sm:$0xff] %v2652_v16 }
 0x256   :  { %v1926_v21 = vpop.f32.mrb[16].mxu0 }
 0x257   :  { %v684_v22 = vpop.f32.mrb[17].mxu0  ;;  %v2680_v33 = vadd.f32 %v1926_v21, %v2672_v29  ;;  %v2739_v21 = vadd.f32 %v596_v14, %v397_v20 }
 0x258   :  { %v1927_v26 = vpop.f32.mrb[18].mxu0  ;;  %v2666_v31 = vadd.f32 %v684_v22, %v2657_v24 }
 0x259   :  { %v687_v27 = vpop.f32.mrb[19].mxu0  ;;  %v2675_v55 = vadd.f32 %v1927_v26, %v2663_v30  ;;  %v2082_v26 = vld [vmem:[#allocation7] sm:$0xff]  }
 0x25a   :  { %v2669_v28 = vadd.f32 %v687_v27, %v2660_v25  ;;  %1956 = vmatprep.mubr.bf16.mxu0 %v2082_v26 }
 0x25b   :  { %v764_v11 = vpack.c.bf16 %v2675_v55, %v2680_v33 }
 0x25c   :  { %v763_v62 = vpack.c.bf16 %v2669_v28, %v2666_v31 }
 0x25e   :  { %827 = vrot.lane.b32.xlu0 %v763_v62, %s2339_s8  ;;  %v1930_v18 = vpop.f32.mrb[20].mxu0  ;;  %v2744_v62 = vadd.f32 %v2638_v4, %v397_v20 }
 0x25f   :  { %v700_v34 = vpop.f32.mrb[21].mxu0  ;;  %v2707_v47 = vadd.f32 %v1930_v18, %v2699_v45  ;;  %v2747_v18 = vadd.f32 %v2643_v7, %v397_v20  ;;  %v2090_v20 = vld [vmem:[#allocation14 + $0x10] sm:$0xff]  }
 0x260   :  { %v1931_v38 = vpop.f32.mrb[22].mxu0  ;;  %v2693_v43 = vadd.f32 %v700_v34, %v2684_v36  ;;  %1972 = vmatprep.subr.bf16.mxu1 %v2090_v20 }
 0x261   :  { %v703_v39 = vpop.f32.mrb[23].mxu0  ;;  %v2702_v35 = vadd.f32 %v1931_v38, %v2690_v40  ;;  %1973 = vmatpush3.bf16.msra.mxu1 %v2090_v20  ;;  %v2781_v20 = vld [vmem:[#allocation7 + $0x30] sm:$0xff]  }
 0x262   :  { %v2696_v44 = vadd.f32 %v703_v39, %v2686_v37  ;;  %829 = vrot.lane.b32.xlu0 %v764_v11, %s2339_s8 }
 0x263   :  { %v766_v1 = vpack.c.bf16 %v2702_v35, %v2707_v47 }
 0x264   :  { %v765_v42 = vpack.c.bf16 %v2696_v44, %v2693_v43 }
 0x266   :  { %831 = vrot.lane.b32.xlu1 %v765_v42, %s2339_s8  ;;  %v1934_v49 = vpop.f32.mrb[24].mxu0  ;;  %v2091_v42 = vld [vmem:[#allocation14 + $0x18] sm:$0xff]  }
 0x267   :  { %v716_v57 = vpop.f32.mrb[25].mxu0  ;;  %v2721_v8 = vadd.f32 %v1934_v49, %v2710_v50  ;;  %1974 = vmatprep.subr.bf16.mxu1 %v2091_v42 }
 0x268   :  { %v1935_v5 = vpop.f32.mrb[26].mxu0  ;;  %v2727_v59 = vadd.f32 %v716_v57, %v2714_v60  ;;  %1975 = vmatpush3.bf16.msra.mxu1 %v2091_v42  ;;  %v2785_v42 = vld [vmem:[#allocation7 + $0x38] sm:$0xff]  }
 0x269   :  { %v2724_v12 = vadd.f32 %v1935_v5, %v2712_v53  ;;  %v719_v15 = vpop.f32.mrb[27].mxu0 }
 0x26a   :  { %v2730_v0 = vadd.f32 %v719_v15, %v2716_v32  ;;  %833 = vrot.lane.b32.xlu1 %v766_v1, %s2339_s8 }
 0x26b   :  { %v768_v52 = vpack.c.bf16 %v2724_v12, %v2721_v8 }
 0x26c   :  { %v767_v56 = vpack.c.bf16 %v2730_v0, %v2727_v59 }
 0x26e   :  { %837 = vrot.lane.b32.xlu1 %v768_v52, %s2339_s8  ;;  %835 = vrot.lane.b32.xlu0 %v767_v56, %s2339_s8  ;;  %v1938_v22 = vpop.f32.mrb[28].mxu0 }
 0x26f   :  { %v732_v27 = vpop.f32.mrb[29].mxu0  ;;  %v2750_v10 = vadd.f32 %v1938_v22, %v2737_v19 }
 0x270   :  { %v1939_v34 = vpop.f32.mrb[30].mxu0  ;;  %v2756_v38 = vadd.f32 %v732_v27, %v2744_v62  ;;  %v2767_v27 = vld [vmem:[#allocation7 + $0x8] sm:$0xff]  }
 0x271   :  { %v2753_v14 = vadd.f32 %v1939_v34, %v2739_v21  ;;  %v735_v11 = vpop.f32.mrb[31].mxu0  ;;  %v2769_v34 = vld [vmem:[#allocation7 + $0x10] sm:$0xff]  }
 0x272   :  { %v2759_v39 = vadd.f32 %v735_v11, %v2747_v18  ;;  %v2773_v11 = vld [vmem:[#allocation7 + $0x18] sm:$0xff]  }
 0x273   :  { %v770_v4 = vpack.c.bf16 %v2753_v14, %v2750_v10 }
 0x274   :  { %v769_v7 = vpack.c.bf16 %v2759_v39, %v2756_v38 }
 0x275   :  { %841 = vrot.lane.b32.xlu1 %v770_v4, %s2339_s8  ;;  %v2775_v4 = vld [vmem:[#allocation7 + $0x20] sm:$0xff]  }
 0x276   :  { %839 = vrot.lane.b32.xlu0 %v769_v7, %s2339_s8  ;;  %v2779_v7 = vld [vmem:[#allocation7 + $0x28] sm:$0xff]  }
 0x2d0   :  { %v828_v49 = vpop.permute.xlu0 %827 }
 0x2d1   :  { %1940 = vmatprep.subr.bf16.mxu0 %v828_v49 }
 0x2d2   :  { %1941 = vmatpush3.bf16.msra.mxu0 %v828_v49 }
 0x2d4   :  { %v830_v57 = vpop.permute.xlu0 %829 }
 0x2d5   :  { %1942 = vmatprep.subr.bf16.mxu0 %v830_v57 }
 0x2d6   :  { %1943 = vmatpush3.bf16.msra.mxu0 %v830_v57 }
 0x2d8   :  { %v832_v1 = vpop.permute.xlu1 %831 }
 0x2d9   :  { %1944 = vmatprep.subr.bf16.mxu0 %v832_v1 }
 0x2da   :  { %1945 = vmatpush3.bf16.msra.mxu0 %v832_v1 }
 0x2dc   :  { %v834_v5 = vpop.permute.xlu1 %833 }
 0x2dd   :  { %1946 = vmatprep.subr.bf16.mxu0 %v834_v5 }
 0x2de   :  { %1947 = vmatpush3.bf16.msra.mxu0 %v834_v5 }
 0x2e0   :  { %v836_v15 = vpop.permute.xlu0 %835  ;;  %v838_v52 = vpop.permute.xlu1 %837 }
 0x2e1   :  { %1948 = vmatprep.subr.bf16.mxu0 %v836_v15 }
 0x2e2   :  { %1949 = vmatpush3.bf16.msra.mxu0 %v836_v15 }
 0x2e3   :  { %1950 = vmatprep.subr.bf16.mxu0 %v838_v52 }
 0x2e6   :  { %1951 = vmatpush3.bf16.msra.mxu0 %v838_v52 }
 0x2e7   :  { %v842_v22 = vpop.permute.xlu1 %841 }
 0x2e8   :  { %v840_v56 = vpop.permute.xlu0 %839 }
 0x2e9   :  { %1952 = vmatprep.subr.bf16.mxu0 %v840_v56 }
 0x2ea   :  { %1953 = vmatpush3.bf16.msra.mxu0 %v840_v56 }
 0x2eb   :  { %1954 = vmatprep.subr.bf16.mxu0 %v842_v22 }
 0x2ee   :  { %1955 = vmatpush3.bf16.msra.mxu0 %v842_v22 }
 0x2f1   :  { %1957 = vmatmul.mubr.bf16.vlgmr.msra.gmra.mrb[32].mxu0 %v2767_v27 }
 0x2f2   :  { %1960 = vmatprep.mubr.bf16.mxu0 %v2769_v34 }
 0x2f9   :  { %1961 = vmatmul.mubr.bf16.gmra.mrb[36].mxu0 %v2773_v11 }
 0x2fa   :  { %1964 = vmatprep.mubr.bf16.mxu0 %v2775_v4 }
 0x301   :  { %1965 = vmatmul.mubr.bf16.gmra.mrb[40].mxu0 %v2779_v7 }
 0x302   :  { %1968 = vmatprep.mubr.bf16.mxu0 %v2781_v20 }
 0x309   :  { %1969 = vmatmul.mubr.bf16.gmra.mrb[44].mxu0 %v2785_v42 }
 0x30a   :  { %2008 = vmatprep.mubr.bf16.mxu0 %v2082_v26 }
 0x3c4   :  { %v1958_v49 = vpop.f32.mrb[32].mxu0 }
 0x3c5   :  { %v950_v57 = vadd.f32 %v1958_v49, %v2680_v33  ;;  %v885_v1 = vpop.f32.mrb[33].mxu0 }
 0x3c6   :  { %v948_v5 = vadd.f32 %v885_v1, %v2666_v31  ;;  %v1959_v15 = vpop.f32.mrb[34].mxu0 }
 0x3c7   :  { %v951_v52 = vadd.f32 %v1959_v15, %v2675_v55  ;;  %v888_v56 = vpop.f32.mrb[35].mxu0  ;;  %v966_v9 = vmax.f32 %v950_v57, 0.0 }
 0x3c8   :  { %v949_v22 = vadd.f32 %v888_v56, %v2669_v28  ;;  %v964_v6 = vmax.f32 %v948_v5, 0.0 }
 0x3c9   :  { %v967_v16 = vmax.f32 %v951_v52, 0.0 }
 0x3ca   :  { %v965_v13 = vmax.f32 %v949_v22, 0.0 }
 0x3cb   :  { %v981_v58 = vpack.c.bf16 %v967_v16, %v966_v9 }
 0x3cc   :  { %v980_v2 = vpack.c.bf16 %v965_v13, %v964_v6  ;;  %v1962_v54 = vpop.f32.mrb[36].mxu0 }
 0x3cd   :  { %v954_v26 = vadd.f32 %v1962_v54, %v2707_v47  ;;  %v901_v63 = vpop.f32.mrb[37].mxu0 }
 0x3ce   :  { %v952_v33 = vadd.f32 %v901_v63, %v2693_v43  ;;  %v1963_v49 = vpop.f32.mrb[38].mxu0  ;;  %1976 = vmatprep.mubr.msk.bf16.mxu1 %vm625_vm4, %v980_v2 }
 0x3cf   :  { %v955_v31 = vadd.f32 %v1963_v49, %v2702_v35  ;;  %v904_v55 = vpop.f32.mrb[39].mxu0  ;;  %1977 = vmatmul.mubr.msk.bf16.vlgmr.msra.gmra.mrb[32].mxu1 %vm625_vm4, %v981_v58  ;;  %v970_v57 = vmax.f32 %v954_v26, 0.0 }
 0x3d0   :  { %v953_v28 = vadd.f32 %v904_v55, %v2696_v44  ;;  %v968_v9 = vmax.f32 %v952_v33, 0.0 }
 0x3d1   :  { %v971_v1 = vmax.f32 %v955_v31, 0.0 }
 0x3d2   :  { %v969_v6 = vmax.f32 %v953_v28, 0.0 }
 0x3d3   :  { %v983_v13 = vpack.c.bf16 %v971_v1, %v970_v57 }
 0x3d4   :  { %v982_v16 = vpack.c.bf16 %v969_v6, %v968_v9  ;;  %v1966_v54 = vpop.f32.mrb[40].mxu0 }
 0x3d5   :  { %v958_v47 = vadd.f32 %v1966_v54, %v2721_v8  ;;  %v917_v63 = vpop.f32.mrb[41].mxu0 }
 0x3d6   :  { %v956_v43 = vadd.f32 %v917_v63, %v2727_v59  ;;  %v1967_v2 = vpop.f32.mrb[42].mxu0  ;;  %1980 = vmatprep.mubr.msk.bf16.mxu1 %vm625_vm4, %v982_v16 }
 0x3d7   :  { %v959_v35 = vadd.f32 %v1967_v2, %v2724_v12  ;;  %v920_v58 = vpop.f32.mrb[43].mxu0  ;;  %1981 = vmatmul.mubr.msk.bf16.gmra.mrb[36].mxu1 %vm625_vm4, %v983_v13  ;;  %v974_v5 = vmax.f32 %v958_v47, 0.0 }
 0x3d8   :  { %v957_v44 = vadd.f32 %v920_v58, %v2730_v0  ;;  %v972_v52 = vmax.f32 %v956_v43, 0.0 }
 0x3d9   :  { %v975_v15 = vmax.f32 %v959_v35, 0.0 }
 0x3da   :  { %v973_v56 = vmax.f32 %v957_v44, 0.0 }
 0x3db   :  { %v985_v22 = vpack.c.bf16 %v975_v15, %v974_v5 }
 0x3dc   :  { %v984_v26 = vpack.c.bf16 %v973_v56, %v972_v52  ;;  %v1970_v8 = vpop.f32.mrb[44].mxu0 }
 0x3dd   :  { %v962_v33 = vadd.f32 %v1970_v8, %v2750_v10  ;;  %v933_v59 = vpop.f32.mrb[45].mxu0 }
 0x3de   :  { %v960_v49 = vadd.f32 %v933_v59, %v2756_v38  ;;  %v1971_v31 = vpop.f32.mrb[46].mxu0  ;;  %1984 = vmatprep.mubr.msk.bf16.mxu1 %vm625_vm4, %v984_v26 }
 0x3df   :  { %v963_v12 = vadd.f32 %v1971_v31, %v2753_v14  ;;  %v936_v55 = vpop.f32.mrb[47].mxu0  ;;  %1985 = vmatmul.mubr.msk.bf16.gmra.mrb[40].mxu1 %vm625_vm4, %v985_v22  ;;  %v978_v28 = vmax.f32 %v962_v33, 0.0 }
 0x3e0   :  { %v961_v0 = vadd.f32 %v936_v55, %v2759_v39  ;;  %v976_v1 = vmax.f32 %v960_v49, 0.0 }
 0x3e1   :  { %v979_v57 = vmax.f32 %v963_v12, 0.0 }
 0x3e2   :  { %v977_v9 = vmax.f32 %v961_v0, 0.0 }
 0x3e3   :  { %v987_v6 = vpack.c.bf16 %v979_v57, %v978_v28 }
 0x3e4   :  { %v986_v13 = vpack.c.bf16 %v977_v9, %v976_v1 }
 0x3e6   :  { %1988 = vmatprep.mubr.msk.bf16.mxu1 %vm625_vm4, %v986_v13 }
 0x3e7   :  { %1989 = vmatmul.mubr.msk.bf16.gmra.mrb[44].mxu1 %vm625_vm4, %v987_v6 }
 0x4a2   :  { %v1978_v10 = vpop.f32.mrb[32].mxu1 }
 0x4a3   :  { %v1063_v38 = vpop.f32.mrb[33].mxu1 }
 0x4a4   :  { %1142 = vrot.lane.b32.xlu0 %v1063_v38, %s2328_s21  ;;  %v1979_v14 = vpop.f32.mrb[34].mxu1 }
 0x4a5   :  { %v1066_v16 = vpop.f32.mrb[35].mxu1 }
 0x4a6   :  { %1144 = vrot.lane.b32.xlu1 %v1066_v16, %s2328_s21 }
 0x4a8   :  { %1146 = vrot.lane.b32.xlu0 %v1978_v10, %s2328_s21 }
 0x4aa   :  { %1148 = vrot.lane.b32.xlu1 %v1979_v14, %s2328_s21  ;;  %v1982_v39 = vpop.f32.mrb[36].mxu1 }
 0x4ab   :  { %v1079_v54 = vpop.f32.mrb[37].mxu1 }
 0x4ac   :  { %1150 = vrot.lane.b32.xlu0 %v1079_v54, %s2328_s21  ;;  %v1983_v47 = vpop.f32.mrb[38].mxu1 }
 0x4ad   :  { %v1082_v63 = vpop.f32.mrb[39].mxu1 }
 0x4ae   :  { %1152 = vrot.lane.b32.xlu1 %v1082_v63, %s2328_s21 }
 0x4b0   :  { %1154 = vrot.lane.b32.xlu0 %v1982_v39, %s2328_s21 }
 0x4b2   :  { %1156 = vrot.lane.b32.xlu1 %v1983_v47, %s2328_s21  ;;  %v1986_v43 = vpop.f32.mrb[40].mxu1 }
 0x4b3   :  { %v1095_v2 = vpop.f32.mrb[41].mxu1 }
 0x4b4   :  { %1158 = vrot.lane.b32.xlu0 %v1095_v2, %s2328_s21  ;;  %v1987_v35 = vpop.f32.mrb[42].mxu1 }
 0x4b5   :  { %v1098_v58 = vpop.f32.mrb[43].mxu1 }
 0x4b6   :  { %1160 = vrot.lane.b32.xlu1 %v1098_v58, %s2328_s21 }
 0x4b8   :  { %1162 = vrot.lane.b32.xlu0 %v1986_v43, %s2328_s21 }
 0x4ba   :  { %1164 = vrot.lane.b32.xlu1 %v1987_v35, %s2328_s21  ;;  %v1990_v44 = vpop.f32.mrb[44].mxu1 }
 0x4bb   :  { %v1111_v5 = vpop.f32.mrb[45].mxu1 }
 0x4bc   :  { %1166 = vrot.lane.b32.xlu0 %v1111_v5, %s2328_s21  ;;  %v1991_v15 = vpop.f32.mrb[46].mxu1 }
 0x4bd   :  { %v1114_v52 = vpop.f32.mrb[47].mxu1 }
 0x4be   :  { %1168 = vrot.lane.b32.xlu1 %v1114_v52, %s2328_s21 }
 0x4c0   :  { %1170 = vrot.lane.b32.xlu0 %v1990_v44, %s2328_s21 }
 0x4c2   :  { %1172 = vrot.lane.b32.xlu1 %v1991_v15, %s2328_s21 }
 0x516   :  { %v1143_v56 = vpop.permute.xlu0 %1142 }
 0x517   :  { %v2829_v26 = vadd.f32 %v1143_v56, %v2657_v24 }
 0x518   :  { %v1145_v22 = vpop.permute.xlu1 %1144 }
 0x519   :  { %v2832_v8 = vadd.f32 %v1145_v22, %v2660_v25 }
 0x51a   :  { %v1147_v33 = vpop.permute.xlu0 %1146 }
 0x51b   :  { %v1206_v59 = vpack.c.bf16 %v2832_v8, %v2829_v26  ;;  %v2837_v31 = vadd.f32 %v1147_v33, %v2672_v29 }
 0x51c   :  { %v1149_v49 = vpop.permute.xlu1 %1148 }
 0x51d   :  { %v2840_v12 = vadd.f32 %v1149_v49, %v2663_v30  ;;  %1222 = vrot.lane.b32.xlu0 %v1206_v59, %s2340_s22 }
 0x51e   :  { %v1151_v55 = vpop.permute.xlu0 %1150 }
 0x51f   :  { %v1207_v24 = vpack.c.bf16 %v2840_v12, %v2837_v31  ;;  %v2846_v0 = vadd.f32 %v1151_v55, %v2684_v36 }
 0x520   :  { %v1153_v25 = vpop.permute.xlu1 %1152 }
 0x521   :  { %v2849_v28 = vadd.f32 %v1153_v25, %v2686_v37  ;;  %1224 = vrot.lane.b32.xlu1 %v1207_v24, %s2340_s22 }
 0x522   :  { %v1155_v29 = vpop.permute.xlu0 %1154 }
 0x523   :  { %v1208_v30 = vpack.c.bf16 %v2849_v28, %v2846_v0  ;;  %v2855_v1 = vadd.f32 %v1155_v29, %v2699_v45  ;;  %v2092_v29 = vld [vmem:[#allocation16] sm:$0xff]  }
 0x524   :  { %v1157_v57 = vpop.permute.xlu1 %1156  ;;  %2024 = vmatprep.subr.bf16.mxu1 %v2092_v29 }
 0x525   :  { %v2858_v9 = vadd.f32 %v1157_v57, %v2690_v40  ;;  %1226 = vrot.lane.b32.xlu0 %v1208_v30, %s2340_s22  ;;  %v2093_v30 = vld [vmem:[#allocation16 + $0x8] sm:$0xff]   ;;  %2025 = vmatpush3.bf16.msra.mxu1 %v2092_v29 }
 0x526   :  { %v1159_v36 = vpop.permute.xlu0 %1158  ;;  %2026 = vmatprep.subr.bf16.mxu1 %v2093_v30 }
 0x527   :  { %v1209_v37 = vpack.c.bf16 %v2858_v9, %v2855_v1  ;;  %v2864_v13 = vadd.f32 %v1159_v36, %v2714_v60 }
 0x528   :  { %v1161_v6 = vpop.permute.xlu1 %1160 }
 0x529   :  { %v2867_v10 = vadd.f32 %v1161_v6, %v2716_v32  ;;  %1228 = vrot.lane.b32.xlu1 %v1209_v37, %s2340_s22  ;;  %2027 = vmatpush3.bf16.msra.mxu1 %v2093_v30 }
 0x52a   :  { %v1163_v45 = vpop.permute.xlu0 %1162 }
 0x52b   :  { %v1210_v40 = vpack.c.bf16 %v2867_v10, %v2864_v13  ;;  %v2873_v14 = vadd.f32 %v1163_v45, %v2710_v50 }
 0x52c   :  { %v1165_v38 = vpop.permute.xlu1 %1164 }
 0x52d   :  { %v2876_v16 = vadd.f32 %v1165_v38, %v2712_v53  ;;  %1230 = vrot.lane.b32.xlu0 %v1210_v40, %s2340_s22 }
 0x52e   :  { %v1167_v60 = vpop.permute.xlu0 %1166 }
 0x52f   :  { %v1211_v32 = vpack.c.bf16 %v2876_v16, %v2873_v14  ;;  %v2882_v54 = vadd.f32 %v1167_v60, %v2744_v62 }
 0x530   :  { %v1169_v39 = vpop.permute.xlu1 %1168 }
 0x531   :  { %v2885_v47 = vadd.f32 %v1169_v39, %v2747_v18  ;;  %1232 = vrot.lane.b32.xlu1 %v1211_v32, %s2340_s22 }
 0x532   :  { %v1171_v50 = vpop.permute.xlu0 %1170 }
 0x533   :  { %v1212_v53 = vpack.c.bf16 %v2885_v47, %v2882_v54  ;;  %v2891_v43 = vadd.f32 %v1171_v50, %v2737_v19 }
 0x534   :  { %v1173_v63 = vpop.permute.xlu1 %1172 }
 0x535   :  { %v2894_v2 = vadd.f32 %v1173_v63, %v2739_v21  ;;  %1234 = vrot.lane.b32.xlu0 %v1212_v53, %s2340_s22 }
 0x537   :  { %v1213_v62 = vpack.c.bf16 %v2894_v2, %v2891_v43 }
 0x539   :  { %1236 = vrot.lane.b32.xlu1 %v1213_v62, %s2340_s22 }
 0x58f   :  { %v1223_v18 = vpop.permute.xlu0 %1222 }
 0x590   :  { %1992 = vmatprep.subr.bf16.mxu0 %v1223_v18 }
 0x591   :  { %1993 = vmatpush3.bf16.msra.mxu0 %v1223_v18 }
 0x593   :  { %v1225_v35 = vpop.permute.xlu1 %1224 }
 0x594   :  { %1994 = vmatprep.subr.bf16.mxu0 %v1225_v35 }
 0x595   :  { %1995 = vmatpush3.bf16.msra.mxu0 %v1225_v35 }
 0x597   :  { %v1227_v58 = vpop.permute.xlu0 %1226 }
 0x598   :  { %1996 = vmatprep.subr.bf16.mxu0 %v1227_v58 }
 0x599   :  { %1997 = vmatpush3.bf16.msra.mxu0 %v1227_v58 }
 0x59b   :  { %v1229_v19 = vpop.permute.xlu1 %1228 }
 0x59c   :  { %1998 = vmatprep.subr.bf16.mxu0 %v1229_v19 }
 0x59d   :  { %1999 = vmatpush3.bf16.msra.mxu0 %v1229_v19 }
 0x59f   :  { %v1231_v21 = vpop.permute.xlu0 %1230 }
 0x5a0   :  { %2000 = vmatprep.subr.bf16.mxu0 %v1231_v21 }
 0x5a1   :  { %2001 = vmatpush3.bf16.msra.mxu0 %v1231_v21 }
 0x5a3   :  { %v1233_v44 = vpop.permute.xlu1 %1232 }
 0x5a4   :  { %2002 = vmatprep.subr.bf16.mxu0 %v1233_v44 }
 0x5a5   :  { %2003 = vmatpush3.bf16.msra.mxu0 %v1233_v44 }
 0x5a7   :  { %v1235_v5 = vpop.permute.xlu0 %1234 }
 0x5a8   :  { %2004 = vmatprep.subr.bf16.mxu0 %v1235_v5 }
 0x5a9   :  { %2005 = vmatpush3.bf16.msra.mxu0 %v1235_v5 }
 0x5ab   :  { %v1237_v15 = vpop.permute.xlu1 %1236 }
 0x5ac   :  { %2006 = vmatprep.subr.bf16.mxu0 %v1237_v15 }
 0x5ad   :  { %2007 = vmatpush3.bf16.msra.mxu0 %v1237_v15 }
 0x5b0   :  { %2009 = vmatmul.mubr.bf16.vlgmr.msra.gmra.mrb[48].mxu0 %v2767_v27 }
 0x5b1   :  { %2012 = vmatprep.mubr.bf16.mxu0 %v2769_v34 }
 0x5b8   :  { %2013 = vmatmul.mubr.bf16.gmra.mrb[52].mxu0 %v2773_v11 }
 0x5b9   :  { %2016 = vmatprep.mubr.bf16.mxu0 %v2775_v4 }
 0x5c0   :  { %2017 = vmatmul.mubr.bf16.gmra.mrb[56].mxu0 %v2779_v7 }
 0x5c1   :  { %2020 = vmatprep.mubr.bf16.mxu0 %v2781_v20 }
 0x5c8   :  { %2021 = vmatmul.mubr.bf16.gmra.mrb[60].mxu0 %v2785_v42 }
 0x683   :  { %v2010_v52 = vpop.f32.mrb[48].mxu0 }
 0x684   :  { %v1280_v56 = vpop.f32.mrb[49].mxu0 }
 0x685   :  { %1359 = vrot.lane.b32.xlu0 %v1280_v56, %s2328_s21  ;;  %v2011_v22 = vpop.f32.mrb[50].mxu0 }
 0x686   :  { %v1283_v33 = vpop.f32.mrb[51].mxu0 }
 0x687   :  { %1361 = vrot.lane.b32.xlu1 %v1283_v33, %s2328_s21 }
 0x689   :  { %1363 = vrot.lane.b32.xlu0 %v2010_v52, %s2328_s21 }
 0x68b   :  { %1365 = vrot.lane.b32.xlu1 %v2011_v22, %s2328_s21  ;;  %v2014_v27 = vpop.f32.mrb[52].mxu0 }
 0x68c   :  { %v1296_v34 = vpop.f32.mrb[53].mxu0 }
 0x68d   :  { %1367 = vrot.lane.b32.xlu0 %v1296_v34, %s2328_s21  ;;  %v2015_v11 = vpop.f32.mrb[54].mxu0 }
 0x68e   :  { %v1299_v4 = vpop.f32.mrb[55].mxu0 }
 0x68f   :  { %1369 = vrot.lane.b32.xlu1 %v1299_v4, %s2328_s21 }
 0x691   :  { %1371 = vrot.lane.b32.xlu0 %v2014_v27, %s2328_s21 }
 0x693   :  { %1373 = vrot.lane.b32.xlu1 %v2015_v11, %s2328_s21  ;;  %v2018_v7 = vpop.f32.mrb[56].mxu0 }
 0x694   :  { %v1312_v20 = vpop.f32.mrb[57].mxu0 }
 0x695   :  { %1375 = vrot.lane.b32.xlu0 %v1312_v20, %s2328_s21  ;;  %v2019_v42 = vpop.f32.mrb[58].mxu0 }
 0x696   :  { %v1315_v59 = vpop.f32.mrb[59].mxu0 }
 0x697   :  { %1377 = vrot.lane.b32.xlu1 %v1315_v59, %s2328_s21 }
 0x699   :  { %1379 = vrot.lane.b32.xlu0 %v2018_v7, %s2328_s21 }
 0x69b   :  { %1381 = vrot.lane.b32.xlu1 %v2019_v42, %s2328_s21  ;;  %v2022_v49 = vpop.f32.mrb[60].mxu0 }
 0x69c   :  { %v1328_v55 = vpop.f32.mrb[61].mxu0 }
 0x69d   :  { %1383 = vrot.lane.b32.xlu0 %v1328_v55, %s2328_s21  ;;  %v2023_v24 = vpop.f32.mrb[62].mxu0 }
 0x69e   :  { %v1331_v25 = vpop.f32.mrb[63].mxu0 }
 0x69f   :  { %1385 = vrot.lane.b32.xlu1 %v1331_v25, %s2328_s21 }
 0x6a1   :  { %1387 = vrot.lane.b32.xlu0 %v2022_v49, %s2328_s21 }
 0x6a3   :  { %1389 = vrot.lane.b32.xlu1 %v2023_v24, %s2328_s21 }
 0x6f7   :  { %v1360_v57 = vpop.permute.xlu0 %1359 }
 0x6f8   :  { %v2924_v36 = vadd.f32 %v1360_v57, %v2829_v26 }
 0x6f9   :  { %v1362_v37 = vpop.permute.xlu1 %1361 }
 0x6fa   :  { %v2927_v6 = vadd.f32 %v1362_v37, %v2832_v8  ;;  %v1423_v40 = vmax.f32 %v2924_v36, 0.0 }
 0x6fb   :  { %v1364_v45 = vpop.permute.xlu0 %1363 }
 0x6fc   :  { %v1424_v38 = vmax.f32 %v2927_v6, 0.0  ;;  %v1409_v60 = vadd.f32 %v1364_v45, %v2837_v31 }
 0x6fd   :  { %v1366_v32 = vpop.permute.xlu1 %1365 }
 0x6fe   :  { %v1410_v39 = vadd.f32 %v1366_v32, %v2840_v12  ;;  %v1439_v50 = vpack.c.bf16 %v1424_v38, %v1423_v40  ;;  %v1425_v63 = vmax.f32 %v1409_v60, 0.0 }
 0x6ff   :  { %v1368_v53 = vpop.permute.xlu0 %1367 }
 0x700   :  { %v1426_v62 = vmax.f32 %v1410_v39, 0.0  ;;  %v1411_v26 = vadd.f32 %v1368_v53, %v2846_v0  ;;  %1459 = vrot.lane.b32.xlu0 %v1439_v50, %s2328_s21 }
 0x701   :  { %v1370_v8 = vpop.permute.xlu1 %1369 }
 0x702   :  { %v1412_v18 = vadd.f32 %v1370_v8, %v2849_v28  ;;  %v1440_v35 = vpack.c.bf16 %v1426_v62, %v1425_v63  ;;  %v1427_v19 = vmax.f32 %v1411_v26, 0.0 }
 0x703   :  { %v1372_v58 = vpop.permute.xlu0 %1371 }
 0x704   :  { %v1428_v21 = vmax.f32 %v1412_v18, 0.0  ;;  %v1413_v31 = vadd.f32 %v1372_v58, %v2855_v1  ;;  %1461 = vrot.lane.b32.xlu1 %v1440_v35, %s2328_s21 }
 0x705   :  { %v1374_v12 = vpop.permute.xlu1 %1373 }
 0x706   :  { %v1414_v44 = vadd.f32 %v1374_v12, %v2858_v9  ;;  %v1441_v5 = vpack.c.bf16 %v1428_v21, %v1427_v19  ;;  %v1429_v52 = vmax.f32 %v1413_v31, 0.0 }
 0x707   :  { %v1376_v15 = vpop.permute.xlu0 %1375 }
 0x708   :  { %v1430_v0 = vmax.f32 %v1414_v44, 0.0  ;;  %v1415_v56 = vadd.f32 %v1376_v15, %v2864_v13  ;;  %1463 = vrot.lane.b32.xlu0 %v1441_v5, %s2328_s21 }
 0x709   :  { %v1378_v28 = vpop.permute.xlu1 %1377 }
 0x70a   :  { %v1416_v22 = vadd.f32 %v1378_v28, %v2867_v10  ;;  %v1442_v33 = vpack.c.bf16 %v1430_v0, %v1429_v52  ;;  %v1431_v34 = vmax.f32 %v1415_v56, 0.0 }
 0x70b   :  { %v1380_v27 = vpop.permute.xlu0 %1379 }
 0x70c   :  { %v1432_v1 = vmax.f32 %v1416_v22, 0.0  ;;  %v1417_v11 = vadd.f32 %v1380_v27, %v2873_v14  ;;  %1465 = vrot.lane.b32.xlu1 %v1442_v33, %s2328_s21 }
 0x70d   :  { %v1382_v9 = vpop.permute.xlu1 %1381 }
 0x70e   :  { %v1418_v4 = vadd.f32 %v1382_v9, %v2876_v16  ;;  %v1443_v7 = vpack.c.bf16 %v1432_v1, %v1431_v34  ;;  %v1433_v42 = vmax.f32 %v1417_v11, 0.0 }
 0x70f   :  { %v1384_v20 = vpop.permute.xlu0 %1383 }
 0x710   :  { %v1434_v13 = vmax.f32 %v1418_v4, 0.0  ;;  %v1419_v59 = vadd.f32 %v1384_v20, %v2882_v54  ;;  %1467 = vrot.lane.b32.xlu0 %v1443_v7, %s2328_s21 }
 0x711   :  { %v1386_v10 = vpop.permute.xlu1 %1385 }
 0x712   :  { %v1420_v49 = vadd.f32 %v1386_v10, %v2885_v47  ;;  %v1444_v55 = vpack.c.bf16 %v1434_v13, %v1433_v42  ;;  %v1435_v25 = vmax.f32 %v1419_v59, 0.0 }
 0x713   :  { %v1388_v24 = vpop.permute.xlu0 %1387 }
 0x714   :  { %v1436_v14 = vmax.f32 %v1420_v49, 0.0  ;;  %v1421_v29 = vadd.f32 %v1388_v24, %v2891_v43  ;;  %1469 = vrot.lane.b32.xlu1 %v1444_v55, %s2328_s21  ;;  %v3039_v49 = vld [vmem:[#allocation26_spill] sm:$0xff] }
 0x715   :  { %v1390_v16 = vpop.permute.xlu1 %1389 }
 0x716   :  { %v1422_v30 = vadd.f32 %v1390_v16, %v2894_v2  ;;  %v1445_v57 = vpack.c.bf16 %v1436_v14, %v1435_v25  ;;  %v1437_v36 = vmax.f32 %v1421_v29, 0.0 }
 0x718   :  { %v1438_v37 = vmax.f32 %v1422_v30, 0.0  ;;  %1471 = vrot.lane.b32.xlu0 %v1445_v57, %s2328_s21  ;;  %v3041_v30 = vld [vmem:[#allocation27_spill] sm:$0xff] }
 0x71a   :  { %v1446_v54 = vpack.c.bf16 %v1438_v37, %v1437_v36 }
 0x71c   :  { %1656 = vrot.lane.b32.xlu0 %v1423_v40, %s2341_s7  ;;  %1473 = vrot.lane.b32.xlu1 %v1446_v54, %s2328_s21  ;;  %v3042_v54 = vld [vmem:[#allocation25_spill] sm:$0xff]  ;;  %s2342_s21 = smov [#allocation17]  }
 0x71d   :  { %s1742_s2 = sshll.u32 %s2342_s21, 4  ;;  %s1743_s2 = int_to_ptr.vmem [resolvable:$true] %s1742_s2 }
 0x71e   :  { %s2292_s20 = scalar_lea.vmem %s1743_s2, 2048  ;;  %p2297_p3 = scmp.lt.s32.totalorder %s1743_s2, %s1743_s2 }
 0x71f   :  { %p2293_p2 = scmp.ne.s32.totalorder %s1743_s2, %s2292_s20  ;;  %p2298_p4 = scmp.lt.s32.totalorder %s2292_s20, %s2292_s20 }
 0x720   :  { %1660 = vrot.lane.b32.xlu0 %v1425_v63, %s2341_s7  ;;  %1658 = vrot.lane.b32.xlu1 %v1424_v38, %s2341_s7 }
 0x721   :  { %p2299_p5 = por %p2298_p4, %p2297_p3 }
 0x723   :  { %p2300_p6 = pnand %p2299_p5, %p2293_p2 }
 0x724   :  { %1664 = vrot.lane.b32.xlu0 %v1427_v19, %s2341_s7  ;;  %1662 = vrot.lane.b32.xlu1 %v1426_v62, %s2341_s7 }
 0x728   :  { %1668 = vrot.lane.b32.xlu0 %v1429_v52, %s2341_s7  ;;  %1666 = vrot.lane.b32.xlu1 %v1428_v21, %s2341_s7 }
 0x72c   :  { %1672 = vrot.lane.b32.xlu0 %v1431_v34, %s2341_s7  ;;  %1670 = vrot.lane.b32.xlu1 %v1430_v0, %s2341_s7 }
 0x730   :  { %1676 = vrot.lane.b32.xlu0 %v1433_v42, %s2341_s7  ;;  %1674 = vrot.lane.b32.xlu1 %v1432_v1, %s2341_s7 }
 0x734   :  { %1680 = vrot.lane.b32.xlu0 %v1435_v25, %s2341_s7  ;;  %1678 = vrot.lane.b32.xlu1 %v1434_v13, %s2341_s7 }
 0x738   :  { %1684 = vrot.lane.b32.xlu0 %v1437_v36, %s2341_s7  ;;  %1682 = vrot.lane.b32.xlu1 %v1436_v14, %s2341_s7  ;;  %v3040_v14 = vld [vmem:[#allocation24_spill] sm:$0xff] }
 0x73c   :  { %1686 = vrot.lane.b32.xlu1 %v1438_v37, %s2341_s7 }
 0x772   :  { %v1460_v47 = vpop.permute.xlu0 %1459 }
 0x773   :  { %2028 = vmatprep.mubr.msk.bf16.mxu1 %vm625_vm4, %v1460_v47 }
 0x776   :  { %v1462_v43 = vpop.permute.xlu1 %1461 }
 0x777   :  { %2029 = vmatmul.mubr.msk.bf16.vlgmr.msra.gmra.mrb[48].mxu1 %vm625_vm4, %v1462_v43 }
 0x77a   :  { %v1464_v2 = vpop.permute.xlu0 %1463 }
 0x77b   :  { %2032 = vmatprep.mubr.msk.bf16.mxu1 %vm625_vm4, %v1464_v2 }
 0x77e   :  { %v1466_v6 = vpop.permute.xlu1 %1465 }
 0x77f   :  { %2033 = vmatmul.mubr.msk.bf16.gmra.mrb[52].mxu1 %vm625_vm4, %v1466_v6 }
 0x782   :  { %v1468_v45 = vpop.permute.xlu0 %1467 }
 0x783   :  { %2036 = vmatprep.mubr.msk.bf16.mxu1 %vm625_vm4, %v1468_v45 }
 0x786   :  { %v1470_v40 = vpop.permute.xlu1 %1469 }
 0x787   :  { %2037 = vmatmul.mubr.msk.bf16.gmra.mrb[56].mxu1 %vm625_vm4, %v1470_v40 }
 0x78a   :  { %v1472_v38 = vpop.permute.xlu0 %1471 }
 0x78b   :  { %2040 = vmatprep.mubr.msk.bf16.mxu1 %vm625_vm4, %v1472_v38 }
 0x78e   :  { %v1474_v60 = vpop.permute.xlu1 %1473  ;;  %v1657_v32 = vpop.permute.xlu0 %1656 }
 0x78f   :  { %2041 = vmatmul.mubr.msk.bf16.gmra.mrb[60].mxu1 %vm625_vm4, %v1474_v60 }
 0x792   :  { %v1659_v39 = vpop.permute.xlu1 %1658  ;;  %v1661_v50 = vpop.permute.xlu0 %1660 }
 0x796   :  { %v1663_v53 = vpop.permute.xlu1 %1662  ;;  %v1665_v63 = vpop.permute.xlu0 %1664 }
 0x79a   :  { %v1667_v62 = vpop.permute.xlu1 %1666  ;;  %v1669_v31 = vpop.permute.xlu0 %1668 }
 0x79e   :  { %v1671_v52 = vpop.permute.xlu1 %1670  ;;  %v1673_v33 = vpop.permute.xlu0 %1672 }
 0x7a2   :  { %v1675_v9 = vpop.permute.xlu1 %1674  ;;  %v1677_v59 = vpop.permute.xlu0 %1676 }
 0x7a6   :  { %v1679_v25 = vpop.permute.xlu1 %1678  ;;  %v1681_v6 = vpop.permute.xlu0 %1680 }
 0x84a   :  { %v2030_v26 = vpop.f32.mrb[48].mxu1 }
 0x84b   :  { %v1554_v8 = vadd.f32 %v2030_v26, %v2597_v17  ;;  %v1545_v18 = vpop.f32.mrb[49].mxu1  ;;  %v3044_v26 = vld [vmem:[#allocation28_spill] sm:$0xff] }
 0x84c   :  { %v1546_v35 = vadd.f32 %v1545_v18, %v2581_v61  ;;  %v2031_v58 = vpop.f32.mrb[50].mxu1 }
 0x84d   :  { %vm1610_vm5 = vcmp.ne.f32.partialorder %v1554_v8, %v1554_v8  ;;  %v1557_v19 = vadd.f32 %v2031_v58, %v2602_v23  ;;  %v1548_v21 = vpop.f32.mrb[51].mxu1 }
 0x84e   :  { %v1626_v12 = vsel %vm1610_vm5, 0.0, %v1554_v8  ;;  %vm1608_vm7 = vcmp.ne.f32.partialorder %v1546_v35, %v1546_v35  ;;  %v1549_v44 = vadd.f32 %v1548_v21, %v2586_v3  ;;  %v1685_v21 = vpop.permute.xlu0 %1684 }
 0x84f   :  { %v1706_v5 = vsel %vm453_vm3, %v1626_v12, %v1661_v50  ;;  %v1624_v15 = vsel %vm1608_vm7, 0.0, %v1546_v35  ;;  %vm1611_vm8 = vcmp.ne.f32.partialorder %v1557_v19, %v1557_v19  ;;  %v3045_v35 = vld [vmem:[#allocation31_spill] sm:$0xff]  ;;  %v3046_v12 = vld [vmem:[#allocation29_spill] sm:$0xff] }
 0x850   :  { %1723 = vst.msk [vmem:[#allocation17 + $0x10] sm:$0xff] %vm1720_vm6, %v1706_v5  ;;  %v1704_v61 = vsel %vm453_vm3, %v1624_v15, %v1657_v32  ;;  %v1627_v17 = vsel %vm1611_vm8, 0.0, %v1557_v19  ;;  %vm1609_vm9 = vcmp.ne.f32.partialorder %v1549_v44, %v1549_v44  ;;  %v1683_v32 = vpop.permute.xlu1 %1682 }
 0x851   :  { %1721 = vst.msk [vmem:[#allocation17] sm:$0xff] %vm1720_vm6, %v1704_v61  ;;  %v1707_v23 = vsel %vm453_vm3, %v1627_v17, %v1663_v53  ;;  %v1625_v0 = vsel %vm1609_vm9, 0.0, %v1549_v44  ;;  %v3043_v53 = vld [vmem:[#allocation30_spill] sm:$0xff] }
 0x852   :  { %1724 = vst.msk [vmem:[#allocation17 + $0x18] sm:$0xff] %vm1720_vm6, %v1707_v23  ;;  %v1705_v3 = vsel %vm453_vm3, %v1625_v0, %v1659_v39  ;;  %v2034_v56 = vpop.f32.mrb[52].mxu1 }
 0x853   :  { %1722 = vst.msk [vmem:[#allocation17 + $0x8] sm:$0xff] %vm1720_vm6, %v1705_v3  ;;  %v1570_v28 = vadd.f32 %v2034_v56, %v2621_v48  ;;  %v1561_v22 = vpop.f32.mrb[53].mxu1 }
 0x854   :  { %v1562_v27 = vadd.f32 %v1561_v22, %v2613_v41  ;;  %v2035_v34 = vpop.f32.mrb[54].mxu1 }
 0x855   :  { %vm1614_vm10 = vcmp.ne.f32.partialorder %v1570_v28, %v1570_v28  ;;  %v1573_v1 = vadd.f32 %v2035_v34, %v2624_v51  ;;  %v1564_v11 = vpop.f32.mrb[55].mxu1 }
 0x856   :  { %v1630_v4 = vsel %vm1614_vm10, 0.0, %v1570_v28  ;;  %vm1612_vm11 = vcmp.ne.f32.partialorder %v1562_v27, %v1562_v27  ;;  %v1565_v7 = vadd.f32 %v1564_v11, %v2616_v46 }
 0x857   :  { %v1710_v20 = vsel %vm453_vm3, %v1630_v4, %v1669_v31  ;;  %v1628_v42 = vsel %vm1612_vm11, 0.0, %v1562_v27  ;;  %vm1615_vm12 = vcmp.ne.f32.partialorder %v1573_v1, %v1573_v1 }
 0x858   :  { %1727 = vst.msk [vmem:[#allocation17 + $0x30] sm:$0xff] %vm1720_vm6, %v1710_v20  ;;  %v1708_v48 = vsel %vm453_vm3, %v1628_v42, %v1665_v63  ;;  %v1631_v13 = vsel %vm1615_vm12, 0.0, %v1573_v1  ;;  %vm1613_vm13 = vcmp.ne.f32.partialorder %v1565_v7, %v1565_v7 }
 0x859   :  { %1725 = vst.msk [vmem:[#allocation17 + $0x20] sm:$0xff] %vm1720_vm6, %v1708_v48  ;;  %v1711_v41 = vsel %vm453_vm3, %v1631_v13, %v1671_v52  ;;  %v1629_v51 = vsel %vm1613_vm13, 0.0, %v1565_v7  ;;  %v1687_v52 = vpop.permute.xlu1 %1686 }
 0x85a   :  { %1728 = vst.msk [vmem:[#allocation17 + $0x38] sm:$0xff] %vm1720_vm6, %v1711_v41  ;;  %v1709_v46 = vsel %vm453_vm3, %v1629_v51, %v1667_v62  ;;  %v2038_v10 = vpop.f32.mrb[56].mxu1 }
 0x85b   :  { %1726 = vst.msk [vmem:[#allocation17 + $0x28] sm:$0xff] %vm1720_vm6, %v1709_v46  ;;  %v1586_v55 = vadd.f32 %v2038_v10, %v3039_v49  ;;  %v1577_v24 = vpop.f32.mrb[57].mxu1 }
 0x85c   :  { %v1578_v29 = vadd.f32 %v1577_v24, %v3040_v14  ;;  %v2039_v16 = vpop.f32.mrb[58].mxu1 }
 0x85d   :  { %vm1618_vm14 = vcmp.ne.f32.partialorder %v1586_v55, %v1586_v55  ;;  %v1589_v57 = vadd.f32 %v2039_v16, %v3041_v30  ;;  %v1580_v36 = vpop.f32.mrb[59].mxu1 }
 0x85e   :  { %v1634_v37 = vsel %vm1618_vm14, 0.0, %v1586_v55  ;;  %vm1616_vm15 = vcmp.ne.f32.partialorder %v1578_v29, %v1578_v29  ;;  %v1581_v47 = vadd.f32 %v1580_v36, %v3042_v54 }
 0x85f   :  { %v1714_v43 = vsel %vm453_vm3, %v1634_v37, %v1677_v59  ;;  %v1632_v2 = vsel %vm1616_vm15, 0.0, %v1578_v29  ;;  %vm1619_vm0 = vcmp.ne.f32.partialorder %v1589_v57, %v1589_v57 }
 0x860   :  { %1731 = vst.msk [vmem:[#allocation17 + $0x50] sm:$0xff] %vm1720_vm6, %v1714_v43  ;;  %v1712_v45 = vsel %vm453_vm3, %v1632_v2, %v1673_v33  ;;  %v1635_v40 = vsel %vm1619_vm0, 0.0, %v1589_v57  ;;  %vm1617_vm1 = vcmp.ne.f32.partialorder %v1581_v47, %v1581_v47 }
 0x861   :  { %1729 = vst.msk [vmem:[#allocation17 + $0x40] sm:$0xff] %vm1720_vm6, %v1712_v45  ;;  %v1715_v38 = vsel %vm453_vm3, %v1635_v40, %v1679_v25  ;;  %v1633_v60 = vsel %vm1617_vm1, 0.0, %v1581_v47 }
 0x862   :  { %1732 = vst.msk [vmem:[#allocation17 + $0x58] sm:$0xff] %vm1720_vm6, %v1715_v38  ;;  %v1713_v39 = vsel %vm453_vm3, %v1633_v60, %v1675_v9  ;;  %v2042_v50 = vpop.f32.mrb[60].mxu1 }
 0x863   :  { %1730 = vst.msk [vmem:[#allocation17 + $0x48] sm:$0xff] %vm1720_vm6, %v1713_v39  ;;  %v1602_v63 = vadd.f32 %v2042_v50, %v3043_v53  ;;  %v1593_v62 = vpop.f32.mrb[61].mxu1 }
 0x864   :  { %v1594_v8 = vadd.f32 %v1593_v62, %v3044_v26  ;;  %v2043_v18 = vpop.f32.mrb[62].mxu1 }
 0x865   :  { %vm1622_vm2 = vcmp.ne.f32.partialorder %v1602_v63, %v1602_v63  ;;  %v1605_v58 = vadd.f32 %v2043_v18, %v3045_v35  ;;  %v1596_v19 = vpop.f32.mrb[63].mxu1 }
 0x866   :  { %v1638_v31 = vsel %vm1622_vm2, 0.0, %v1602_v63  ;;  %vm1620_vm4 = vcmp.ne.f32.partialorder %v1594_v8, %v1594_v8  ;;  %v1597_v44 = vadd.f32 %v1596_v19, %v3046_v12 }
 0x867   :  { %v1718_v5 = vsel %vm453_vm3, %v1638_v31, %v1685_v21  ;;  %v1636_v15 = vsel %vm1620_vm4, 0.0, %v1594_v8  ;;  %vm1623_vm5 = vcmp.ne.f32.partialorder %v1605_v58, %v1605_v58 }
 0x868   :  { %1735 = vst.msk [vmem:[#allocation17 + $0x70] sm:$0xff] %vm1720_vm6, %v1718_v5  ;;  %v1716_v61 = vsel %vm453_vm3, %v1636_v15, %v1681_v6  ;;  %v1639_v17 = vsel %vm1623_vm5, 0.0, %v1605_v58  ;;  %vm1621_vm7 = vcmp.ne.f32.partialorder %v1597_v44, %v1597_v44 }
 0x869   :  { %1733 = vst.msk [vmem:[#allocation17 + $0x60] sm:$0xff] %vm1720_vm6, %v1716_v61  ;;  %v1719_v23 = vsel %vm453_vm3, %v1639_v17, %v1687_v52  ;;  %v1637_v0 = vsel %vm1621_vm7, 0.0, %v1597_v44 }
 0x86a   :  { %1736 = vst.msk [vmem:[#allocation17 + $0x78] sm:$0xff] %vm1720_vm6, %v1719_v23  ;;  %v1717_v3 = vsel %vm453_vm3, %v1637_v0, %v1683_v32 }
 0x86b   :  { %1734 = vst.msk [vmem:[#allocation17 + $0x68] sm:$0xff] %vm1720_vm6, %v1717_v3 }
 0x86c   :  { %2303 = shalt.err (!%p2300_p6)
}
 0x86d   :  { %s2304_s29 = scalar_lea.hbm %s3030_s9, 2048 }
 0x86e   :  { %p2305_p7 = scmp.ne.s32.totalorder %s3030_s9, %s2304_s29  ;;  %p2308_p8 = scmp.lt.u32.totalorder %s2304_s29, %s3030_s9 }
 0x870   :  { %p2310_p9 = pnand %p2308_p8, %p2305_p7 }
 0x872   :  { %2313 = shalt.err (!%p2310_p9)
}
 0x873   :  { %s2343_s10 = smov 128   ;;  %s2344_s14 = smov 8  }
 0x874   :  { %1748 = dma.vmem_to_hbm [thread:$0]  %s1743_s2, 2048, %s3030_s9, [#allocation4], %s2343_s10, %s2343_s10, %s2344_s14  }
 0x875   :  { %2324 = dma.done.wait [#allocation4], 2048  }
 0x876   :  { %2325 = vsyncadd [#allocation4], 4294965248 }
 0x877   :  { %1752 = vsyncpa [#allocation3], 1 }
 0x878   :  { %1753 = vsyncpa [#allocation6], 1 }
 0x879   :  { %1754 = vsyncpa [#allocation9], 1 }
 0x87a   :  { %1755 = vsyncpa [#allocation12], 1 }
 0x87b   :  { %1756 = vsyncpa [#allocation15], 1 }
 0x87c   :  { %1757 = vsyncpa [#allocation4], 1 }

// kernel: _lambda_.3
= control target key start
LH: loop header
LB: loop body
LE: loop exit
PB: predicated region body
PF: predicated region fallthrough
CT: control target
= control target key end

     0   :  { %16 = vsyncpa [#allocation3], 0  ;;  %s5583_s0 = inlined_call_operand.hbm [shape: bf16[128,16], index: 0, kind: input, shape index: {}]   ;;  %s5584_s1 = inlined_call_operand.hbm [shape: bf16[128,39], index: 1, kind: input, shape index: {}]   ;;  %s5585_s2 = inlined_call_operand.hbm [shape: bf16[128,128], index: 2, kind: input, shape index: {}]   ;;  %s5586_s3 = inlined_call_operand.hbm [shape: bf16[16,64], index: 3, kind: input, shape index: {}]   ;;  %s5587_s4 = inlined_call_operand.hbm [shape: f32[1,64], index: 4, kind: input, shape index: {}]   ;;  %s5588_s5 = inlined_call_operand.hbm [shape: bf16[39,263], index: 5, kind: input, shape index: {}]   ;;  %s5589_s6 = inlined_call_operand.hbm [shape: f32[1,263], index: 6, kind: input, shape index: {}]   ;;  %s5590_s7 = inlined_call_operand.hbm [shape: bf16[2,32,64], index: 7, kind: input, shape index: {}]   ;;  %s5591_s8 = inlined_call_operand.hbm [shape: bf16[32,3], index: 8, kind: input, shape index: {}]   ;;  %s5592_s9 = inlined_call_operand.hbm [shape: bf16[2,32,64], index: 9, kind: input, shape index: {}]   ;;  %s5593_s10 = inlined_call_operand.hbm [shape: bf16[32,4], index: 10, kind: input, shape index: {}]   ;;  %s5594_s11 = inlined_call_operand.hbm [shape: f32[128,71], index: 11, kind: output, shape index: {}]  }
   0x1   :  { %17 = vsyncpa [#allocation6], 0 }
   0x2   :  { %18 = vsyncpa [#allocation9], 0 }
   0x3   :  { %19 = vsyncpa [#allocation12], 0 }
   0x4   :  { %20 = vsyncpa [#allocation15], 0 }
   0x5   :  { %21 = vsyncpa [#allocation18], 0 }
   0x6   :  { %22 = vsyncpa [#allocation4], 0  ;;  %s4042_s17 = smov [#allocation5]   ;;  %s4043_s19 = smov [#allocation8]  }
   0x7   :  { %s40_s18 = sshll.u32 %s4042_s17, 4  ;;  %s64_s20 = sshll.u32 %s4043_s19, 4  ;;  %s41_s18 = int_to_ptr.vmem [resolvable:$true] %s40_s18  ;;  %s4128_s20 = int_to_ptr.vmem [resolvable:$true] %s64_s20 }
   0x8   :  { %s3764_s23 = scalar_lea.hbm %s5584_s1, 1024 }
   0x9   :  { %p3765_p0 = scmp.ne.s32.totalorder %s5584_s1, %s3764_s23  ;;  %p3768_p1 = scmp.lt.u32.totalorder %s3764_s23, %s5584_s1 }
   0xb   :  { %p3770_p2 = pnand %p3768_p1, %p3765_p0 }
   0xd   :  { %3773 = shalt.err (!%p3770_p2)
}
   0xe   :  { %s3774_s28 = scalar_lea.vmem %s41_s18, 1024  ;;  %p3779_p4 = scmp.lt.s32.totalorder %s41_s18, %s41_s18 }
   0xf   :  { %p3775_p3 = scmp.ne.s32.totalorder %s41_s18, %s3774_s28  ;;  %p3780_p5 = scmp.lt.s32.totalorder %s3774_s28, %s3774_s28 }
  0x11   :  { %p3781_p6 = por %p3780_p5, %p3779_p4 }
  0x13   :  { %p3782_p7 = pnand %p3781_p6, %p3775_p3 }
  0x15   :  { %3785 = shalt.err (!%p3782_p7)
}
  0x16   :  { %s4044_s29 = smov 64   ;;  %s4045_s30 = smov 4  }
  0x17   :  { %46 = dma.hbm_to_vmem [thread:$0]  %s5584_s1, 1024, %s41_s18, [#allocation6], %s4044_s29, %s4044_s29, %s4045_s30  }
  0x18   :  { %s3786_s16 = scalar_lea.hbm %s5586_s3, 128 }
  0x19   :  { %p3787_p8 = scmp.ne.s32.totalorder %s5586_s3, %s3786_s16  ;;  %p3790_p9 = scmp.lt.u32.totalorder %s3786_s16, %s5586_s3 }
  0x1b   :  { %p3792_p10 = pnand %p3790_p9, %p3787_p8 }
  0x1d   :  { %3795 = shalt.err (!%p3792_p10)
}
  0x1e   :  { %s3796_s23 = scalar_lea.vmem %s4128_s20, 128  ;;  %p3801_p12 = scmp.lt.s32.totalorder %s4128_s20, %s4128_s20 }
  0x1f   :  { %p3797_p11 = scmp.ne.s32.totalorder %s4128_s20, %s3796_s23  ;;  %p3802_p13 = scmp.lt.s32.totalorder %s3796_s23, %s3796_s23 }
  0x21   :  { %p3803_p0 = por %p3802_p13, %p3801_p12 }
  0x23   :  { %p3804_p1 = pnand %p3803_p0, %p3797_p11 }
  0x25   :  { %3807 = shalt.err (!%p3804_p1)
}
  0x26   :  { %70 = dma.hbm_to_vmem [thread:$0]  %s5586_s3, 128, %s4128_s20, [#allocation9], %s4044_s29, %s4044_s29, %s4045_s30  }
  0x27   :  { %s4046_s24 = smov [#allocation11]   ;;  %s3808_s28 = scalar_lea.hbm %s5588_s5, 960 }
  0x28   :  { %s86_s25 = sshll.u32 %s4046_s24, 4  ;;  %p3809_p2 = scmp.ne.s32.totalorder %s5588_s5, %s3808_s28  ;;  %s87_s25 = int_to_ptr.vmem [resolvable:$true] %s86_s25 }
  0x29   :  { %p3812_p3 = scmp.lt.u32.totalorder %s3808_s28, %s5588_s5 }
  0x2b   :  { %p3814_p4 = pnand %p3812_p3, %p3809_p2 }
  0x2d   :  { %3817 = shalt.err (!%p3814_p4)
}
  0x2e   :  { %s3818_s16 = scalar_lea.vmem %s87_s25, 960  ;;  %p3823_p6 = scmp.lt.s32.totalorder %s87_s25, %s87_s25 }
  0x2f   :  { %p3819_p5 = scmp.ne.s32.totalorder %s87_s25, %s3818_s16  ;;  %p3824_p7 = scmp.lt.s32.totalorder %s3818_s16, %s3818_s16 }
  0x31   :  { %p3825_p8 = por %p3824_p7, %p3823_p6 }
  0x33   :  { %p3826_p9 = pnand %p3825_p8, %p3819_p5 }
  0x35   :  { %3829 = shalt.err (!%p3826_p9)
}
  0x36   :  { %s4047_s3 = smov 192   ;;  %s4048_s20 = smov 12  }
  0x37   :  { %92 = dma.hbm_to_vmem [thread:$0]  %s5588_s5, 960, %s87_s25, [#allocation12], %s4047_s3, %s4047_s3, %s4048_s20  }
  0x38   :  { %s4049_s21 = smov [#allocation14]   ;;  %s4050_s23 = smov [#allocation17]  }
  0x39   :  { %s108_s22 = sshll.u32 %s4049_s21, 4  ;;  %s132_s1 = sshll.u32 %s4050_s23, 4  ;;  %s109_s22 = int_to_ptr.vmem [resolvable:$true] %s108_s22  ;;  %s133_s1 = int_to_ptr.vmem [resolvable:$true] %s132_s1 }
  0x3a   :  { %s3830_s26 = scalar_lea.hbm %s5590_s7, 512 }
  0x3b   :  { %p3831_p10 = scmp.ne.s32.totalorder %s5590_s7, %s3830_s26  ;;  %p3834_p11 = scmp.lt.u32.totalorder %s3830_s26, %s5590_s7 }
  0x3d   :  { %p3836_p12 = pnand %p3834_p11, %p3831_p10 }
  0x3f   :  { %3839 = shalt.err (!%p3836_p12)
}
  0x40   :  { %s3840_s5 = scalar_lea.vmem %s109_s22, 512  ;;  %p3845_p0 = scmp.lt.s32.totalorder %s109_s22, %s109_s22 }
  0x41   :  { %p3841_p13 = scmp.ne.s32.totalorder %s109_s22, %s3840_s5  ;;  %p3846_p1 = scmp.lt.s32.totalorder %s3840_s5, %s3840_s5 }
  0x43   :  { %p3847_p2 = por %p3846_p1, %p3845_p0 }
  0x45   :  { %p3848_p3 = pnand %p3847_p2, %p3841_p13 }
  0x47   :  { %3851 = shalt.err (!%p3848_p3)
}
  0x48   :  { %114 = dma.hbm_to_vmem [thread:$0]  %s5590_s7, 512, %s109_s22, [#allocation15], %s4044_s29, %s4044_s29, %s4045_s30  }
  0x49   :  { %s3852_s3 = scalar_lea.hbm %s5592_s9, 512 }
  0x4a   :  { %p3853_p4 = scmp.ne.s32.totalorder %s5592_s9, %s3852_s3  ;;  %p3856_p5 = scmp.lt.u32.totalorder %s3852_s3, %s5592_s9 }
  0x4c   :  { %p3858_p6 = pnand %p3856_p5, %p3853_p4 }
  0x4e   :  { %3861 = shalt.err (!%p3858_p6)
}
  0x4f   :  { %s3862_s23 = scalar_lea.vmem %s133_s1, 512  ;;  %p3867_p8 = scmp.lt.s32.totalorder %s133_s1, %s133_s1 }
  0x50   :  { %p3863_p7 = scmp.ne.s32.totalorder %s133_s1, %s3862_s23  ;;  %p3868_p9 = scmp.lt.s32.totalorder %s3862_s23, %s3862_s23 }
  0x52   :  { %p3869_p10 = por %p3868_p9, %p3867_p8 }
  0x54   :  { %p3870_p11 = pnand %p3869_p10, %p3863_p7 }
  0x56   :  { %3873 = shalt.err (!%p3870_p11)
}
  0x57   :  { %138 = dma.hbm_to_vmem [thread:$0]  %s5592_s9, 512, %s133_s1, [#allocation18], %s4044_s29, %s4044_s29, %s4045_s30  }
  0x58   :  { %s4051_s18 = smov [#allocation2]   ;;  %s4052_s26 = smov [#allocation7]  }
  0x59   :  { %s28_s24 = sshll.u32 %s4051_s18, 4  ;;  %s52_s27 = sshll.u32 %s4052_s26, 4  ;;  %s29_s24 = int_to_ptr.vmem [resolvable:$true] %s28_s24  ;;  %s53_s27 = int_to_ptr.vmem [resolvable:$true] %s52_s27 }
  0x5a   :  { %s3874_s13 = scalar_lea.hbm %s5583_s0, 1024 }
  0x5b   :  { %p3875_p12 = scmp.ne.s32.totalorder %s5583_s0, %s3874_s13  ;;  %p3878_p13 = scmp.lt.u32.totalorder %s3874_s13, %s5583_s0 }
  0x5d   :  { %p3880_p0 = pnand %p3878_p13, %p3875_p12 }
  0x5f   :  { %3883 = shalt.err (!%p3880_p0)
}
  0x60   :  { %s3884_s9 = scalar_lea.vmem %s29_s24, 1024  ;;  %p3889_p2 = scmp.lt.s32.totalorder %s29_s24, %s29_s24 }
  0x61   :  { %p3885_p1 = scmp.ne.s32.totalorder %s29_s24, %s3884_s9  ;;  %p3890_p3 = scmp.lt.s32.totalorder %s3884_s9, %s3884_s9 }
  0x63   :  { %p3891_p4 = por %p3890_p3, %p3889_p2 }
  0x65   :  { %p3892_p5 = pnand %p3891_p4, %p3885_p1 }
  0x67   :  { %3895 = shalt.err (!%p3892_p5)
}
  0x68   :  { %34 = dma.hbm_to_vmem [thread:$0]  %s5583_s0, 1024, %s29_s24, [#allocation3], %s4044_s29, %s4044_s29, %s4045_s30  }
  0x69   :  { %s3896_s17 = scalar_lea.hbm %s5585_s2, 1024 }
  0x6a   :  { %p3897_p6 = scmp.ne.s32.totalorder %s5585_s2, %s3896_s17  ;;  %p3900_p7 = scmp.lt.u32.totalorder %s3896_s17, %s5585_s2 }
  0x6c   :  { %p3902_p8 = pnand %p3900_p7, %p3897_p6 }
  0x6e   :  { %3905 = shalt.err (!%p3902_p8)
}
  0x6f   :  { %s3906_s22 = scalar_lea.vmem %s53_s27, 1024  ;;  %p3911_p10 = scmp.lt.s32.totalorder %s53_s27, %s53_s27 }
  0x70   :  { %p3907_p9 = scmp.ne.s32.totalorder %s53_s27, %s3906_s22  ;;  %p3912_p11 = scmp.lt.s32.totalorder %s3906_s22, %s3906_s22 }
  0x72   :  { %p3913_p12 = por %p3912_p11, %p3911_p10 }
  0x74   :  { %p3914_p13 = pnand %p3913_p12, %p3907_p9 }
  0x76   :  { %3917 = shalt.err (!%p3914_p13)
}
  0x77   :  { %58 = dma.hbm_to_vmem [thread:$0]  %s5585_s2, 1024, %s53_s27, [#allocation6], %s4044_s29, %s4044_s29, %s4045_s30  }
  0x78   :  { %s4053_s24 = smov [#allocation10]   ;;  %s4054_s28 = smov [#allocation13]  }
  0x79   :  { %s77_s26 = sshll.u32 %s4053_s24, 4  ;;  %s99_s12 = sshll.u32 %s4054_s28, 4  ;;  %s78_s26 = int_to_ptr.vmem [resolvable:$true] %s77_s26  ;;  %s100_s12 = int_to_ptr.vmem [resolvable:$true] %s99_s12 }
  0x7a   :  { %s3918_s25 = scalar_lea.hbm %s5587_s4, 16 }
  0x7b   :  { %p3919_p0 = scmp.ne.s32.totalorder %s5587_s4, %s3918_s25  ;;  %p3922_p1 = scmp.lt.u32.totalorder %s3918_s25, %s5587_s4 }
  0x7d   :  { %p3924_p2 = pnand %p3922_p1, %p3919_p0 }
  0x7f   :  { %3927 = shalt.err (!%p3924_p2)
}
  0x80   :  { %s3928_s2 = scalar_lea.vmem %s78_s26, 16  ;;  %s3932_s27 = scalar_lea.vmem %s78_s26, 32 }
  0x81   :  { %p3929_p3 = scmp.ne.s32.totalorder %s78_s26, %s3928_s2  ;;  %p3933_p4 = scmp.lt.s32.totalorder %s78_s26, %s78_s26 }
  0x82   :  { %p3934_p5 = scmp.lt.s32.totalorder %s3932_s27, %s3928_s2 }
  0x84   :  { %p3935_p6 = por %p3934_p5, %p3933_p4 }
  0x86   :  { %p3936_p7 = pnand %p3935_p6, %p3929_p3 }
  0x88   :  { %3939 = shalt.err (!%p3936_p7)
}
  0x89   :  { %80 = dma.hbm_to_vmem [thread:$0]  %s5587_s4, 16, %s78_s26, [#allocation9]  }
  0x8a   :  { %s3940_s19 = scalar_lea.hbm %s5589_s6, 48 }
  0x8b   :  { %p3941_p8 = scmp.ne.s32.totalorder %s5589_s6, %s3940_s19  ;;  %p3944_p9 = scmp.lt.u32.totalorder %s3940_s19, %s5589_s6 }
  0x8d   :  { %p3946_p10 = pnand %p3944_p9, %p3941_p8 }
  0x8f   :  { %3949 = shalt.err (!%p3946_p10)
}
  0x90   :  { %s3950_s0 = scalar_lea.vmem %s100_s12, 48  ;;  %s3954_s18 = scalar_lea.vmem %s100_s12, 64 }
  0x91   :  { %p3951_p11 = scmp.ne.s32.totalorder %s100_s12, %s3950_s0  ;;  %p3955_p12 = scmp.lt.s32.totalorder %s100_s12, %s100_s12 }
  0x92   :  { %p3956_p13 = scmp.lt.s32.totalorder %s3954_s18, %s3950_s0 }
  0x94   :  { %p3957_p0 = por %p3956_p13, %p3955_p12 }
  0x96   :  { %p3958_p1 = pnand %p3957_p0, %p3951_p11 }
  0x98   :  { %3961 = shalt.err (!%p3958_p1)
}
  0x99   :  { %102 = dma.hbm_to_vmem [thread:$0]  %s5589_s6, 48, %s100_s12, [#allocation12]  }
  0x9a   :  { %s4055_s26 = smov [#allocation16]   ;;  %s4056_s13 = smov [#allocation19]  }
  0x9b   :  { %s120_s28 = sshll.u32 %s4055_s26, 4  ;;  %s144_s5 = sshll.u32 %s4056_s13, 4  ;;  %s121_s28 = int_to_ptr.vmem [resolvable:$true] %s120_s28  ;;  %s145_s5 = int_to_ptr.vmem [resolvable:$true] %s144_s5 }
  0x9c   :  { %s3962_s15 = scalar_lea.hbm %s5591_s8, 256 }
  0x9d   :  { %p3963_p2 = scmp.ne.s32.totalorder %s5591_s8, %s3962_s15  ;;  %p3966_p3 = scmp.lt.u32.totalorder %s3962_s15, %s5591_s8 }
  0x9f   :  { %p3968_p4 = pnand %p3966_p3, %p3963_p2 }
  0xa1   :  { %3971 = shalt.err (!%p3968_p4)
}
  0xa2   :  { %s3972_s6 = scalar_lea.vmem %s121_s28, 256  ;;  %p3977_p6 = scmp.lt.s32.totalorder %s121_s28, %s121_s28 }
  0xa3   :  { %p3973_p5 = scmp.ne.s32.totalorder %s121_s28, %s3972_s6  ;;  %p3978_p7 = scmp.lt.s32.totalorder %s3972_s6, %s3972_s6 }
  0xa5   :  { %p3979_p8 = por %p3978_p7, %p3977_p6 }
  0xa7   :  { %p3980_p9 = pnand %p3979_p8, %p3973_p5 }
  0xa9   :  { %3983 = shalt.err (!%p3980_p9)
}
  0xaa   :  { %126 = dma.hbm_to_vmem [thread:$0]  %s5591_s8, 256, %s121_s28, [#allocation15], %s4044_s29, %s4044_s29, %s4045_s30  }
  0xab   :  { %s3984_s17 = scalar_lea.hbm %s5593_s10, 256 }
  0xac   :  { %p3985_p10 = scmp.ne.s32.totalorder %s5593_s10, %s3984_s17  ;;  %p3988_p11 = scmp.lt.u32.totalorder %s3984_s17, %s5593_s10 }
  0xae   :  { %p3990_p12 = pnand %p3988_p11, %p3985_p10 }
  0xb0   :  { %3993 = shalt.err (!%p3990_p12)
}
  0xb1   :  { %s3994_s22 = scalar_lea.vmem %s145_s5, 256  ;;  %p3999_p0 = scmp.lt.s32.totalorder %s145_s5, %s145_s5 }
  0xb2   :  { %p3995_p13 = scmp.ne.s32.totalorder %s145_s5, %s3994_s22  ;;  %p4000_p1 = scmp.lt.s32.totalorder %s3994_s22, %s3994_s22 }
  0xb4   :  { %p4001_p2 = por %p4000_p1, %p3999_p0 }
  0xb6   :  { %p4002_p3 = pnand %p4001_p2, %p3995_p13 }
  0xb8   :  { %4005 = shalt.err (!%p4002_p3)
}
  0xb9   :  { %150 = dma.hbm_to_vmem [thread:$0]  %s5593_s10, 256, %s145_s5, [#allocation18], %s4044_s29, %s4044_s29, %s4045_s30  }
  0xba   :  { %4028 = dma.done.wait [#allocation3], 1024  }
  0xbb   :  { %4029 = vsyncadd [#allocation3], 4294966272 }
  0xbc   :  { %4030 = dma.done.wait [#allocation6], 2048  }
  0xbd   :  { %4031 = vsyncadd [#allocation6], 4294965248 }
  0xbe   :  { %4032 = dma.done.wait [#allocation9], 144  }
  0xbf   :  { %4033 = vsyncadd [#allocation9], 4294967152 }
  0xc0   :  { %4034 = dma.done.wait [#allocation12], 1008  }
  0xc1   :  { %4035 = vsyncadd [#allocation12], 4294966288 }
  0xc2   :  { %4036 = dma.done.wait [#allocation15], 768  }
  0xc3   :  { %4037 = vsyncadd [#allocation15], 4294966528 }
  0xc4   :  { %4038 = dma.done.wait [#allocation18], 768  }
  0xc5   :  { %4039 = vsyncadd [#allocation18], 4294966528  ;;  %v4057_v0 = vmov 0   ;;  %v3716_v1 = vld [vmem:[#allocation8] sm:$0xff]   ;;  %vm272_vm0 = vcmask 130048   ;;  %v3718_v3 = vld [vmem:[#allocation2 + $0x8] sm:$0xff]   ;;  %v438_v36 = vlaneseq }
  0xc6   :  { %603 = vmatprep.mubr.bf16.mxu1 %v4057_v0  ;;  %v3717_v2 = vld [vmem:[#allocation2] sm:$0xff]   ;;  %3402 = vmatprep.subr.bf16.mxu0 %v3716_v1  ;;  %v3719_v4 = vld [vmem:[#allocation2 + $0x10] sm:$0xff]   ;;  %vm558_vm1 = vcmask 1042432   ;;  %vm559_vm2 = vcmask 1043456   ;;  %v3720_v5 = vld [vmem:[#allocation2 + $0x18] sm:$0xff]   ;;  %v4058_v6 = vmov 65535  }
  0xc7   :  { %3403 = vmatpush3.bf16.msra.mxu0 %v3716_v1  ;;  %3404 = vmatprep.mubr.msk.bf16.mxu0 %vm272_vm0, %v3717_v2  ;;  %v560_v7 = vsel %vm558_vm1, 4294967295, %v4058_v6  ;;  %v3721_v8 = vld [vmem:[#allocation2 + $0x20] sm:$0xff]   ;;  %v3726_v10 = vld [vmem:[#allocation11 + $0x4] ss:$12 sps:$4 sm:$0xff]   ;;  %v3728_v11 = vld [vmem:[#allocation11] ss:$12 sps:$4 sm:$0xff]  }
  0xc8   :  { %v3725_v9 = vld [vmem:[#allocation11 + $0x8] ss:$12 sps:$4 sm:$0xff]   ;;  %571 = vmatprep.subr.bf16.mxu1 %v3726_v10  ;;  %v3729_v12 = vld [vmem:[#allocation11 + $0x20] ss:$12 sps:$4 sm:$0xff]   ;;  %v561_v13 = vsel %vm559_vm2, %v560_v7, 0  ;;  %vm533_vm3 = vcmask 318464  }
  0xc9   :  { %3420 = vmatprep.subr.bf16.mxu0 %v3725_v9  ;;  %572 = vmatpush1.bf16.msra.mxu1 %v3728_v11  ;;  %v3730_v14 = vld [vmem:[#allocation11 + $0x1c] ss:$12 sps:$4 sm:$0xff]   ;;  %v3732_v15 = vld [vmem:[#allocation11 + $0x18] ss:$12 sps:$4 sm:$0xff]   ;;  %v434_v17 = vld [vmem:[#allocation11 + $0x30] sm:$0xff]  ;;  %v4323_v37 = vshrl.u32 %v438_v36, 7 }
  0xca   :  { %3405 = vmatmul.mubr.msk.bf16.vlgmr.msra.gmra.mrb[0].mxu0 %vm272_vm0, %v3718_v3  ;;  %v3733_v16 = vld [vmem:[#allocation11 + $0x38] ss:$0 sps:$4 sm:$0xff]   ;;  %573 = vmatprep.subr.bf16.mxu1 %v3730_v14  ;;  %v3172_v18 = vcombine.high %v434_v17, %v434_v17  ;;  %v3171_v19 = vcombine.low %v434_v17, %v434_v17  ;;  %v3722_v23 = vld [vmem:[#allocation2 + $0x28] sm:$0xff]   ;;  %v3723_v24 = vld [vmem:[#allocation2 + $0x30] sm:$0xff]   ;;  %vm805_vm4 = vcmask 261120   ;;  %s4059_s10 = smov 96  }
  0xcb   :  { %3408 = vmatprep.mubr.msk.bf16.mxu0 %vm272_vm0, %v3719_v4  ;;  %3421 = vmatpush3.bf16.msra.mxu0 %v3725_v9  ;;  %v569_v20 = vand.u32 %v3733_v16, %v561_v13  ;;  %v3736_v25 = vld [vmem:[#allocation5] sm:$0xff]   ;;  %v3724_v26 = vld [vmem:[#allocation2 + $0x38] sm:$0xff]   ;;  %v3737_v27 = vld [vmem:[#allocation5 + $0x8] sm:$0xff]   ;;  %v448_v39 = vsub.s32 2, %v4323_v37  ;;  %v444_v41 = vsub.s32 1, %v4323_v37  ;;  %s4060_s30 = smov 32  }
  0xcc   :  { %3422 = vmatprep.subr.bf16.mxu0 %v3729_v12  ;;  %v566_v21 = vand.u32 %v3172_v18, %v561_v13  ;;  %v563_v22 = vand.u32 %v3171_v19, %v561_v13  ;;  %v3738_v28 = vld [vmem:[#allocation5 + $0x10] sm:$0xff]   ;;  %v3739_v29 = vld [vmem:[#allocation5 + $0x18] sm:$0xff]   ;;  %v3740_v30 = vld [vmem:[#allocation5 + $0x20] sm:$0xff]   ;;  %s4061_s18 = smov 125   ;;  %s4063_s4 = smov 103   ;;  %vm3050_vm6 = vcmask 23552  }
  0xcd   :  { %574 = vmatpush1.bf16.msra.mxu1 %v3732_v15  ;;  %v3741_v31 = vld [vmem:[#allocation5 + $0x28] sm:$0xff]   ;;  %v3742_v32 = vld [vmem:[#allocation5 + $0x30] sm:$0xff]   ;;  %v3743_v33 = vld [vmem:[#allocation5 + $0x38] sm:$0xff]   ;;  %s4064_s24 = smov 3   ;;  %vm3067_vm8 = vcmask 56320   ;;  %vm3100_vm10 = vcmask 580608  }
  0xce   :  { %575 = vmatprep.subr.bf16.mxu1 %v566_v21  ;;  %v3744_v34 = vld [vmem:[#allocation14] sm:$0xff]   ;;  %v3745_v35 = vld [vmem:[#allocation14 + $0x8] sm:$0xff]   ;;  %v4325_v38 = vld [vmem:[#allocation13] sm:$0x7]  ;;  %s4065_s26 = smov [#allocation20]  }
  0xcf   :  { %3423 = vmatpush3.bf16.msra.mxu0 %v3729_v12  ;;  %v4329_v40 = vrot.slane %v4325_v38, %v448_v39  ;;  %v4333_v42 = vrot.slane %v4325_v38, %v444_v41  ;;  %v4335_v43 = vld [vmem:[#allocation10] ss:$0 sm:$0xff]  ;;  %s3122_s28 = sshll.u32 %s4065_s26, 4  ;;  %s3123_s28 = int_to_ptr.vmem [resolvable:$true] %s3122_s28 }
  0xd0   :  { %3424 = vmatprep.subr.bf16.mxu0 %v569_v20  ;;  %s4006_s13 = scalar_lea.vmem %s3123_s28, 2048  ;;  %p4011_p5 = scmp.lt.s32.totalorder %s3123_s28, %s3123_s28 }
  0xd1   :  { %576 = vmatpush1.bf16.msra.mxu1 %v563_v22  ;;  %p4007_p4 = scmp.ne.s32.totalorder %s3123_s28, %s4006_s13  ;;  %p4012_p6 = scmp.lt.s32.totalorder %s4006_s13, %s4006_s13 }
  0xd2   :  { %3409 = vmatmul.mubr.msk.bf16.gmra.mrb[4].mxu0 %vm272_vm0, %v3720_v5 }
  0xd3   :  { %3412 = vmatprep.mubr.msk.bf16.mxu0 %vm272_vm0, %v3721_v8  ;;  %3425 = vmatpush3.bf16.msra.mxu0 %v569_v20  ;;  %p4013_p7 = por %p4012_p6, %p4011_p5 }
  0xd4   :  { %3174 = vmatmul.mubr.msk.bf16.vlgmr.msra.gmra.mrb[0].mxu1 %vm533_vm3, %v3736_v25  ;;  %3442 = vmatprep.subr.bf16.mxu0 %v3744_v34 }
  0xd5   :  { %613 = vmatprep.mubr.bf16.mxu1 %v4057_v0  ;;  %p4014_p8 = pnand %p4013_p7, %p4007_p4 }
  0xda   :  { %3413 = vmatmul.mubr.msk.bf16.gmra.mrb[8].mxu0 %vm272_vm0, %v3722_v23 }
  0xdb   :  { %3416 = vmatprep.mubr.msk.bf16.mxu0 %vm272_vm0, %v3723_v24 }
  0xdc   :  { %3175 = vmatmul.mubr.msk.bf16.gmra.mrb[4].mxu1 %vm533_vm3, %v3737_v27 }
  0xdd   :  { %623 = vmatprep.mubr.bf16.mxu1 %v4057_v0 }
  0xe2   :  { %3417 = vmatmul.mubr.msk.bf16.gmra.mrb[12].mxu0 %vm272_vm0, %v3724_v26 }
  0xe3   :  { %3426 = vmatprep.mubr.msk.bf16.mxu0 %vm533_vm3, %v3736_v25 }
  0xe4   :  { %3176 = vmatmul.mubr.msk.bf16.gmra.mrb[8].mxu1 %vm533_vm3, %v3738_v28 }
  0xe5   :  { %633 = vmatprep.mubr.bf16.mxu1 %v4057_v0 }
  0xea   :  { %3427 = vmatmul.mubr.msk.bf16.vlgmr.msra.gmra.mrb[16].mxu0 %vm533_vm3, %v3737_v27 }
  0xeb   :  { %3430 = vmatprep.mubr.msk.bf16.mxu0 %vm533_vm3, %v3738_v28  ;;  %3443 = vmatpush3.bf16.msra.mxu0 %v3744_v34 }
  0xec   :  { %3177 = vmatmul.mubr.msk.bf16.gmra.mrb[12].mxu1 %vm533_vm3, %v3739_v29  ;;  %3444 = vmatprep.subr.bf16.mxu0 %v3745_v35 }
  0xed   :  { %643 = vmatprep.mubr.bf16.mxu1 %v4057_v0 }
  0xef   :  { %3445 = vmatpush3.bf16.msra.mxu0 %v3745_v35 }
  0xf2   :  { %3431 = vmatmul.mubr.msk.bf16.gmra.mrb[20].mxu0 %vm533_vm3, %v3739_v29 }
  0xf3   :  { %3434 = vmatprep.mubr.msk.bf16.mxu0 %vm533_vm3, %v3740_v30 }
  0xf4   :  { %3178 = vmatmul.mubr.msk.bf16.gmra.mrb[16].mxu1 %vm533_vm3, %v3740_v30 }
  0xf5   :  { %653 = vmatprep.mubr.bf16.mxu1 %v4057_v0 }
  0xfa   :  { %3435 = vmatmul.mubr.msk.bf16.gmra.mrb[24].mxu0 %vm533_vm3, %v3741_v31 }
  0xfb   :  { %3438 = vmatprep.mubr.msk.bf16.mxu0 %vm533_vm3, %v3742_v32 }
  0xfc   :  { %3179 = vmatmul.mubr.msk.bf16.gmra.mrb[20].mxu1 %vm533_vm3, %v3741_v31 }
  0xfd   :  { %663 = vmatprep.mubr.bf16.mxu1 %v4057_v0 }
 0x102   :  { %3439 = vmatmul.mubr.msk.bf16.gmra.mrb[28].mxu0 %vm533_vm3, %v3743_v33 }
 0x104   :  { %3180 = vmatmul.mubr.msk.bf16.gmra.mrb[24].mxu1 %vm533_vm3, %v3742_v32 }
 0x105   :  { %673 = vmatprep.mubr.bf16.mxu1 %v4057_v0 }
 0x10c   :  { %3181 = vmatmul.mubr.msk.bf16.gmra.mrb[28].mxu1 %vm533_vm3, %v3743_v33 }
 0x19d   :  { %v3406_v44 = vpop.f32.mrb[0].mxu0 }
 0x19e   :  { %v340_v45 = vadd.f32 %v3406_v44, %v4335_v43  ;;  %v331_v46 = vpop.f32.mrb[1].mxu0 }
 0x19f   :  { %v332_v47 = vadd.f32 %v4335_v43, %v331_v46  ;;  %v3407_v48 = vpop.f32.mrb[2].mxu0 }
 0x1a0   :  { %v343_v49 = vadd.f32 %v3407_v48, %v4335_v43  ;;  %v334_v50 = vpop.f32.mrb[3].mxu0  ;;  %v396_v52 = vmax.f32 %v340_v45, 0.0 }
 0x1a1   :  { %v335_v51 = vadd.f32 %v4335_v43, %v334_v50  ;;  %v394_v54 = vmax.f32 %v332_v47, 0.0 }
 0x1a2   :  { %v397_v53 = vmax.f32 %v343_v49, 0.0 }
 0x1a3   :  { %v395_v55 = vmax.f32 %v335_v51, 0.0 }
 0x1a4   :  { %v4341_v56 = vpack.c.bf16 %v397_v53, %v396_v52 }
 0x1a5   :  { %v4343_v57 = vpack.c.bf16 %v395_v55, %v394_v54  ;;  %v3410_v58 = vpop.f32.mrb[4].mxu0 }
 0x1a6   :  { %v356_v59 = vadd.f32 %v3410_v58, %v4335_v43  ;;  %v347_v60 = vpop.f32.mrb[5].mxu0 }
 0x1a7   :  { %v348_v61 = vadd.f32 %v4335_v43, %v347_v60  ;;  %v3411_v62 = vpop.f32.mrb[6].mxu0  ;;  %3446 = vmatprep.mubr.msk.bf16.mxu0 %vm805_vm4, %v4343_v57  ;;  %v4361_v13 = vpop.f32.mrb[0].mxu1 }
 0x1a8   :  { %v359_v63 = vadd.f32 %v3411_v62, %v4335_v43  ;;  %v350_v0 = vpop.f32.mrb[7].mxu0  ;;  %3447 = vmatmul.mubr.msk.bf16.vlgmr.msra.gmra.mrb[32].mxu0 %vm805_vm4, %v4341_v56  ;;  %v400_v2 = vmax.f32 %v356_v59, 0.0  ;;  %v607_v16 = vpop.f32.mrb[1].mxu1 }
 0x1a9   :  { %v351_v1 = vadd.f32 %v4335_v43, %v350_v0  ;;  %v398_v4 = vmax.f32 %v348_v61, 0.0  ;;  %v4368_v18 = vadd.f32 %v607_v16, %v4333_v42  ;;  %v4370_v19 = vpop.f32.mrb[2].mxu1 }
 0x1aa   :  { %v401_v3 = vmax.f32 %v359_v63, 0.0  ;;  %v611_v22 = vpop.f32.mrb[3].mxu1 }
 0x1ab   :  { %v399_v5 = vmax.f32 %v351_v1, 0.0  ;;  %v4373_v25 = vadd.f32 %v611_v22, %v4333_v42 }
 0x1ac   :  { %v4353_v6 = vpack.c.bf16 %v401_v3, %v400_v2 }
 0x1ad   :  { %v4355_v7 = vpack.c.bf16 %v399_v5, %v398_v4  ;;  %v3414_v8 = vpop.f32.mrb[8].mxu0 }
 0x1ae   :  { %v372_v9 = vadd.f32 %v3414_v8, %v4335_v43  ;;  %v363_v10 = vpop.f32.mrb[9].mxu0 }
 0x1af   :  { %v364_v11 = vadd.f32 %v4335_v43, %v363_v10  ;;  %v3415_v12 = vpop.f32.mrb[10].mxu0  ;;  %3450 = vmatprep.mubr.msk.bf16.mxu0 %vm805_vm4, %v4355_v7  ;;  %v4383_v33 = vpop.f32.mrb[4].mxu1 }
 0x1b0   :  { %v375_v14 = vadd.f32 %v3415_v12, %v4335_v43  ;;  %v366_v15 = vpop.f32.mrb[11].mxu0  ;;  %3451 = vmatmul.mubr.msk.bf16.gmra.mrb[36].mxu0 %vm805_vm4, %v4353_v6  ;;  %v404_v20 = vmax.f32 %v372_v9, 0.0  ;;  %v617_v36 = vpop.f32.mrb[5].mxu1 }
 0x1b1   :  { %v367_v17 = vadd.f32 %v4335_v43, %v366_v15  ;;  %v402_v23 = vmax.f32 %v364_v11, 0.0  ;;  %v4390_v41 = vadd.f32 %v617_v36, %v4333_v42  ;;  %v4392_v44 = vpop.f32.mrb[6].mxu1 }
 0x1b2   :  { %v405_v21 = vmax.f32 %v375_v14, 0.0  ;;  %v621_v15 = vpop.f32.mrb[7].mxu1 }
 0x1b3   :  { %v403_v24 = vmax.f32 %v367_v17, 0.0  ;;  %v4439_v16 = vadd.f32 %v621_v15, %v4333_v42 }
 0x1b4   :  { %v4375_v26 = vpack.c.bf16 %v405_v21, %v404_v20 }
 0x1b5   :  { %v4377_v27 = vpack.c.bf16 %v403_v24, %v402_v23  ;;  %v3418_v28 = vpop.f32.mrb[12].mxu0 }
 0x1b6   :  { %v388_v29 = vadd.f32 %v3418_v28, %v4335_v43  ;;  %v379_v30 = vpop.f32.mrb[13].mxu0 }
 0x1b7   :  { %v380_v31 = vadd.f32 %v4335_v43, %v379_v30  ;;  %v3419_v32 = vpop.f32.mrb[14].mxu0  ;;  %3454 = vmatprep.mubr.msk.bf16.mxu0 %vm805_vm4, %v4377_v27  ;;  %v4441_v17 = vpop.f32.mrb[8].mxu1 }
 0x1b8   :  { %v391_v34 = vadd.f32 %v3419_v32, %v4335_v43  ;;  %v382_v35 = vpop.f32.mrb[15].mxu0  ;;  %3455 = vmatmul.mubr.msk.bf16.gmra.mrb[40].mxu0 %vm805_vm4, %v4375_v26  ;;  %v408_v45 = vmax.f32 %v388_v29, 0.0  ;;  %v627_v20 = vpop.f32.mrb[9].mxu1 }
 0x1b9   :  { %v383_v39 = vadd.f32 %v4335_v43, %v382_v35  ;;  %v406_v47 = vmax.f32 %v380_v31, 0.0  ;;  %v4443_v21 = vpop.f32.mrb[10].mxu1  ;;  %v4446_v23 = vadd.f32 %v627_v20, %v4333_v42 }
 0x1ba   :  { %v409_v46 = vmax.f32 %v391_v34, 0.0  ;;  %v631_v22 = vpop.f32.mrb[11].mxu1 }
 0x1bb   :  { %v407_v48 = vmax.f32 %v383_v39, 0.0  ;;  %v4449_v24 = vadd.f32 %v631_v22, %v4333_v42 }
 0x1bc   :  { %v4394_v49 = vpack.c.bf16 %v409_v46, %v408_v45 }
 0x1bd   :  { %v4396_v50 = vpack.c.bf16 %v407_v48, %v406_v47  ;;  %v3428_v51 = vpop.f32.mrb[16].mxu0 }
 0x1be   :  { %v4399_v52 = vadd.f32 %v3428_v51, %v4329_v40  ;;  %v718_v53 = vpop.f32.mrb[17].mxu0 }
 0x1bf   :  { %3458 = vmatprep.mubr.msk.bf16.mxu0 %vm805_vm4, %v4396_v50  ;;  %v4404_v43 = vadd.f32 %v718_v53, %v4329_v40  ;;  %v3429_v54 = vpop.f32.mrb[18].mxu0  ;;  %v635_v36 = vpop.f32.mrb[12].mxu1 }
 0x1c0   :  { %5658 = vst [vmem:[#allocation28_spill] sm:$0xff] %v4399_v52  ;;  %3459 = vmatmul.mubr.msk.bf16.gmra.mrb[44].mxu0 %vm805_vm4, %v4394_v49  ;;  %v4409_v55 = vadd.f32 %v3429_v54, %v4329_v40  ;;  %v721_v58 = vpop.f32.mrb[19].mxu0  ;;  %v637_v45 = vpop.f32.mrb[13].mxu1 }
 0x1c1   :  { %5659 = vst [vmem:[#allocation29_spill] sm:$0xff] %v4404_v43  ;;  %v4412_v59 = vadd.f32 %v721_v58, %v4329_v40  ;;  %v639_v46 = vpop.f32.mrb[14].mxu1  ;;  %v4464_v48 = vadd.f32 %v637_v45, %v4333_v42 }
 0x1c2   :  { %5660 = vst [vmem:[#allocation30_spill] sm:$0xff] %v4409_v55  ;;  %v641_v47 = vpop.f32.mrb[15].mxu1 }
 0x1c3   :  { %5661 = vst [vmem:[#allocation31_spill] sm:$0xff] %v4412_v59  ;;  %v4467_v51 = vadd.f32 %v641_v47, %v4333_v42 }
 0x1c5   :  { %v3432_v60 = vpop.f32.mrb[20].mxu0 }
 0x1c6   :  { %v4415_v61 = vadd.f32 %v3432_v60, %v4329_v40  ;;  %v734_v62 = vpop.f32.mrb[21].mxu0 }
 0x1c7   :  { %v4418_v63 = vadd.f32 %v734_v62, %v4329_v40  ;;  %v3433_v0 = vpop.f32.mrb[22].mxu0  ;;  %v645_v53 = vpop.f32.mrb[16].mxu1 }
 0x1c8   :  { %5662 = vst [vmem:[#allocation32_spill] sm:$0xff] %v4415_v61  ;;  %v4421_v1 = vadd.f32 %v3433_v0, %v4329_v40  ;;  %v737_v2 = vpop.f32.mrb[23].mxu0  ;;  %v647_v54 = vpop.f32.mrb[17].mxu1 }
 0x1c9   :  { %5663 = vst [vmem:[#allocation33_spill] sm:$0xff] %v4418_v63  ;;  %v4424_v3 = vadd.f32 %v737_v2, %v4329_v40  ;;  %v649_v58 = vpop.f32.mrb[18].mxu1  ;;  %v4470_v62 = vadd.f32 %v647_v54, %v4333_v42 }
 0x1ca   :  { %5664 = vst [vmem:[#allocation34_spill] sm:$0xff] %v4421_v1  ;;  %v651_v60 = vpop.f32.mrb[19].mxu1 }
 0x1cb   :  { %5665 = vst [vmem:[#allocation35_spill] sm:$0xff] %v4424_v3  ;;  %v4473_v0 = vadd.f32 %v651_v60, %v4333_v42 }
 0x1cd   :  { %v3436_v4 = vpop.f32.mrb[24].mxu0 }
 0x1ce   :  { %v4427_v5 = vadd.f32 %v3436_v4, %v4329_v40  ;;  %v750_v8 = vpop.f32.mrb[25].mxu0 }
 0x1cf   :  { %v4430_v9 = vadd.f32 %v750_v8, %v4329_v40  ;;  %v3437_v10 = vpop.f32.mrb[26].mxu0 }
 0x1d0   :  { %5666 = vst [vmem:[#allocation36_spill] sm:$0xff] %v4427_v5  ;;  %v4433_v11 = vadd.f32 %v3437_v10, %v4329_v40  ;;  %v753_v12 = vpop.f32.mrb[27].mxu0 }
 0x1d1   :  { %5667 = vst [vmem:[#allocation37_spill] sm:$0xff] %v4430_v9  ;;  %v4436_v14 = vadd.f32 %v753_v12, %v4329_v40 }
 0x1d2   :  { %5668 = vst [vmem:[#allocation38_spill] sm:$0xff] %v4433_v11 }
 0x1d3   :  { %5669 = vst [vmem:[#allocation39_spill] sm:$0xff] %v4436_v14 }
 0x1d5   :  { %v3440_v28 = vpop.f32.mrb[28].mxu0 }
 0x1d6   :  { %v4452_v29 = vadd.f32 %v3440_v28, %v4329_v40  ;;  %v766_v30 = vpop.f32.mrb[29].mxu0 }
 0x1d7   :  { %v4455_v31 = vadd.f32 %v766_v30, %v4329_v40  ;;  %v3441_v32 = vpop.f32.mrb[30].mxu0 }
 0x1d8   :  { %5670 = vst [vmem:[#allocation40_spill] sm:$0xff] %v4452_v29  ;;  %v4458_v34 = vadd.f32 %v3441_v32, %v4329_v40  ;;  %v769_v35 = vpop.f32.mrb[31].mxu0 }
 0x1d9   :  { %5671 = vst [vmem:[#allocation41_spill] sm:$0xff] %v4455_v31  ;;  %v4461_v39 = vadd.f32 %v769_v35, %v4329_v40  ;;  %v655_v40 = vpop.f32.mrb[20].mxu1 }
 0x1da   :  { %5672 = vst [vmem:[#allocation42_spill] sm:$0xff] %v4458_v34  ;;  %v657_v2 = vpop.f32.mrb[21].mxu1 }
 0x1db   :  { %5673 = vst [vmem:[#allocation43_spill] sm:$0xff] %v4461_v39  ;;  %v659_v4 = vpop.f32.mrb[22].mxu1  ;;  %v4476_v10 = vadd.f32 %v657_v2, %v4333_v42 }
 0x1dc   :  { %v661_v8 = vpop.f32.mrb[23].mxu1 }
 0x1dd   :  { %v4479_v12 = vadd.f32 %v661_v8, %v4333_v42  ;;  %v4481_v15 = vpop.f32.mrb[24].mxu1  ;;  %v440_v8 = vsub.s32 0, %v4323_v37 }
 0x1de   :  { %v667_v20 = vpop.f32.mrb[25].mxu1 }
 0x1df   :  { %v4483_v22 = vpop.f32.mrb[26].mxu1  ;;  %v4486_v30 = vadd.f32 %v667_v20, %v4333_v42  ;;  %v441_v34 = vrot.slane %v4325_v38, %v440_v8 }
 0x1e0   :  { %v671_v28 = vpop.f32.mrb[27].mxu1 }
 0x1e1   :  { %v4489_v32 = vadd.f32 %v671_v28, %v4333_v42  ;;  %v675_v35 = vpop.f32.mrb[28].mxu1  ;;  %v4500_v29 = vadd.f32 %v4361_v13, %v441_v34  ;;  %v4503_v28 = vadd.f32 %v4370_v19, %v441_v34  ;;  %v4506_v31 = vadd.f32 %v4392_v44, %v441_v34 }
 0x1e2   :  { %v677_v45 = vpop.f32.mrb[29].mxu1  ;;  %v4515_v38 = vadd.f32 %v4383_v33, %v441_v34  ;;  %v4534_v5 = vadd.f32 %v639_v46, %v441_v34  ;;  %v4593_v59 = vadd.f32 %v4483_v22, %v441_v34  ;;  %v4632_v22 = vld [vmem:[#allocation7 + $0x10] sm:$0xff]  }
 0x1e3   :  { %v4492_v47 = vadd.f32 %v677_v45, %v4333_v42  ;;  %v679_v54 = vpop.f32.mrb[30].mxu1  ;;  %5678 = vst [vmem:[#allocation48_spill] sm:$0xff] %v4632_v22 }
 0x1e4   :  { %v681_v60 = vpop.f32.mrb[31].mxu1  ;;  %v4583_v63 = vadd.f32 %v679_v54, %v441_v34 }
 0x1e5   :  { %5674 = vst [vmem:[#allocation44_spill] sm:$0xff] %v4492_v47  ;;  %v4495_v2 = vadd.f32 %v681_v60, %v4333_v42 }
 0x1e7   :  { %5675 = vst [vmem:[#allocation45_spill] sm:$0xff] %v4495_v2 }
 0x27b   :  { %v3448_v39 = vpop.f32.mrb[32].mxu0 }
 0x27c   :  { %v864_v20 = vpop.f32.mrb[33].mxu0  ;;  %v4523_v60 = vadd.f32 %v3448_v39, %v4515_v38 }
 0x27d   :  { %v3449_v11 = vpop.f32.mrb[34].mxu0  ;;  %v4509_v42 = vadd.f32 %v864_v20, %v4500_v29  ;;  %v4527_v20 = vadd.f32 %v4441_v17, %v441_v34  ;;  %v4543_v17 = vadd.f32 %v635_v36, %v441_v34 }
 0x27e   :  { %v867_v45 = vpop.f32.mrb[35].mxu0  ;;  %v4518_v13 = vadd.f32 %v3449_v11, %v4506_v31  ;;  %v4532_v11 = vadd.f32 %v4443_v21, %v441_v34 }
 0x27f   :  { %v4512_v37 = vadd.f32 %v867_v45, %v4503_v28 }
 0x280   :  { %v944_v33 = vpack.c.bf16 %v4518_v13, %v4523_v60 }
 0x281   :  { %v943_v19 = vpack.c.bf16 %v4512_v37, %v4509_v42 }
 0x283   :  { %1007 = vrot.lane.b32.xlu0 %v943_v19, %s4059_s10  ;;  %v3452_v44 = vpop.f32.mrb[36].mxu0 }
 0x284   :  { %v880_v8 = vpop.f32.mrb[37].mxu0  ;;  %v4551_v9 = vadd.f32 %v3452_v44, %v4543_v17 }
 0x285   :  { %v3453_v45 = vpop.f32.mrb[38].mxu0  ;;  %v4537_v39 = vadd.f32 %v880_v8, %v4527_v20  ;;  %v4554_v8 = vadd.f32 %v655_v40, %v441_v34 }
 0x286   :  { %v883_v14 = vpop.f32.mrb[39].mxu0  ;;  %v4546_v1 = vadd.f32 %v3453_v45, %v4534_v5  ;;  %v4562_v45 = vadd.f32 %v649_v58, %v441_v34 }
 0x287   :  { %v4540_v19 = vadd.f32 %v883_v14, %v4532_v11  ;;  %1009 = vrot.lane.b32.xlu0 %v944_v33, %s4059_s10  ;;  %v4556_v14 = vadd.f32 %v659_v4, %v441_v34  ;;  %v4558_v33 = vadd.f32 %v645_v53, %v441_v34 }
 0x288   :  { %v946_v36 = vpack.c.bf16 %v4546_v1, %v4551_v9 }
 0x289   :  { %v945_v21 = vpack.c.bf16 %v4540_v19, %v4537_v39 }
 0x28b   :  { %1011 = vrot.lane.b32.xlu1 %v945_v21, %s4059_s10  ;;  %v3456_v46 = vpop.f32.mrb[40].mxu0 }
 0x28c   :  { %v896_v3 = vpop.f32.mrb[41].mxu0  ;;  %v4565_v55 = vadd.f32 %v3456_v46, %v4554_v8  ;;  %v4581_v46 = vadd.f32 %v675_v35, %v441_v34 }
 0x28d   :  { %v3457_v61 = vpop.f32.mrb[42].mxu0  ;;  %v4571_v40 = vadd.f32 %v896_v3, %v4558_v33  ;;  %v4587_v3 = vld [vmem:[#allocation7] sm:$0xff]  }
 0x28e   :  { %v4568_v44 = vadd.f32 %v3457_v61, %v4556_v14  ;;  %v899_v21 = vpop.f32.mrb[43].mxu0  ;;  %5676 = vst [vmem:[#allocation46_spill] sm:$0xff] %v4587_v3  ;;  %3478 = vmatprep.mubr.bf16.mxu1 %v4587_v3 }
 0x28f   :  { %v4574_v4 = vadd.f32 %v899_v21, %v4562_v45  ;;  %1013 = vrot.lane.b32.xlu1 %v946_v36, %s4059_s10  ;;  %v4590_v36 = vadd.f32 %v4481_v15, %v441_v34 }
 0x290   :  { %v948_v53 = vpack.c.bf16 %v4568_v44, %v4565_v55 }
 0x291   :  { %v947_v58 = vpack.c.bf16 %v4574_v4, %v4571_v40 }
 0x293   :  { %1015 = vrot.lane.b32.xlu0 %v947_v58, %s4059_s10  ;;  %v3460_v61 = vpop.f32.mrb[44].mxu0  ;;  %1017 = vrot.lane.b32.xlu1 %v948_v53, %s4059_s10 }
 0x294   :  { %v912_v21 = vpop.f32.mrb[45].mxu0  ;;  %v4597_v35 = vadd.f32 %v3460_v61, %v4581_v46  ;;  %v4636_v61 = vld [vmem:[#allocation7 + $0x18] sm:$0xff]  }
 0x295   :  { %v3461_v52 = vpop.f32.mrb[46].mxu0  ;;  %v4603_v53 = vadd.f32 %v912_v21, %v4590_v36  ;;  %5679 = vst [vmem:[#allocation49_spill] sm:$0xff] %v4636_v61  ;;  %v4638_v21 = vld [vmem:[#allocation7 + $0x20] sm:$0xff]  }
 0x296   :  { %v4600_v54 = vadd.f32 %v3461_v52, %v4583_v63  ;;  %v915_v58 = vpop.f32.mrb[47].mxu0  ;;  %v4630_v52 = vld [vmem:[#allocation7 + $0x8] sm:$0xff]   ;;  %5680 = vst [vmem:[#allocation50_spill] sm:$0xff] %v4638_v21 }
 0x297   :  { %v4606_v43 = vadd.f32 %v915_v58, %v4593_v59  ;;  %5677 = vst [vmem:[#allocation47_spill] sm:$0xff] %v4630_v52  ;;  %v4642_v58 = vld [vmem:[#allocation7 + $0x28] sm:$0xff]  }
 0x298   :  { %v950_v34 = vpack.c.bf16 %v4600_v54, %v4597_v35  ;;  %5681 = vst [vmem:[#allocation51_spill] sm:$0xff] %v4642_v58 }
 0x299   :  { %v949_v15 = vpack.c.bf16 %v4606_v43, %v4603_v53 }
 0x29a   :  { %1021 = vrot.lane.b32.xlu1 %v950_v34, %s4059_s10  ;;  %v4644_v34 = vld [vmem:[#allocation7 + $0x30] sm:$0xff]  }
 0x29b   :  { %1019 = vrot.lane.b32.xlu0 %v949_v15, %s4059_s10  ;;  %5682 = vst [vmem:[#allocation52_spill] sm:$0xff] %v4644_v34  ;;  %v4648_v15 = vld [vmem:[#allocation7 + $0x38] sm:$0xff]  }
 0x29c   :  { %5683 = vst [vmem:[#allocation53_spill] sm:$0xff] %v4648_v15 }
 0x29e   :  { %1633 = vrot.lane.b32.xlu1 %v4341_v56, %s4059_s10 }
 0x29f   :  { %1631 = vrot.lane.b32.xlu0 %v4343_v57, %s4059_s10 }
 0x2a2   :  { %1637 = vrot.lane.b32.xlu1 %v4353_v6, %s4059_s10 }
 0x2a3   :  { %1635 = vrot.lane.b32.xlu0 %v4355_v7, %s4059_s10 }
 0x2a6   :  { %1641 = vrot.lane.b32.xlu1 %v4375_v26, %s4059_s10 }
 0x2a7   :  { %1639 = vrot.lane.b32.xlu0 %v4377_v27, %s4059_s10 }
 0x2aa   :  { %1645 = vrot.lane.b32.xlu1 %v4394_v49, %s4059_s10 }
 0x2ab   :  { %1643 = vrot.lane.b32.xlu0 %v4396_v50, %s4059_s10 }
 0x2f5   :  { %v1008_v56 = vpop.permute.xlu0 %1007 }
 0x2f6   :  { %3462 = vmatprep.subr.bf16.mxu1 %v1008_v56 }
 0x2f7   :  { %3463 = vmatpush3.bf16.msra.mxu1 %v1008_v56  ;;  %v3754_v56 = vld [vmem:[#allocation14 + $0x10] sm:$0xff]  }
 0x2f8   :  { %3494 = vmatprep.subr.bf16.mxu0 %v3754_v56 }
 0x2f9   :  { %v1010_v57 = vpop.permute.xlu0 %1009  ;;  %3495 = vmatpush3.bf16.msra.mxu0 %v3754_v56 }
 0x2fa   :  { %3464 = vmatprep.subr.bf16.mxu1 %v1010_v57 }
 0x2fb   :  { %3465 = vmatpush3.bf16.msra.mxu1 %v1010_v57  ;;  %v3755_v57 = vld [vmem:[#allocation14 + $0x18] sm:$0xff]  }
 0x2fc   :  { %3496 = vmatprep.subr.bf16.mxu0 %v3755_v57 }
 0x2fd   :  { %v1012_v6 = vpop.permute.xlu1 %1011  ;;  %3497 = vmatpush3.bf16.msra.mxu0 %v3755_v57 }
 0x2fe   :  { %3466 = vmatprep.subr.bf16.mxu1 %v1012_v6 }
 0x2ff   :  { %3467 = vmatpush3.bf16.msra.mxu1 %v1012_v6  ;;  %v3756_v6 = vld [vmem:[#allocation17] sm:$0xff]  }
 0x300   :  { %3546 = vmatprep.subr.bf16.mxu0 %v3756_v6 }
 0x301   :  { %v1014_v7 = vpop.permute.xlu1 %1013 }
 0x302   :  { %3468 = vmatprep.subr.bf16.mxu1 %v1014_v7 }
 0x303   :  { %3469 = vmatpush3.bf16.msra.mxu1 %v1014_v7 }
 0x305   :  { %v1016_v26 = vpop.permute.xlu0 %1015  ;;  %v1018_v27 = vpop.permute.xlu1 %1017 }
 0x306   :  { %3470 = vmatprep.subr.bf16.mxu1 %v1016_v26 }
 0x307   :  { %3471 = vmatpush3.bf16.msra.mxu1 %v1016_v26 }
 0x308   :  { %3472 = vmatprep.subr.bf16.mxu1 %v1018_v27 }
 0x30b   :  { %3473 = vmatpush3.bf16.msra.mxu1 %v1018_v27 }
 0x30c   :  { %v1022_v50 = vpop.permute.xlu1 %1021 }
 0x30d   :  { %v1020_v49 = vpop.permute.xlu0 %1019 }
 0x30e   :  { %3474 = vmatprep.subr.bf16.mxu1 %v1020_v49 }
 0x30f   :  { %3475 = vmatpush3.bf16.msra.mxu1 %v1020_v49 }
 0x310   :  { %3476 = vmatprep.subr.bf16.mxu1 %v1022_v50 }
 0x313   :  { %3477 = vmatpush3.bf16.msra.mxu1 %v1022_v50 }
 0x316   :  { %3479 = vmatmul.mubr.bf16.vlgmr.msra.gmra.mrb[32].mxu1 %v4630_v52 }
 0x317   :  { %3482 = vmatprep.mubr.bf16.mxu1 %v4632_v22 }
 0x31e   :  { %3483 = vmatmul.mubr.bf16.gmra.mrb[36].mxu1 %v4636_v61 }
 0x31f   :  { %3486 = vmatprep.mubr.bf16.mxu1 %v4638_v21 }
 0x326   :  { %3487 = vmatmul.mubr.bf16.gmra.mrb[40].mxu1 %v4642_v58 }
 0x327   :  { %3490 = vmatprep.mubr.bf16.mxu1 %v4644_v34 }
 0x32e   :  { %3491 = vmatmul.mubr.bf16.gmra.mrb[44].mxu1 %v4648_v15 }
 0x32f   :  { %3530 = vmatprep.mubr.bf16.mxu1 %v4587_v3 }
 0x3e9   :  { %v3480_v7 = vpop.f32.mrb[32].mxu1 }
 0x3ea   :  { %v1130_v26 = vadd.f32 %v3480_v7, %v4523_v60  ;;  %v1065_v27 = vpop.f32.mrb[33].mxu1  ;;  %v3757_v60 = vld [vmem:[#allocation17 + $0x8] sm:$0xff]  }
 0x3eb   :  { %v1128_v49 = vadd.f32 %v1065_v27, %v4509_v42  ;;  %v3481_v50 = vpop.f32.mrb[34].mxu1 }
 0x3ec   :  { %v1131_v34 = vadd.f32 %v3481_v50, %v4518_v13  ;;  %v1068_v15 = vpop.f32.mrb[35].mxu1  ;;  %v1146_v58 = vmax.f32 %v1130_v26, 0.0 }
 0x3ed   :  { %v1129_v3 = vadd.f32 %v1068_v15, %v4512_v37  ;;  %v1144_v56 = vmax.f32 %v1128_v49, 0.0 }
 0x3ee   :  { %v1147_v21 = vmax.f32 %v1131_v34, 0.0 }
 0x3ef   :  { %v1145_v61 = vmax.f32 %v1129_v3, 0.0 }
 0x3f0   :  { %v1161_v22 = vpack.c.bf16 %v1147_v21, %v1146_v58 }
 0x3f1   :  { %v1160_v57 = vpack.c.bf16 %v1145_v61, %v1144_v56  ;;  %v3484_v52 = vpop.f32.mrb[36].mxu1 }
 0x3f2   :  { %v1134_v47 = vadd.f32 %v3484_v52, %v4551_v9  ;;  %v1081_v2 = vpop.f32.mrb[37].mxu1 }
 0x3f3   :  { %v1132_v7 = vadd.f32 %v1081_v2, %v4537_v39  ;;  %v3485_v42 = vpop.f32.mrb[38].mxu1  ;;  %3498 = vmatprep.mubr.msk.bf16.mxu0 %vm805_vm4, %v1160_v57 }
 0x3f4   :  { %v1135_v13 = vadd.f32 %v3485_v42, %v4546_v1  ;;  %v1084_v27 = vpop.f32.mrb[39].mxu1  ;;  %3499 = vmatmul.mubr.msk.bf16.vlgmr.msra.gmra.mrb[48].mxu0 %vm805_vm4, %v1161_v22  ;;  %v1150_v3 = vmax.f32 %v1134_v47, 0.0 }
 0x3f5   :  { %v1133_v37 = vadd.f32 %v1084_v27, %v4540_v19  ;;  %3547 = vmatpush3.bf16.msra.mxu0 %v3756_v6  ;;  %v1148_v21 = vmax.f32 %v1132_v7, 0.0 }
 0x3f6   :  { %v1151_v61 = vmax.f32 %v1135_v13, 0.0  ;;  %3548 = vmatprep.subr.bf16.mxu0 %v3757_v60 }
 0x3f7   :  { %v1149_v9 = vmax.f32 %v1133_v37, 0.0 }
 0x3f8   :  { %v1163_v52 = vpack.c.bf16 %v1151_v61, %v1150_v3 }
 0x3f9   :  { %v1162_v58 = vpack.c.bf16 %v1149_v9, %v1148_v21  ;;  %v3488_v34 = vpop.f32.mrb[40].mxu1  ;;  %3549 = vmatpush3.bf16.msra.mxu0 %v3757_v60 }
 0x3fa   :  { %v1138_v2 = vadd.f32 %v3488_v34, %v4565_v55  ;;  %v1097_v39 = vpop.f32.mrb[41].mxu1 }
 0x3fb   :  { %v1136_v1 = vadd.f32 %v1097_v39, %v4571_v40  ;;  %v3489_v15 = vpop.f32.mrb[42].mxu1  ;;  %3502 = vmatprep.mubr.msk.bf16.mxu0 %vm805_vm4, %v1162_v58 }
 0x3fc   :  { %v1139_v19 = vadd.f32 %v3489_v15, %v4568_v44  ;;  %v1100_v22 = vpop.f32.mrb[43].mxu1  ;;  %3503 = vmatmul.mubr.msk.bf16.gmra.mrb[52].mxu0 %vm805_vm4, %v1163_v52  ;;  %v1154_v6 = vmax.f32 %v1138_v2, 0.0 }
 0x3fd   :  { %v1137_v47 = vadd.f32 %v1100_v22, %v4574_v4  ;;  %v1152_v49 = vmax.f32 %v1136_v1, 0.0 }
 0x3fe   :  { %v1155_v26 = vmax.f32 %v1139_v19, 0.0 }
 0x3ff   :  { %v1153_v50 = vmax.f32 %v1137_v47, 0.0 }
 0x400   :  { %v1165_v56 = vpack.c.bf16 %v1155_v26, %v1154_v6 }
 0x401   :  { %v1164_v57 = vpack.c.bf16 %v1153_v50, %v1152_v49  ;;  %v3492_v55 = vpop.f32.mrb[44].mxu1 }
 0x402   :  { %v1142_v60 = vadd.f32 %v3492_v55, %v4597_v35  ;;  %v1113_v40 = vpop.f32.mrb[45].mxu1  ;;  %v1632_v35 = vpop.permute.xlu0 %1631 }
 0x403   :  { %v1140_v7 = vadd.f32 %v1113_v40, %v4603_v53  ;;  %v3493_v42 = vpop.f32.mrb[46].mxu1  ;;  %3506 = vmatprep.mubr.msk.bf16.mxu0 %vm805_vm4, %v1164_v57  ;;  %v1634_v53 = vpop.permute.xlu1 %1633 }
 0x404   :  { %v1143_v44 = vadd.f32 %v3493_v42, %v4600_v54  ;;  %v1116_v13 = vpop.f32.mrb[47].mxu1  ;;  %3507 = vmatmul.mubr.msk.bf16.gmra.mrb[56].mxu0 %vm805_vm4, %v1165_v56  ;;  %v1158_v27 = vmax.f32 %v1142_v60, 0.0 }
 0x405   :  { %v1141_v4 = vadd.f32 %v1116_v13, %v4606_v43  ;;  %v1156_v3 = vmax.f32 %v1140_v7, 0.0 }
 0x406   :  { %v1159_v37 = vmax.f32 %v1143_v44, 0.0  ;;  %v1636_v54 = vpop.permute.xlu0 %1635 }
 0x407   :  { %v1157_v61 = vmax.f32 %v1141_v4, 0.0  ;;  %v1638_v43 = vpop.permute.xlu1 %1637 }
 0x408   :  { %v1167_v21 = vpack.c.bf16 %v1159_v37, %v1158_v27 }
 0x409   :  { %v1166_v9 = vpack.c.bf16 %v1157_v61, %v1156_v3 }
 0x40a   :  { %v1640_v52 = vpop.permute.xlu0 %1639 }
 0x40b   :  { %3510 = vmatprep.mubr.msk.bf16.mxu0 %vm805_vm4, %v1166_v9  ;;  %v1642_v58 = vpop.permute.xlu1 %1641 }
 0x40c   :  { %3511 = vmatmul.mubr.msk.bf16.gmra.mrb[60].mxu0 %vm805_vm4, %v1167_v21 }
 0x40d   :  { %3550 = vmatprep.mubr.msk.bf16.mxu0 %vm805_vm4, %v1632_v35 }
 0x40e   :  { %v1644_v34 = vpop.permute.xlu0 %1643 }
 0x40f   :  { %v1646_v2 = vpop.permute.xlu1 %1645 }
 0x414   :  { %3551 = vmatmul.mubr.msk.bf16.vlgmr.msra.gmra.mrb[64].mxu0 %vm805_vm4, %v1634_v53 }
 0x415   :  { %3554 = vmatprep.mubr.msk.bf16.mxu0 %vm805_vm4, %v1636_v54 }
 0x41c   :  { %3555 = vmatmul.mubr.msk.bf16.gmra.mrb[68].mxu0 %vm805_vm4, %v1638_v43 }
 0x41d   :  { %3558 = vmatprep.mubr.msk.bf16.mxu0 %vm805_vm4, %v1640_v52 }
 0x424   :  { %3559 = vmatmul.mubr.msk.bf16.gmra.mrb[72].mxu0 %vm805_vm4, %v1642_v58 }
 0x425   :  { %3562 = vmatprep.mubr.msk.bf16.mxu0 %vm805_vm4, %v1644_v34 }
 0x42c   :  { %3563 = vmatmul.mubr.msk.bf16.gmra.mrb[76].mxu0 %vm805_vm4, %v1646_v2 }
 0x4c7   :  { %v3500_v39 = vpop.f32.mrb[48].mxu0 }
 0x4c8   :  { %v1243_v1 = vpop.f32.mrb[49].mxu0 }
 0x4c9   :  { %1322 = vrot.lane.b32.xlu0 %v1243_v1, %s4044_s29  ;;  %v3501_v15 = vpop.f32.mrb[50].mxu0 }
 0x4ca   :  { %v1246_v19 = vpop.f32.mrb[51].mxu0 }
 0x4cb   :  { %1324 = vrot.lane.b32.xlu1 %v1246_v19, %s4044_s29 }
 0x4cd   :  { %1326 = vrot.lane.b32.xlu0 %v3500_v39, %s4044_s29 }
 0x4cf   :  { %1328 = vrot.lane.b32.xlu1 %v3501_v15, %s4044_s29  ;;  %v3504_v22 = vpop.f32.mrb[52].mxu0 }
 0x4d0   :  { %v1259_v47 = vpop.f32.mrb[53].mxu0 }
 0x4d1   :  { %1330 = vrot.lane.b32.xlu0 %v1259_v47, %s4044_s29  ;;  %v3505_v6 = vpop.f32.mrb[54].mxu0 }
 0x4d2   :  { %v1262_v26 = vpop.f32.mrb[55].mxu0 }
 0x4d3   :  { %1332 = vrot.lane.b32.xlu1 %v1262_v26, %s4044_s29 }
 0x4d5   :  { %1334 = vrot.lane.b32.xlu0 %v3504_v22, %s4044_s29 }
 0x4d7   :  { %1336 = vrot.lane.b32.xlu1 %v3505_v6, %s4044_s29  ;;  %v3508_v49 = vpop.f32.mrb[56].mxu0 }
 0x4d8   :  { %v1275_v50 = vpop.f32.mrb[57].mxu0 }
 0x4d9   :  { %1338 = vrot.lane.b32.xlu0 %v1275_v50, %s4044_s29  ;;  %v3509_v56 = vpop.f32.mrb[58].mxu0 }
 0x4da   :  { %v1278_v57 = vpop.f32.mrb[59].mxu0 }
 0x4db   :  { %1340 = vrot.lane.b32.xlu1 %v1278_v57, %s4044_s29 }
 0x4dd   :  { %1342 = vrot.lane.b32.xlu0 %v3508_v49, %s4044_s29 }
 0x4df   :  { %1344 = vrot.lane.b32.xlu1 %v3509_v56, %s4044_s29  ;;  %v3512_v55 = vpop.f32.mrb[60].mxu0 }
 0x4e0   :  { %v1291_v60 = vpop.f32.mrb[61].mxu0 }
 0x4e1   :  { %1346 = vrot.lane.b32.xlu0 %v1291_v60, %s4044_s29  ;;  %v3513_v40 = vpop.f32.mrb[62].mxu0 }
 0x4e2   :  { %v1294_v7 = vpop.f32.mrb[63].mxu0 }
 0x4e3   :  { %1348 = vrot.lane.b32.xlu1 %v1294_v7, %s4044_s29 }
 0x4e5   :  { %1350 = vrot.lane.b32.xlu0 %v3512_v55, %s4044_s29 }
 0x4e7   :  { %1352 = vrot.lane.b32.xlu1 %v3513_v40, %s4044_s29  ;;  %v4700_v42 = vpop.f32.mrb[64].mxu0 }
 0x4e8   :  { %v1717_v44 = vpop.f32.mrb[65].mxu0 }
 0x4e9   :  { %v4702_v13 = vpop.f32.mrb[66].mxu0 }
 0x4ea   :  { %v1720_v4 = vpop.f32.mrb[67].mxu0 }
 0x4ef   :  { %v4704_v27 = vpop.f32.mrb[68].mxu0 }
 0x4f0   :  { %v4706_v37 = vpop.f32.mrb[69].mxu0 }
 0x4f1   :  { %v4708_v3 = vpop.f32.mrb[70].mxu0 }
 0x4f2   :  { %v1736_v61 = vpop.f32.mrb[71].mxu0 }
 0x4f7   :  { %v4710_v21 = vpop.f32.mrb[72].mxu0 }
 0x4f8   :  { %v4712_v9 = vpop.f32.mrb[73].mxu0 }
 0x4f9   :  { %v4714_v35 = vpop.f32.mrb[74].mxu0 }
 0x4fa   :  { %v4716_v53 = vpop.f32.mrb[75].mxu0 }
 0x4ff   :  { %v4718_v54 = vpop.f32.mrb[76].mxu0 }
 0x500   :  { %v4720_v43 = vpop.f32.mrb[77].mxu0 }
 0x501   :  { %v4722_v52 = vpop.f32.mrb[78].mxu0 }
 0x502   :  { %v4724_v58 = vpop.f32.mrb[79].mxu0 }
 0x53b   :  { %v1323_v34 = vpop.permute.xlu0 %1322 }
 0x53c   :  { %v4727_v39 = vadd.f32 %v1323_v34, %v4500_v29 }
 0x53d   :  { %v1325_v2 = vpop.permute.xlu1 %1324 }
 0x53e   :  { %5684 = vst [vmem:[#allocation54_spill] sm:$0xff] %v4727_v39  ;;  %v4730_v1 = vadd.f32 %v1325_v2, %v4503_v28 }
 0x53f   :  { %v1327_v15 = vpop.permute.xlu0 %1326 }
 0x540   :  { %5685 = vst [vmem:[#allocation55_spill] sm:$0xff] %v4730_v1  ;;  %v1386_v19 = vpack.c.bf16 %v4730_v1, %v4727_v39  ;;  %v4735_v47 = vadd.f32 %v1327_v15, %v4515_v38 }
 0x541   :  { %v1329_v22 = vpop.permute.xlu1 %1328 }
 0x542   :  { %5686 = vst [vmem:[#allocation56_spill] sm:$0xff] %v4735_v47  ;;  %v4738_v6 = vadd.f32 %v1329_v22, %v4506_v31  ;;  %1402 = vrot.lane.b32.xlu0 %v1386_v19, %s4060_s30 }
 0x543   :  { %v1331_v26 = vpop.permute.xlu0 %1330 }
 0x544   :  { %5687 = vst [vmem:[#allocation57_spill] sm:$0xff] %v4738_v6  ;;  %v1387_v29 = vpack.c.bf16 %v4738_v6, %v4735_v47  ;;  %v4744_v49 = vadd.f32 %v1331_v26, %v4527_v20 }
 0x545   :  { %v1333_v28 = vpop.permute.xlu1 %1332 }
 0x546   :  { %5688 = vst [vmem:[#allocation58_spill] sm:$0xff] %v4744_v49  ;;  %v4747_v50 = vadd.f32 %v1333_v28, %v4532_v11  ;;  %1404 = vrot.lane.b32.xlu1 %v1387_v29, %s4060_s30  ;;  %v4787_v29 = vadd.f32 %v1720_v4, %v4373_v25 }
 0x547   :  { %v1335_v38 = vpop.permute.xlu0 %1334 }
 0x548   :  { %5689 = vst [vmem:[#allocation59_spill] sm:$0xff] %v4747_v50  ;;  %v1388_v31 = vpack.c.bf16 %v4747_v50, %v4744_v49  ;;  %v4753_v57 = vadd.f32 %v1335_v38, %v4543_v17  ;;  %v4792_v38 = vadd.f32 %v1717_v44, %v4368_v18 }
 0x549   :  { %v1337_v56 = vpop.permute.xlu1 %1336 }
 0x54a   :  { %5690 = vst [vmem:[#allocation60_spill] sm:$0xff] %v4753_v57  ;;  %v4756_v55 = vadd.f32 %v1337_v56, %v4534_v5  ;;  %1406 = vrot.lane.b32.xlu0 %v1388_v31, %s4060_s30  ;;  %v1796_v4 = vpack.c.bf16 %v4787_v29, %v4792_v38  ;;  %v4808_v56 = vadd.f32 %v1736_v61, %v4449_v24 }
 0x54b   :  { %v1339_v20 = vpop.permute.xlu0 %1338  ;;  %v4826_v61 = vadd.f32 %v4708_v3, %v4467_v51 }
 0x54c   :  { %5691 = vst [vmem:[#allocation61_spill] sm:$0xff] %v4756_v55  ;;  %v1389_v11 = vpack.c.bf16 %v4756_v55, %v4753_v57  ;;  %v4762_v40 = vadd.f32 %v1339_v20, %v4558_v33 }
 0x54d   :  { %v1341_v60 = vpop.permute.xlu1 %1340 }
 0x54e   :  { %5692 = vst [vmem:[#allocation62_spill] sm:$0xff] %v4762_v40  ;;  %v4765_v7 = vadd.f32 %v1341_v60, %v4562_v45  ;;  %1408 = vrot.lane.b32.xlu1 %v1389_v11, %s4060_s30  ;;  %v4840_v11 = vadd.f32 %v4712_v9, %v4470_v62  ;;  %v4848_v60 = vadd.f32 %v4714_v35, %v4479_v12 }
 0x54f   :  { %v1343_v17 = vpop.permute.xlu0 %1342  ;;  %v4858_v9 = vadd.f32 %v4710_v21, %v4476_v10  ;;  %v5701_v21 = vld [vmem:[#allocation44_spill] sm:$0xff] }
 0x550   :  { %5693 = vst [vmem:[#allocation63_spill] sm:$0xff] %v4765_v7  ;;  %v1390_v5 = vpack.c.bf16 %v4765_v7, %v4762_v40  ;;  %v4771_v2 = vadd.f32 %v1343_v17, %v4554_v8  ;;  %v4862_v17 = vadd.f32 %v4720_v43, %v4486_v30 }
 0x551   :  { %v1345_v34 = vpop.permute.xlu1 %1344  ;;  %v1801_v35 = vpack.c.bf16 %v4848_v60, %v4858_v9 }
 0x552   :  { %5694 = vst [vmem:[#allocation64_spill] sm:$0xff] %v4771_v2  ;;  %v4774_v15 = vadd.f32 %v1345_v34, %v4556_v14  ;;  %1410 = vrot.lane.b32.xlu0 %v1390_v5, %s4060_s30  ;;  %v5700_v5 = vld [vmem:[#allocation45_spill] sm:$0xff] }
 0x553   :  { %v1347_v33 = vpop.permute.xlu0 %1346  ;;  %v4870_v34 = vadd.f32 %v4722_v52, %v5700_v5 }
 0x554   :  { %5695 = vst [vmem:[#allocation65_spill] sm:$0xff] %v4774_v15  ;;  %v1391_v45 = vpack.c.bf16 %v4774_v15, %v4771_v2  ;;  %v4780_v22 = vadd.f32 %v1347_v33, %v4590_v36  ;;  %v4876_v33 = vadd.f32 %v4718_v54, %v5701_v21 }
 0x555   :  { %v1349_v19 = vpop.permute.xlu1 %1348 }
 0x556   :  { %5696 = vst [vmem:[#allocation66_spill] sm:$0xff] %v4780_v22  ;;  %v4783_v26 = vadd.f32 %v1349_v19, %v4593_v59  ;;  %1412 = vrot.lane.b32.xlu1 %v1391_v45, %s4060_s30  ;;  %v4803_v59 = vadd.f32 %v4702_v13, %v4439_v16  ;;  %v1803_v43 = vpack.c.bf16 %v4870_v34, %v4876_v33 }
 0x557   :  { %v1351_v8 = vpop.permute.xlu0 %1350 }
 0x558   :  { %5697 = vst [vmem:[#allocation67_spill] sm:$0xff] %v4783_v26  ;;  %v1392_v14 = vpack.c.bf16 %v4783_v26, %v4780_v22  ;;  %v4795_v31 = vadd.f32 %v1351_v8, %v4581_v46  ;;  %v4814_v46 = vadd.f32 %v4700_v42, %v4390_v41  ;;  %v4832_v42 = vadd.f32 %v4716_v53, %v4473_v0 }
 0x559   :  { %v1353_v28 = vpop.permute.xlu1 %1352 }
 0x55a   :  { %5698 = vst [vmem:[#allocation68_spill] sm:$0xff] %v4795_v31  ;;  %v4798_v36 = vadd.f32 %v1353_v28, %v4583_v63  ;;  %1414 = vrot.lane.b32.xlu0 %v1392_v14, %s4060_s30  ;;  %v4818_v63 = vadd.f32 %v4706_v37, %v4446_v23  ;;  %v1797_v13 = vpack.c.bf16 %v4803_v59, %v4814_v46 }
 0x55b   :  { %v4836_v37 = vadd.f32 %v4704_v27, %v4464_v48  ;;  %v1800_v53 = vpack.c.bf16 %v4832_v42, %v4840_v11  ;;  %v4854_v27 = vadd.f32 %v4724_v58, %v4489_v32 }
 0x55c   :  { %5699 = vst [vmem:[#allocation69_spill] sm:$0xff] %v4798_v36  ;;  %v1393_v44 = vpack.c.bf16 %v4798_v36, %v4795_v31  ;;  %v1798_v20 = vpack.c.bf16 %v4808_v56, %v4818_v63 }
 0x55d   :  { %v1799_v3 = vpack.c.bf16 %v4826_v61, %v4836_v37  ;;  %v1802_v58 = vpack.c.bf16 %v4854_v27, %v4862_v17 }
 0x55e   :  { %1416 = vrot.lane.b32.xlu1 %v1393_v44, %s4060_s30  ;;  %1812 = vrot.lane.b32.xlu0 %v1796_v4, %s4059_s10 }
 0x562   :  { %1814 = vrot.lane.b32.xlu1 %v1797_v13, %s4059_s10  ;;  %1816 = vrot.lane.b32.xlu0 %v1798_v20, %s4059_s10  ;;  %v5702_v13 = vld [vmem:[#allocation47_spill] sm:$0xff] }
 0x566   :  { %1818 = vrot.lane.b32.xlu1 %v1799_v3, %s4059_s10  ;;  %1820 = vrot.lane.b32.xlu0 %v1800_v53, %s4059_s10  ;;  %v5703_v3 = vld [vmem:[#allocation48_spill] sm:$0xff] }
 0x56a   :  { %1822 = vrot.lane.b32.xlu1 %v1801_v35, %s4059_s10  ;;  %1824 = vrot.lane.b32.xlu0 %v1802_v58, %s4059_s10  ;;  %v5704_v35 = vld [vmem:[#allocation49_spill] sm:$0xff] }
 0x56e   :  { %1826 = vrot.lane.b32.xlu1 %v1803_v43, %s4059_s10  ;;  %v5705_v43 = vld [vmem:[#allocation50_spill] sm:$0xff] }
 0x5b4   :  { %v1403_v45 = vpop.permute.xlu0 %1402 }
 0x5b5   :  { %3514 = vmatprep.subr.bf16.mxu1 %v1403_v45 }
 0x5b6   :  { %3515 = vmatpush3.bf16.msra.mxu1 %v1403_v45 }
 0x5b8   :  { %v1405_v52 = vpop.permute.xlu1 %1404 }
 0x5b9   :  { %3516 = vmatprep.subr.bf16.mxu1 %v1405_v52 }
 0x5ba   :  { %3517 = vmatpush3.bf16.msra.mxu1 %v1405_v52  ;;  %v5706_v52 = vld [vmem:[#allocation51_spill] sm:$0xff] }
 0x5bc   :  { %v1407_v19 = vpop.permute.xlu0 %1406 }
 0x5bd   :  { %3518 = vmatprep.subr.bf16.mxu1 %v1407_v19 }
 0x5be   :  { %3519 = vmatpush3.bf16.msra.mxu1 %v1407_v19 }
 0x5c0   :  { %v1409_v54 = vpop.permute.xlu1 %1408 }
 0x5c1   :  { %3520 = vmatprep.subr.bf16.mxu1 %v1409_v54 }
 0x5c2   :  { %3521 = vmatpush3.bf16.msra.mxu1 %v1409_v54  ;;  %v5707_v54 = vld [vmem:[#allocation52_spill] sm:$0xff] }
 0x5c4   :  { %v1411_v8 = vpop.permute.xlu0 %1410 }
 0x5c5   :  { %3522 = vmatprep.subr.bf16.mxu1 %v1411_v8 }
 0x5c6   :  { %3523 = vmatpush3.bf16.msra.mxu1 %v1411_v8 }
 0x5c8   :  { %v1413_v14 = vpop.permute.xlu1 %1412 }
 0x5c9   :  { %3524 = vmatprep.subr.bf16.mxu1 %v1413_v14 }
 0x5ca   :  { %3525 = vmatpush3.bf16.msra.mxu1 %v1413_v14  ;;  %v5708_v14 = vld [vmem:[#allocation53_spill] sm:$0xff] }
 0x5cc   :  { %v1415_v28 = vpop.permute.xlu0 %1414 }
 0x5cd   :  { %3526 = vmatprep.subr.bf16.mxu1 %v1415_v28 }
 0x5ce   :  { %3527 = vmatpush3.bf16.msra.mxu1 %v1415_v28 }
 0x5d0   :  { %v1417_v4 = vpop.permute.xlu1 %1416  ;;  %v1813_v44 = vpop.permute.xlu0 %1812 }
 0x5d1   :  { %3528 = vmatprep.subr.bf16.mxu1 %v1417_v4 }
 0x5d2   :  { %3529 = vmatpush3.bf16.msra.mxu1 %v1417_v4  ;;  %v5709_v4 = vld [vmem:[#allocation46_spill] sm:$0xff] }
 0x5d3   :  { %3566 = vmatprep.subr.bf16.mxu1 %v1813_v44 }
 0x5d4   :  { %v1815_v20 = vpop.permute.xlu1 %1814  ;;  %v1817_v53 = vpop.permute.xlu0 %1816 }
 0x5d5   :  { %3531 = vmatmul.mubr.bf16.vlgmr.msra.gmra.mrb[48].mxu1 %v5702_v13 }
 0x5d6   :  { %3567 = vmatpush3.bf16.msra.mxu1 %v1813_v44  ;;  %3534 = vmatprep.mubr.bf16.mxu1 %v5703_v3  ;;  %v3758_v44 = vld [vmem:[#allocation17 + $0x10] sm:$0xff]  }
 0x5d7   :  { %3568 = vmatprep.subr.bf16.mxu1 %v1815_v20  ;;  %3598 = vmatprep.subr.bf16.mxu0 %v3758_v44 }
 0x5d8   :  { %v1819_v58 = vpop.permute.xlu1 %1818  ;;  %v1821_v45 = vpop.permute.xlu0 %1820  ;;  %3599 = vmatpush3.bf16.msra.mxu0 %v3758_v44 }
 0x5da   :  { %3569 = vmatpush3.bf16.msra.mxu1 %v1815_v20  ;;  %v3759_v20 = vld [vmem:[#allocation17 + $0x18] sm:$0xff]  }
 0x5db   :  { %3570 = vmatprep.subr.bf16.mxu1 %v1817_v53  ;;  %3600 = vmatprep.subr.bf16.mxu0 %v3759_v20 }
 0x5dc   :  { %v1823_v19 = vpop.permute.xlu1 %1822  ;;  %v1825_v8 = vpop.permute.xlu0 %1824  ;;  %3601 = vmatpush3.bf16.msra.mxu0 %v3759_v20 }
 0x5dd   :  { %3535 = vmatmul.mubr.bf16.gmra.mrb[52].mxu1 %v5704_v35 }
 0x5de   :  { %3571 = vmatpush3.bf16.msra.mxu1 %v1817_v53  ;;  %3538 = vmatprep.mubr.bf16.mxu1 %v5705_v43 }
 0x5df   :  { %3572 = vmatprep.subr.bf16.mxu1 %v1819_v58 }
 0x5e0   :  { %v1827_v28 = vpop.permute.xlu1 %1826 }
 0x5e2   :  { %3573 = vmatpush3.bf16.msra.mxu1 %v1819_v58 }
 0x5e3   :  { %3574 = vmatprep.subr.bf16.mxu1 %v1821_v45 }
 0x5e5   :  { %3539 = vmatmul.mubr.bf16.gmra.mrb[56].mxu1 %v5706_v52 }
 0x5e6   :  { %3575 = vmatpush3.bf16.msra.mxu1 %v1821_v45  ;;  %3542 = vmatprep.mubr.bf16.mxu1 %v5707_v54 }
 0x5e7   :  { %3576 = vmatprep.subr.bf16.mxu1 %v1823_v19 }
 0x5ea   :  { %3577 = vmatpush3.bf16.msra.mxu1 %v1823_v19 }
 0x5eb   :  { %3578 = vmatprep.subr.bf16.mxu1 %v1825_v8 }
 0x5ed   :  { %3543 = vmatmul.mubr.bf16.gmra.mrb[60].mxu1 %v5708_v14 }
 0x5ee   :  { %3579 = vmatpush3.bf16.msra.mxu1 %v1825_v8  ;;  %3582 = vmatprep.mubr.bf16.mxu1 %v5709_v4 }
 0x5ef   :  { %3580 = vmatprep.subr.bf16.mxu1 %v1827_v28 }
 0x5f2   :  { %3581 = vmatpush3.bf16.msra.mxu1 %v1827_v28 }
 0x5f5   :  { %3583 = vmatmul.mubr.bf16.vlgmr.msra.gmra.mrb[64].mxu1 %v5702_v13 }
 0x5f6   :  { %3586 = vmatprep.mubr.bf16.mxu1 %v5703_v3 }
 0x5fd   :  { %3587 = vmatmul.mubr.bf16.gmra.mrb[68].mxu1 %v5704_v35 }
 0x5fe   :  { %3590 = vmatprep.mubr.bf16.mxu1 %v5705_v43 }
 0x605   :  { %3591 = vmatmul.mubr.bf16.gmra.mrb[72].mxu1 %v5706_v52 }
 0x606   :  { %3594 = vmatprep.mubr.bf16.mxu1 %v5707_v54 }
 0x60d   :  { %3595 = vmatmul.mubr.bf16.gmra.mrb[76].mxu1 %v5708_v14 }
 0x60e   :  { %3634 = vmatprep.mubr.bf16.mxu1 %v5709_v4 }
 0x6a8   :  { %v4899_v53 = vpop.f32.mrb[48].mxu1 }
 0x6a9   :  { %v4901_v58 = vpop.f32.mrb[49].mxu1 }
 0x6aa   :  { %v4903_v45 = vpop.f32.mrb[50].mxu1 }
 0x6ab   :  { %v4905_v19 = vpop.f32.mrb[51].mxu1 }
 0x6b0   :  { %v4907_v8 = vpop.f32.mrb[52].mxu1 }
 0x6b1   :  { %v4909_v28 = vpop.f32.mrb[53].mxu1 }
 0x6b2   :  { %v4911_v31 = vpop.f32.mrb[54].mxu1 }
 0x6b3   :  { %v4913_v4 = vpop.f32.mrb[55].mxu1 }
 0x6b8   :  { %v4915_v44 = vpop.f32.mrb[56].mxu1 }
 0x6b9   :  { %5710 = vst [vmem:[#allocation45_spill] sm:$0xff] %v4915_v44  ;;  %v4917_v36 = vpop.f32.mrb[57].mxu1 }
 0x6ba   :  { %5711 = vst [vmem:[#allocation44_spill] sm:$0xff] %v4917_v36  ;;  %v4919_v20 = vpop.f32.mrb[58].mxu1 }
 0x6bb   :  { %5712 = vst [vmem:[#allocation47_spill] sm:$0xff] %v4919_v20  ;;  %v4921_v26 = vpop.f32.mrb[59].mxu1 }
 0x6bc   :  { %5713 = vst [vmem:[#allocation48_spill] sm:$0xff] %v4921_v26 }
 0x6c0   :  { %v4923_v22 = vpop.f32.mrb[60].mxu1 }
 0x6c1   :  { %5714 = vst [vmem:[#allocation49_spill] sm:$0xff] %v4923_v22  ;;  %v4925_v15 = vpop.f32.mrb[61].mxu1 }
 0x6c2   :  { %5715 = vst [vmem:[#allocation50_spill] sm:$0xff] %v4925_v15  ;;  %v4927_v2 = vpop.f32.mrb[62].mxu1 }
 0x6c3   :  { %5716 = vst [vmem:[#allocation51_spill] sm:$0xff] %v4927_v2  ;;  %v4929_v7 = vpop.f32.mrb[63].mxu1 }
 0x6c4   :  { %5717 = vst [vmem:[#allocation52_spill] sm:$0xff] %v4929_v7 }
 0x6c8   :  { %v3584_v40 = vpop.f32.mrb[64].mxu1 }
 0x6c9   :  { %v1935_v57 = vadd.f32 %v3584_v40, %v4814_v46  ;;  %v1870_v55 = vpop.f32.mrb[65].mxu1 }
 0x6ca   :  { %v1933_v50 = vadd.f32 %v1870_v55, %v4792_v38  ;;  %v3585_v49 = vpop.f32.mrb[66].mxu1 }
 0x6cb   :  { %v1936_v6 = vadd.f32 %v3585_v49, %v4803_v59  ;;  %v1873_v47 = vpop.f32.mrb[67].mxu1  ;;  %v1951_v39 = vmax.f32 %v1935_v57, 0.0 }
 0x6cc   :  { %v1934_v1 = vadd.f32 %v1873_v47, %v4787_v29  ;;  %v1949_v20 = vmax.f32 %v1933_v50, 0.0 }
 0x6cd   :  { %v1952_v22 = vmax.f32 %v1936_v6, 0.0 }
 0x6ce   :  { %v1950_v15 = vmax.f32 %v1934_v1, 0.0 }
 0x6cf   :  { %v1966_v44 = vpack.c.bf16 %v1952_v22, %v1951_v39 }
 0x6d0   :  { %v1965_v2 = vpack.c.bf16 %v1950_v15, %v1949_v20  ;;  %v3588_v26 = vpop.f32.mrb[68].mxu1 }
 0x6d1   :  { %v1939_v7 = vadd.f32 %v3588_v26, %v4836_v37  ;;  %v1886_v36 = vpop.f32.mrb[69].mxu1 }
 0x6d2   :  { %v1937_v40 = vadd.f32 %v1886_v36, %v4818_v63  ;;  %v3589_v46 = vpop.f32.mrb[70].mxu1  ;;  %3602 = vmatprep.mubr.msk.bf16.mxu0 %vm805_vm4, %v1965_v2 }
 0x6d3   :  { %v1940_v49 = vadd.f32 %v3589_v46, %v4826_v61  ;;  %v1889_v55 = vpop.f32.mrb[71].mxu1  ;;  %3603 = vmatmul.mubr.msk.bf16.vlgmr.msra.gmra.mrb[80].mxu0 %vm805_vm4, %v1966_v44  ;;  %v1955_v6 = vmax.f32 %v1939_v7, 0.0 }
 0x6d4   :  { %v1938_v47 = vadd.f32 %v1889_v55, %v4808_v56  ;;  %v1953_v39 = vmax.f32 %v1937_v40, 0.0 }
 0x6d5   :  { %v1956_v1 = vmax.f32 %v1940_v49, 0.0 }
 0x6d6   :  { %v1954_v50 = vmax.f32 %v1938_v47, 0.0 }
 0x6d7   :  { %v1968_v57 = vpack.c.bf16 %v1956_v1, %v1955_v6 }
 0x6d8   :  { %v1967_v15 = vpack.c.bf16 %v1954_v50, %v1953_v39  ;;  %v3592_v22 = vpop.f32.mrb[72].mxu1 }
 0x6d9   :  { %v1943_v26 = vadd.f32 %v3592_v22, %v4858_v9  ;;  %v1902_v29 = vpop.f32.mrb[73].mxu1 }
 0x6da   :  { %v1941_v38 = vadd.f32 %v1902_v29, %v4840_v11  ;;  %v3593_v2 = vpop.f32.mrb[74].mxu1  ;;  %3606 = vmatprep.mubr.msk.bf16.mxu0 %vm805_vm4, %v1967_v15 }
 0x6db   :  { %v1944_v36 = vadd.f32 %v3593_v2, %v4848_v60  ;;  %v1905_v59 = vpop.f32.mrb[75].mxu1  ;;  %3607 = vmatmul.mubr.msk.bf16.gmra.mrb[84].mxu0 %vm805_vm4, %v1968_v57  ;;  %v1959_v56 = vmax.f32 %v1943_v26, 0.0 }
 0x6dc   :  { %v1942_v7 = vadd.f32 %v1905_v59, %v4832_v42  ;;  %v1957_v61 = vmax.f32 %v1941_v38, 0.0 }
 0x6dd   :  { %v1960_v63 = vmax.f32 %v1944_v36, 0.0 }
 0x6de   :  { %v1958_v37 = vmax.f32 %v1942_v7, 0.0 }
 0x6df   :  { %v1970_v44 = vpack.c.bf16 %v1960_v63, %v1959_v56 }
 0x6e0   :  { %v1969_v20 = vpack.c.bf16 %v1958_v37, %v1957_v61  ;;  %v3596_v9 = vpop.f32.mrb[76].mxu1 }
 0x6e1   :  { %v1947_v40 = vadd.f32 %v3596_v9, %v4876_v33  ;;  %v1918_v11 = vpop.f32.mrb[77].mxu1 }
 0x6e2   :  { %v1945_v46 = vadd.f32 %v1918_v11, %v4862_v17  ;;  %v3597_v49 = vpop.f32.mrb[78].mxu1  ;;  %3610 = vmatprep.mubr.msk.bf16.mxu0 %vm805_vm4, %v1969_v20 }
 0x6e3   :  { %v1948_v60 = vadd.f32 %v3597_v49, %v4870_v34  ;;  %v1921_v55 = vpop.f32.mrb[79].mxu1  ;;  %3611 = vmatmul.mubr.msk.bf16.gmra.mrb[88].mxu0 %vm805_vm4, %v1970_v44  ;;  %v1963_v47 = vmax.f32 %v1947_v40, 0.0 }
 0x6e4   :  { %v1946_v42 = vadd.f32 %v1921_v55, %v4854_v27  ;;  %v1961_v1 = vmax.f32 %v1945_v46, 0.0 }
 0x6e5   :  { %v1964_v6 = vmax.f32 %v1948_v60, 0.0 }
 0x6e6   :  { %v1962_v39 = vmax.f32 %v1946_v42, 0.0 }
 0x6e7   :  { %v1972_v50 = vpack.c.bf16 %v1964_v6, %v1963_v47 }
 0x6e8   :  { %v1971_v57 = vpack.c.bf16 %v1962_v39, %v1961_v1 }
 0x6ea   :  { %3614 = vmatprep.mubr.msk.bf16.mxu0 %vm805_vm4, %v1971_v57 }
 0x6eb   :  { %3615 = vmatmul.mubr.msk.bf16.gmra.mrb[92].mxu0 %vm805_vm4, %v1972_v50 }
 0x7a6   :  { %v3604_v17 = vpop.f32.mrb[80].mxu0 }
 0x7a7   :  { %v2048_v33 = vpop.f32.mrb[81].mxu0 }
 0x7a8   :  { %2127 = vrot.lane.b32.xlu0 %v2048_v33, %s4044_s29  ;;  %v3605_v34 = vpop.f32.mrb[82].mxu0 }
 0x7a9   :  { %v2051_v15 = vpop.f32.mrb[83].mxu0 }
 0x7aa   :  { %2129 = vrot.lane.b32.xlu1 %v2051_v15, %s4044_s29 }
 0x7ac   :  { %2131 = vrot.lane.b32.xlu0 %v3604_v17, %s4044_s29 }
 0x7ae   :  { %2133 = vrot.lane.b32.xlu1 %v3605_v34, %s4044_s29  ;;  %v3608_v27 = vpop.f32.mrb[84].mxu0 }
 0x7af   :  { %v2064_v22 = vpop.f32.mrb[85].mxu0 }
 0x7b0   :  { %2135 = vrot.lane.b32.xlu0 %v2064_v22, %s4044_s29  ;;  %v3609_v26 = vpop.f32.mrb[86].mxu0 }
 0x7b1   :  { %v2067_v29 = vpop.f32.mrb[87].mxu0 }
 0x7b2   :  { %2137 = vrot.lane.b32.xlu1 %v2067_v29, %s4044_s29 }
 0x7b4   :  { %2139 = vrot.lane.b32.xlu0 %v3608_v27, %s4044_s29 }
 0x7b6   :  { %2141 = vrot.lane.b32.xlu1 %v3609_v26, %s4044_s29  ;;  %v3612_v38 = vpop.f32.mrb[88].mxu0 }
 0x7b7   :  { %v2080_v2 = vpop.f32.mrb[89].mxu0 }
 0x7b8   :  { %2143 = vrot.lane.b32.xlu0 %v2080_v2, %s4044_s29  ;;  %v3613_v36 = vpop.f32.mrb[90].mxu0 }
 0x7b9   :  { %v2083_v59 = vpop.f32.mrb[91].mxu0 }
 0x7ba   :  { %2145 = vrot.lane.b32.xlu1 %v2083_v59, %s4044_s29 }
 0x7bc   :  { %2147 = vrot.lane.b32.xlu0 %v3612_v38, %s4044_s29 }
 0x7be   :  { %2149 = vrot.lane.b32.xlu1 %v3613_v36, %s4044_s29  ;;  %v3616_v7 = vpop.f32.mrb[92].mxu0 }
 0x7bf   :  { %v2096_v56 = vpop.f32.mrb[93].mxu0 }
 0x7c0   :  { %2151 = vrot.lane.b32.xlu0 %v2096_v56, %s4044_s29  ;;  %v3617_v63 = vpop.f32.mrb[94].mxu0 }
 0x7c1   :  { %v2099_v61 = vpop.f32.mrb[95].mxu0 }
 0x7c2   :  { %2153 = vrot.lane.b32.xlu1 %v2099_v61, %s4044_s29 }
 0x7c4   :  { %2155 = vrot.lane.b32.xlu0 %v3616_v7, %s4044_s29 }
 0x7c6   :  { %2157 = vrot.lane.b32.xlu1 %v3617_v63, %s4044_s29 }
 0x81a   :  { %v2128_v37 = vpop.permute.xlu0 %2127 }
 0x81b   :  { %v4972_v20 = vadd.f32 %v2128_v37, %v4368_v18 }
 0x81c   :  { %v2130_v44 = vpop.permute.xlu1 %2129 }
 0x81d   :  { %v4975_v9 = vadd.f32 %v2130_v44, %v4373_v25 }
 0x81e   :  { %v2132_v40 = vpop.permute.xlu0 %2131 }
 0x81f   :  { %v2191_v11 = vpack.c.bf16 %v4975_v9, %v4972_v20  ;;  %v4980_v49 = vadd.f32 %v2132_v40, %v4390_v41 }
 0x820   :  { %v2134_v46 = vpop.permute.xlu1 %2133 }
 0x821   :  { %v4983_v60 = vadd.f32 %v2134_v46, %v4439_v16  ;;  %2207 = vrot.lane.b32.xlu0 %v2191_v11, %s4060_s30 }
 0x822   :  { %v2136_v55 = vpop.permute.xlu0 %2135 }
 0x823   :  { %v2192_v18 = vpack.c.bf16 %v4983_v60, %v4980_v49  ;;  %v4989_v25 = vadd.f32 %v2136_v55, %v4446_v23 }
 0x824   :  { %v2138_v42 = vpop.permute.xlu1 %2137 }
 0x825   :  { %v4992_v47 = vadd.f32 %v2138_v42, %v4449_v24  ;;  %2209 = vrot.lane.b32.xlu1 %v2192_v18, %s4060_s30 }
 0x826   :  { %v2140_v41 = vpop.permute.xlu0 %2139 }
 0x827   :  { %v2193_v16 = vpack.c.bf16 %v4992_v47, %v4989_v25  ;;  %v4998_v1 = vadd.f32 %v2140_v41, %v4464_v48  ;;  %v3760_v41 = vld [vmem:[#allocation19] sm:$0xff]  }
 0x828   :  { %v2142_v6 = vpop.permute.xlu1 %2141 }
 0x829   :  { %v5001_v39 = vadd.f32 %v2142_v6, %v4467_v51  ;;  %2211 = vrot.lane.b32.xlu0 %v2193_v16, %s4060_s30 }
 0x82a   :  { %v2144_v23 = vpop.permute.xlu0 %2143 }
 0x82b   :  { %v2194_v24 = vpack.c.bf16 %v5001_v39, %v4998_v1  ;;  %v5007_v57 = vadd.f32 %v2144_v23, %v4470_v62 }
 0x82c   :  { %v2146_v50 = vpop.permute.xlu1 %2145 }
 0x82d   :  { %v5010_v17 = vadd.f32 %v2146_v50, %v4473_v0  ;;  %2213 = vrot.lane.b32.xlu1 %v2194_v24, %s4060_s30 }
 0x82e   :  { %v2148_v48 = vpop.permute.xlu0 %2147 }
 0x82f   :  { %v2195_v51 = vpack.c.bf16 %v5010_v17, %v5007_v57  ;;  %v5016_v34 = vadd.f32 %v2148_v48, %v4476_v10 }
 0x830   :  { %v2150_v33 = vpop.permute.xlu1 %2149 }
 0x831   :  { %v5019_v15 = vadd.f32 %v2150_v33, %v4479_v12  ;;  %2215 = vrot.lane.b32.xlu0 %v2195_v51, %s4060_s30 }
 0x832   :  { %v2152_v62 = vpop.permute.xlu0 %2151 }
 0x833   :  { %v2196_v0 = vpack.c.bf16 %v5019_v15, %v5016_v34  ;;  %v5025_v22 = vadd.f32 %v2152_v62, %v4486_v30 }
 0x834   :  { %v2154_v27 = vpop.permute.xlu1 %2153 }
 0x835   :  { %v5028_v26 = vadd.f32 %v2154_v27, %v4489_v32  ;;  %2217 = vrot.lane.b32.xlu1 %v2196_v0, %s4060_s30 }
 0x836   :  { %v2156_v10 = vpop.permute.xlu0 %2155 }
 0x837   :  { %v2197_v12 = vpack.c.bf16 %v5028_v26, %v5025_v22  ;;  %v5034_v38 = vadd.f32 %v2156_v10, %v5701_v21 }
 0x838   :  { %v2158_v29 = vpop.permute.xlu1 %2157 }
 0x839   :  { %v5037_v2 = vadd.f32 %v2158_v29, %v5700_v5  ;;  %2219 = vrot.lane.b32.xlu0 %v2197_v12, %s4060_s30 }
 0x83b   :  { %v2198_v30 = vpack.c.bf16 %v5037_v2, %v5034_v38 }
 0x83d   :  { %2221 = vrot.lane.b32.xlu1 %v2198_v30, %s4060_s30 }
 0x893   :  { %v2208_v32 = vpop.permute.xlu0 %2207 }
 0x894   :  { %3618 = vmatprep.subr.bf16.mxu1 %v2208_v32 }
 0x895   :  { %3619 = vmatpush3.bf16.msra.mxu1 %v2208_v32 }
 0x897   :  { %v2210_v36 = vpop.permute.xlu1 %2209 }
 0x898   :  { %3620 = vmatprep.subr.bf16.mxu1 %v2210_v36 }
 0x899   :  { %3621 = vmatpush3.bf16.msra.mxu1 %v2210_v36 }
 0x89b   :  { %v2212_v59 = vpop.permute.xlu0 %2211 }
 0x89c   :  { %3622 = vmatprep.subr.bf16.mxu1 %v2212_v59 }
 0x89d   :  { %3623 = vmatpush3.bf16.msra.mxu1 %v2212_v59 }
 0x89f   :  { %v2214_v21 = vpop.permute.xlu1 %2213 }
 0x8a0   :  { %3624 = vmatprep.subr.bf16.mxu1 %v2214_v21 }
 0x8a1   :  { %3625 = vmatpush3.bf16.msra.mxu1 %v2214_v21 }
 0x8a3   :  { %v2216_v5 = vpop.permute.xlu0 %2215 }
 0x8a4   :  { %3626 = vmatprep.subr.bf16.mxu1 %v2216_v5 }
 0x8a5   :  { %3627 = vmatpush3.bf16.msra.mxu1 %v2216_v5 }
 0x8a7   :  { %v2218_v7 = vpop.permute.xlu1 %2217 }
 0x8a8   :  { %3628 = vmatprep.subr.bf16.mxu1 %v2218_v7 }
 0x8a9   :  { %3629 = vmatpush3.bf16.msra.mxu1 %v2218_v7 }
 0x8ab   :  { %v2220_v56 = vpop.permute.xlu0 %2219 }
 0x8ac   :  { %3630 = vmatprep.subr.bf16.mxu1 %v2220_v56 }
 0x8ad   :  { %3631 = vmatpush3.bf16.msra.mxu1 %v2220_v56 }
 0x8af   :  { %v2222_v63 = vpop.permute.xlu1 %2221 }
 0x8b0   :  { %3632 = vmatprep.subr.bf16.mxu1 %v2222_v63 }
 0x8b1   :  { %3633 = vmatpush3.bf16.msra.mxu1 %v2222_v63 }
 0x8b2   :  { %3670 = vmatprep.subr.bf16.mxu1 %v3760_v41 }
 0x8b4   :  { %3635 = vmatmul.mubr.bf16.vlgmr.msra.gmra.mrb[80].mxu1 %v5702_v13 }
 0x8b5   :  { %3638 = vmatprep.mubr.bf16.mxu1 %v5703_v3  ;;  %3671 = vmatpush3.bf16.msra.mxu1 %v3760_v41 }
 0x8bc   :  { %3639 = vmatmul.mubr.bf16.gmra.mrb[84].mxu1 %v5704_v35 }
 0x8bd   :  { %3642 = vmatprep.mubr.bf16.mxu1 %v5705_v43 }
 0x8c4   :  { %3643 = vmatmul.mubr.bf16.gmra.mrb[88].mxu1 %v5706_v52 }
 0x8c5   :  { %3646 = vmatprep.mubr.bf16.mxu1 %v5707_v54 }
 0x8cc   :  { %3647 = vmatmul.mubr.bf16.gmra.mrb[92].mxu1 %v5708_v14 }
 0x987   :  { %v3636_v61 = vpop.f32.mrb[80].mxu1 }
 0x988   :  { %v2265_v37 = vpop.f32.mrb[81].mxu1 }
 0x989   :  { %2344 = vrot.lane.b32.xlu0 %v2265_v37, %s4044_s29  ;;  %v3637_v44 = vpop.f32.mrb[82].mxu1  ;;  %v5722_v37 = vld [vmem:[#allocation50_spill] sm:$0xff] }
 0x98a   :  { %v2268_v40 = vpop.f32.mrb[83].mxu1 }
 0x98b   :  { %2346 = vrot.lane.b32.xlu1 %v2268_v40, %s4044_s29 }
 0x98d   :  { %2348 = vrot.lane.b32.xlu0 %v3636_v61, %s4044_s29 }
 0x98f   :  { %2350 = vrot.lane.b32.xlu1 %v3637_v44, %s4044_s29  ;;  %v3640_v13 = vpop.f32.mrb[84].mxu1  ;;  %v3762_v44 = vld [vmem:[#allocation16] sm:$0xff]  }
 0x990   :  { %v2281_v3 = vpop.f32.mrb[85].mxu1  ;;  %3650 = vmatprep.subr.bf16.mxu0 %v3762_v44 }
 0x991   :  { %2352 = vrot.lane.b32.xlu0 %v2281_v3, %s4044_s29  ;;  %v3641_v35 = vpop.f32.mrb[86].mxu1  ;;  %3651 = vmatpush3.bf16.msra.mxu0 %v3762_v44 }
 0x992   :  { %v2284_v43 = vpop.f32.mrb[87].mxu1 }
 0x993   :  { %2354 = vrot.lane.b32.xlu1 %v2284_v43, %s4044_s29  ;;  %v5723_v43 = vld [vmem:[#allocation52_spill] sm:$0xff] }
 0x995   :  { %2356 = vrot.lane.b32.xlu0 %v3640_v13, %s4044_s29 }
 0x997   :  { %2358 = vrot.lane.b32.xlu1 %v3641_v35, %s4044_s29  ;;  %v3644_v52 = vpop.f32.mrb[88].mxu1 }
 0x998   :  { %v2297_v54 = vpop.f32.mrb[89].mxu1 }
 0x999   :  { %2360 = vrot.lane.b32.xlu0 %v2297_v54, %s4044_s29  ;;  %v3645_v14 = vpop.f32.mrb[90].mxu1 }
 0x99a   :  { %v2300_v11 = vpop.f32.mrb[91].mxu1 }
 0x99b   :  { %2362 = vrot.lane.b32.xlu1 %v2300_v11, %s4044_s29 }
 0x99d   :  { %2364 = vrot.lane.b32.xlu0 %v3644_v52, %s4044_s29  ;;  %v3763_v52 = vld [vmem:[#allocation16 + $0x8] sm:$0xff]  }
 0x99e   :  { %3652 = vmatprep.subr.bf16.mxu0 %v3763_v52 }
 0x99f   :  { %2366 = vrot.lane.b32.xlu1 %v3645_v14, %s4044_s29  ;;  %v3648_v46 = vpop.f32.mrb[92].mxu1  ;;  %3653 = vmatpush3.bf16.msra.mxu0 %v3763_v52 }
 0x9a0   :  { %v2313_v55 = vpop.f32.mrb[93].mxu1 }
 0x9a1   :  { %2368 = vrot.lane.b32.xlu0 %v2313_v55, %s4044_s29  ;;  %v3649_v18 = vpop.f32.mrb[94].mxu1 }
 0x9a2   :  { %v2316_v42 = vpop.f32.mrb[95].mxu1 }
 0x9a3   :  { %2370 = vrot.lane.b32.xlu1 %v2316_v42, %s4044_s29  ;;  %v5725_v42 = vld [vmem:[#allocation49_spill] sm:$0xff] }
 0x9a5   :  { %2372 = vrot.lane.b32.xlu0 %v3648_v46, %s4044_s29 }
 0x9a7   :  { %2374 = vrot.lane.b32.xlu1 %v3649_v18, %s4044_s29  ;;  %v5724_v18 = vld [vmem:[#allocation51_spill] sm:$0xff] }
 0x9a9   :  { %1539 = vrot.lane.b32.xlu0 %v4901_v58, %s4044_s29  ;;  %v5719_v58 = vld [vmem:[#allocation48_spill] sm:$0xff] }
 0x9ab   :  { %1541 = vrot.lane.b32.xlu1 %v4905_v19, %s4044_s29  ;;  %v3761_v19 = vld [vmem:[#allocation19 + $0x8] sm:$0xff]  }
 0x9ac   :  { %3672 = vmatprep.subr.bf16.mxu1 %v3761_v19 }
 0x9ad   :  { %1543 = vrot.lane.b32.xlu0 %v4899_v53, %s4044_s29  ;;  %v5718_v53 = vld [vmem:[#allocation44_spill] sm:$0xff]  ;;  %3673 = vmatpush3.bf16.msra.mxu1 %v3761_v19 }
 0x9af   :  { %1545 = vrot.lane.b32.xlu1 %v4903_v45, %s4044_s29  ;;  %v5720_v45 = vld [vmem:[#allocation45_spill] sm:$0xff] }
 0x9b1   :  { %1547 = vrot.lane.b32.xlu0 %v4909_v28, %s4044_s29 }
 0x9b3   :  { %1549 = vrot.lane.b32.xlu1 %v4913_v4, %s4044_s29 }
 0x9b5   :  { %1553 = vrot.lane.b32.xlu0 %v4911_v31, %s4044_s29 }
 0x9b7   :  { %1551 = vrot.lane.b32.xlu1 %v4907_v8, %s4044_s29 }
 0x9b9   :  { %1555 = vrot.lane.b32.xlu0 %v5718_v53, %s4044_s29 }
 0x9bb   :  { %1557 = vrot.lane.b32.xlu1 %v5719_v58, %s4044_s29 }
 0x9bf   :  { %1559 = vrot.lane.b32.xlu1 %v5720_v45, %s4044_s29 }
 0x9fb   :  { %v2345_v28 = vpop.permute.xlu0 %2344 }
 0x9fc   :  { %v5089_v31 = vadd.f32 %v2345_v28, %v4972_v20  ;;  %v5726_v28 = vld [vmem:[#allocation54_spill] sm:$0xff] }
 0x9fd   :  { %v2347_v4 = vpop.permute.xlu1 %2346 }
 0x9fe   :  { %v5092_v8 = vadd.f32 %v2347_v4, %v4975_v9  ;;  %v2408_v6 = vmax.f32 %v5089_v31, 0.0 }
 0x9ff   :  { %v2349_v16 = vpop.permute.xlu0 %2348 }
 0xa00   :  { %v2409_v23 = vmax.f32 %v5092_v8, 0.0  ;;  %v5097_v24 = vadd.f32 %v2349_v16, %v4980_v49 }
 0xa01   :  { %v2351_v50 = vpop.permute.xlu1 %2350 }
 0xa02   :  { %v5100_v48 = vadd.f32 %v2351_v50, %v4983_v60  ;;  %v2625_v20 = vpack.c.bf16 %v2409_v23, %v2408_v6  ;;  %v2410_v9 = vmax.f32 %v5097_v24, 0.0  ;;  %v5727_v50 = vld [vmem:[#allocation55_spill] sm:$0xff] }
 0xa03   :  { %v2353_v51 = vpop.permute.xlu0 %2352 }
 0xa04   :  { %v5656_v33 = vmax.f32 %v5100_v48, 0.0  ;;  %v5109_v62 = vadd.f32 %v2353_v51, %v4989_v25  ;;  %2645 = vrot.lane.b32.xlu0 %v2625_v20, %s4044_s29  ;;  %v5721_v25 = vld [vmem:[#allocation47_spill] sm:$0xff] }
 0xa05   :  { %v2355_v49 = vpop.permute.xlu1 %2354 }
 0xa06   :  { %v5113_v0 = vadd.f32 %v2355_v49, %v4992_v47  ;;  %v2626_v60 = vpack.c.bf16 %v5656_v33, %v2410_v9  ;;  %v5657_v10 = vmax.f32 %v5109_v62, 0.0  ;;  %v5755_v33 = vld [vmem:[#allocation40_spill] sm:$0xff] }
 0xa07   :  { %v2357_v27 = vpop.permute.xlu0 %2356 }
 0xa08   :  { %v5654_v12 = vmax.f32 %v5113_v0, 0.0  ;;  %v5122_v29 = vadd.f32 %v2357_v27, %v4998_v1  ;;  %1561 = vrot.lane.b32.xlu0 %v5721_v25, %s4044_s29  ;;  %2647 = vrot.lane.b32.xlu1 %v2626_v60, %s4044_s29  ;;  %v5728_v27 = vld [vmem:[#allocation56_spill] sm:$0xff] }
 0xa09   :  { %v2359_v47 = vpop.permute.xlu1 %2358 }
 0xa0a   :  { %v5128_v30 = vadd.f32 %v2359_v47, %v5001_v39  ;;  %v2627_v32 = vpack.c.bf16 %v5654_v12, %v5657_v10  ;;  %v5655_v59 = vmax.f32 %v5122_v29, 0.0  ;;  %v5757_v10 = vld [vmem:[#allocation42_spill] sm:$0xff]  ;;  %v5760_v31 = vmax.f32 %v5122_v29, 0.0 }
 0xa0b   :  { %v2361_v36 = vpop.permute.xlu0 %2360 }
 0xa0c   :  { %v5652_v1 = vmax.f32 %v5128_v30, 0.0  ;;  %v5137_v21 = vadd.f32 %v2361_v36, %v5007_v57  ;;  %2649 = vrot.lane.b32.xlu0 %v2627_v32, %s4044_s29  ;;  %v5729_v36 = vld [vmem:[#allocation57_spill] sm:$0xff] }
 0xa0d   :  { %v2363_v5 = vpop.permute.xlu1 %2362 }
 0xa0e   :  { %v5141_v7 = vadd.f32 %v2363_v5, %v5010_v17  ;;  %v2628_v39 = vpack.c.bf16 %v5652_v1, %v5655_v59  ;;  %v5653_v63 = vmax.f32 %v5137_v21, 0.0  ;;  %v5762_v8 = vmax.f32 %v5137_v21, 0.0 }
 0xa0f   :  { %v2365_v56 = vpop.permute.xlu0 %2364 }
 0xa10   :  { %v5650_v61 = vmax.f32 %v5141_v7, 0.0  ;;  %1563 = vrot.lane.b32.xlu0 %v5722_v37, %s4044_s29  ;;  %2651 = vrot.lane.b32.xlu1 %v2628_v39, %s4044_s29  ;;  %v5160_v3 = vadd.f32 %v2365_v56, %v5016_v34 }
 0xa11   :  { %v2367_v57 = vpop.permute.xlu1 %2366 }
 0xa12   :  { %v5153_v17 = vadd.f32 %v2367_v57, %v5019_v15  ;;  %v2629_v40 = vpack.c.bf16 %v5650_v61, %v5653_v63  ;;  %v5651_v34 = vmax.f32 %v5160_v3, 0.0  ;;  %v5730_v57 = vld [vmem:[#allocation58_spill] sm:$0xff]  ;;  %v5764_v24 = vmax.f32 %v5160_v3, 0.0 }
 0xa13   :  { %v2369_v13 = vpop.permute.xlu0 %2368 }
 0xa14   :  { %v5163_v35 = vadd.f32 %v2369_v13, %v5025_v22  ;;  %2653 = vrot.lane.b32.xlu0 %v2629_v40, %s4044_s29  ;;  %1565 = vrot.lane.b32.xlu1 %v5723_v43, %s4044_s29  ;;  %v5648_v54 = vmax.f32 %v5153_v17, 0.0  ;;  %v5731_v43 = vld [vmem:[#allocation59_spill] sm:$0xff] }
 0xa15   :  { %v2371_v15 = vpop.permute.xlu1 %2370 }
 0xa16   :  { %v5170_v14 = vadd.f32 %v2371_v15, %v5028_v26  ;;  %v5649_v22 = vmax.f32 %v5163_v35, 0.0  ;;  %v2630_v53 = vpack.c.bf16 %v5648_v54, %v5651_v34 }
 0xa17   :  { %v2373_v11 = vpop.permute.xlu0 %2372 }
 0xa18   :  { %v5647_v46 = vmax.f32 %v5170_v14, 0.0  ;;  %v5176_v55 = vadd.f32 %v2373_v11, %v5034_v38  ;;  %1569 = vrot.lane.b32.xlu0 %v5724_v18, %s4044_s29  ;;  %1567 = vrot.lane.b32.xlu1 %v5725_v42, %s4044_s29  ;;  %v5732_v42 = vld [vmem:[#allocation61_spill] sm:$0xff] }
 0xa19   :  { %v2375_v41 = vpop.permute.xlu1 %2374 }
 0xa1a   :  { %v5183_v26 = vadd.f32 %v2375_v41, %v5037_v2  ;;  %v2631_v38 = vpack.c.bf16 %v5647_v46, %v5649_v22  ;;  %v5646_v45 = vmax.f32 %v5176_v55, 0.0 }
 0xa1b   :  { %v1540_v58 = vpop.permute.xlu0 %1539 }
 0xa1c   :  { %v5645_v19 = vmax.f32 %v5183_v26, 0.0  ;;  %v5196_v4 = vadd.f32 %v1540_v58, %v5726_v28  ;;  %2655 = vrot.lane.b32.xlu1 %v2630_v53, %s4044_s29  ;;  %2657 = vrot.lane.b32.xlu0 %v2631_v38, %s4044_s29  ;;  %v5733_v58 = vld [vmem:[#allocation60_spill] sm:$0xff] }
 0xa1d   :  { %v1542_v2 = vpop.permute.xlu1 %1541 }
 0xa1e   :  { %v2632_v16 = vpack.c.bf16 %v5645_v19, %v5646_v45  ;;  %v5205_v20 = vadd.f32 %v1542_v2, %v5727_v50  ;;  %v1603_v49 = vmax.f32 %v5196_v4, 0.0  ;;  %v5739_v19 = vld [vmem:[#allocation67_spill] sm:$0xff] }
 0xa1f   :  { %v1544_v51 = vpop.permute.xlu0 %1543 }
 0xa20   :  { %v1604_v60 = vmax.f32 %v5205_v20, 0.0  ;;  %v5210_v25 = vadd.f32 %v1544_v51, %v5728_v27  ;;  %2659 = vrot.lane.b32.xlu1 %v2632_v16, %s4044_s29  ;;  %v5734_v51 = vld [vmem:[#allocation62_spill] sm:$0xff] }
 0xa21   :  { %v1546_v47 = vpop.permute.xlu1 %1545 }
 0xa22   :  { %v2424_v32 = vpack.c.bf16 %v1604_v60, %v1603_v49  ;;  %v5218_v5 = vadd.f32 %v1546_v47, %v5729_v36  ;;  %v1605_v56 = vmax.f32 %v5210_v25, 0.0  ;;  %v5735_v36 = vld [vmem:[#allocation63_spill] sm:$0xff] }
 0xa23   :  { %v1548_v39 = vpop.permute.xlu0 %1547 }
 0xa24   :  { %v1606_v37 = vmax.f32 %v5218_v5, 0.0  ;;  %v5223_v44 = vadd.f32 %v1548_v39, %v5730_v57  ;;  %2444 = vrot.lane.b32.xlu0 %v2424_v32, %s4044_s29 }
 0xa25   :  { %v1550_v40 = vpop.permute.xlu1 %1549 }
 0xa26   :  { %v2425_v13 = vpack.c.bf16 %v1606_v37, %v1605_v56  ;;  %v5231_v15 = vadd.f32 %v1550_v40, %v5731_v43  ;;  %v1607_v11 = vmax.f32 %v5223_v44, 0.0 }
 0xa27   :  { %v1554_v52 = vpop.permute.xlu0 %1553 }
 0xa28   :  { %v1608_v18 = vmax.f32 %v5231_v15, 0.0  ;;  %v5236_v41 = vadd.f32 %v1554_v52, %v5732_v42  ;;  %2446 = vrot.lane.b32.xlu1 %v2425_v13, %s4044_s29  ;;  %v5736_v42 = vld [vmem:[#allocation64_spill] sm:$0xff] }
 0xa29   :  { %v1552_v53 = vpop.permute.xlu1 %1551 }
 0xa2a   :  { %v2426_v38 = vpack.c.bf16 %v1608_v18, %v1607_v11  ;;  %v5244_v28 = vadd.f32 %v1552_v53, %v5733_v58  ;;  %v1610_v16 = vmax.f32 %v5236_v41, 0.0 }
 0xa2b   :  { %v1556_v2 = vpop.permute.xlu0 %1555 }
 0xa2c   :  { %v1609_v50 = vmax.f32 %v5244_v28, 0.0  ;;  %v5249_v27 = vadd.f32 %v1556_v2, %v5734_v51  ;;  %2448 = vrot.lane.b32.xlu0 %v2426_v38, %s4044_s29  ;;  %v5737_v2 = vld [vmem:[#allocation65_spill] sm:$0xff] }
 0xa2d   :  { %v1558_v47 = vpop.permute.xlu1 %1557 }
 0xa2e   :  { %v2427_v32 = vpack.c.bf16 %v1610_v16, %v1609_v50  ;;  %v5257_v39 = vadd.f32 %v1558_v47, %v5735_v36  ;;  %v1611_v57 = vmax.f32 %v5249_v27, 0.0 }
 0xa30   :  { %v1612_v40 = vmax.f32 %v5257_v39, 0.0  ;;  %2450 = vrot.lane.b32.xlu1 %v2427_v32, %s4044_s29 }
 0xa31   :  { %v1560_v43 = vpop.permute.xlu1 %1559 }
 0xa32   :  { %v2428_v13 = vpack.c.bf16 %v1612_v40, %v1611_v57  ;;  %v5269_v53 = vadd.f32 %v1560_v43, %v5736_v42  ;;  %v5738_v42 = vld [vmem:[#allocation66_spill] sm:$0xff] }
 0xa34   :  { %2452 = vrot.lane.b32.xlu0 %v2428_v13, %s4044_s29  ;;  %v1613_v47 = vmax.f32 %v5269_v53, 0.0 }
 0xa76   :  { %v2646_v52 = vpop.permute.xlu0 %2645 }
 0xa77   :  { %3674 = vmatprep.mubr.msk.bf16.mxu1 %vm805_vm4, %v2646_v52 }
 0xa7a   :  { %v1562_v38 = vpop.permute.xlu0 %1561  ;;  %v2648_v58 = vpop.permute.xlu1 %2647 }
 0xa7b   :  { %v5272_v51 = vadd.f32 %v1562_v38, %v5737_v2  ;;  %3675 = vmatmul.mubr.msk.bf16.vlgmr.msra.gmra.mrb[96].mxu1 %vm805_vm4, %v2648_v58 }
 0xa7d   :  { %v1614_v32 = vmax.f32 %v5272_v51, 0.0 }
 0xa7e   :  { %v2650_v36 = vpop.permute.xlu0 %2649 }
 0xa7f   :  { %v2429_v13 = vpack.c.bf16 %v1614_v32, %v1613_v47  ;;  %3678 = vmatprep.mubr.msk.bf16.mxu1 %vm805_vm4, %v2650_v36  ;;  %v5740_v36 = vld [vmem:[#allocation69_spill] sm:$0xff] }
 0xa81   :  { %2454 = vrot.lane.b32.xlu1 %v2429_v13, %s4044_s29  ;;  %v5741_v13 = vld [vmem:[#allocation68_spill] sm:$0xff] }
 0xa82   :  { %v1564_v43 = vpop.permute.xlu0 %1563  ;;  %v2652_v52 = vpop.permute.xlu1 %2651 }
 0xa83   :  { %3679 = vmatmul.mubr.msk.bf16.gmra.mrb[100].mxu1 %vm805_vm4, %v2652_v52  ;;  %v1599_v38 = vadd.f32 %v1564_v43, %v5738_v42 }
 0xa85   :  { %v1615_v46 = vmax.f32 %v1599_v38, 0.0 }
 0xa86   :  { %v2654_v58 = vpop.permute.xlu0 %2653  ;;  %v1566_v2 = vpop.permute.xlu1 %1565 }
 0xa87   :  { %v1600_v45 = vadd.f32 %v1566_v2, %v5739_v19  ;;  %3682 = vmatprep.mubr.msk.bf16.mxu1 %vm805_vm4, %v2654_v58  ;;  %v5746_v19 = vld [vmem:[#allocation30_spill] sm:$0xff]  ;;  %v5747_v58 = vld [vmem:[#allocation32_spill] sm:$0xff]  ;;  %v5748_v2 = vld [vmem:[#allocation35_spill] sm:$0xff] }
 0xa89   :  { %v1616_v54 = vmax.f32 %v1600_v45, 0.0  ;;  %v5742_v45 = vld [vmem:[#allocation29_spill] sm:$0xff] }
 0xa8a   :  { %v1570_v22 = vpop.permute.xlu0 %1569  ;;  %v1568_v61 = vpop.permute.xlu1 %1567 }
 0xa8b   :  { %v2430_v34 = vpack.c.bf16 %v1616_v54, %v1615_v46  ;;  %v1602_v1 = vadd.f32 %v1570_v22, %v5740_v36  ;;  %v1601_v63 = vadd.f32 %v1568_v61, %v5741_v13  ;;  %v5743_v22 = vld [vmem:[#allocation28_spill] sm:$0xff]  ;;  %v5749_v13 = vld [vmem:[#allocation37_spill] sm:$0xff] }
 0xa8d   :  { %v1618_v12 = vmax.f32 %v1602_v1, 0.0  ;;  %v1617_v59 = vmax.f32 %v1601_v63, 0.0  ;;  %2456 = vrot.lane.b32.xlu0 %v2430_v34, %s4044_s29  ;;  %v5744_v1 = vld [vmem:[#allocation31_spill] sm:$0xff]  ;;  %v5745_v34 = vld [vmem:[#allocation33_spill] sm:$0xff] }
 0xa8e   :  { %v2658_v43 = vpop.permute.xlu0 %2657  ;;  %v2656_v52 = vpop.permute.xlu1 %2655 }
 0xa8f   :  { %v2431_v42 = vpack.c.bf16 %v1618_v12, %v1617_v59  ;;  %3683 = vmatmul.mubr.msk.bf16.gmra.mrb[104].mxu1 %vm805_vm4, %v2656_v52 }
 0xa90   :  { %3686 = vmatprep.mubr.msk.bf16.mxu1 %vm805_vm4, %v2658_v43  ;;  %v5750_v43 = vld [vmem:[#allocation34_spill] sm:$0xff] }
 0xa91   :  { %2689 = vrot.lane.b32.xlu0 %v5742_v45, %s4061_s18  ;;  %2458 = vrot.lane.b32.xlu1 %v2431_v42, %s4044_s29  ;;  %v5751_v42 = vld [vmem:[#allocation36_spill] sm:$0xff]  ;;  %s4062_s29 = smov 71  }
 0xa92   :  { %v2660_v63 = vpop.permute.xlu1 %2659 }
 0xa95   :  { %2693 = vrot.lane.b32.xlu0 %v5743_v22, %s4061_s18  ;;  %2691 = vrot.lane.b32.xlu1 %v5744_v1, %s4061_s18 }
 0xa96   :  { %v2445_v61 = vpop.permute.xlu0 %2444 }
 0xa97   :  { %3654 = vmatprep.mubr.msk.bf16.mxu0 %vm805_vm4, %v2445_v61  ;;  %3687 = vmatmul.mubr.msk.bf16.gmra.mrb[108].mxu1 %vm805_vm4, %v2660_v63  ;;  %v5752_v63 = vld [vmem:[#allocation39_spill] sm:$0xff] }
 0xa99   :  { %2697 = vrot.lane.b32.xlu0 %v5745_v34, %s4061_s18  ;;  %2695 = vrot.lane.b32.xlu1 %v5746_v19, %s4061_s18 }
 0xa9a   :  { %v2447_v38 = vpop.permute.xlu1 %2446 }
 0xa9b   :  { %3655 = vmatmul.mubr.msk.bf16.vlgmr.msra.gmra.mrb[96].mxu0 %vm805_vm4, %v2447_v38  ;;  %v5753_v38 = vld [vmem:[#allocation41_spill] sm:$0xff] }
 0xa9d   :  { %2701 = vrot.lane.b32.xlu0 %v5747_v58, %s4061_s18  ;;  %2699 = vrot.lane.b32.xlu1 %v5748_v2, %s4061_s18 }
 0xa9e   :  { %v2449_v36 = vpop.permute.xlu0 %2448 }
 0xa9f   :  { %3658 = vmatprep.mubr.msk.bf16.mxu0 %vm805_vm4, %v2449_v36  ;;  %v5754_v36 = vld [vmem:[#allocation38_spill] sm:$0xff] }
 0xaa1   :  { %2705 = vrot.lane.b32.xlu0 %v5749_v13, %s4061_s18  ;;  %2703 = vrot.lane.b32.xlu1 %v5750_v43, %s4061_s18 }
 0xaa2   :  { %v2451_v52 = vpop.permute.xlu1 %2450 }
 0xaa3   :  { %3659 = vmatmul.mubr.msk.bf16.gmra.mrb[100].mxu0 %vm805_vm4, %v2451_v52  ;;  %v5756_v52 = vld [vmem:[#allocation43_spill] sm:$0xff] }
 0xaa5   :  { %2709 = vrot.lane.b32.xlu0 %v5751_v42, %s4061_s18  ;;  %2707 = vrot.lane.b32.xlu1 %v5752_v63, %s4061_s18 }
 0xaa6   :  { %v2453_v61 = vpop.permute.xlu0 %2452 }
 0xaa7   :  { %3662 = vmatprep.mubr.msk.bf16.mxu0 %vm805_vm4, %v2453_v61 }
 0xaa9   :  { %2713 = vrot.lane.b32.xlu0 %v5753_v38, %s4061_s18  ;;  %2711 = vrot.lane.b32.xlu1 %v5754_v36, %s4061_s18 }
 0xaad   :  { %2717 = vrot.lane.b32.xlu0 %v5755_v33, %s4061_s18  ;;  %2715 = vrot.lane.b32.xlu1 %v5756_v52, %s4061_s18 }
 0xab1   :  { %2938 = vrot.lane.b32.xlu0 %v1603_v49, %s4062_s29  ;;  %2719 = vrot.lane.b32.xlu1 %v5757_v10, %s4061_s18 }
 0xab5   :  { %2942 = vrot.lane.b32.xlu0 %v1605_v56, %s4062_s29  ;;  %2940 = vrot.lane.b32.xlu1 %v1604_v60, %s4062_s29 }
 0xab9   :  { %2946 = vrot.lane.b32.xlu0 %v1607_v11, %s4062_s29  ;;  %2944 = vrot.lane.b32.xlu1 %v1606_v37, %s4062_s29 }
 0xabd   :  { %2950 = vrot.lane.b32.xlu0 %v1609_v50, %s4062_s29  ;;  %2948 = vrot.lane.b32.xlu1 %v1608_v18, %s4062_s29 }
 0xac1   :  { %2954 = vrot.lane.b32.xlu0 %v1611_v57, %s4062_s29  ;;  %2952 = vrot.lane.b32.xlu1 %v1610_v16, %s4062_s29 }
 0xac5   :  { %2958 = vrot.lane.b32.xlu0 %v1613_v47, %s4062_s29  ;;  %2956 = vrot.lane.b32.xlu1 %v1612_v40, %s4062_s29 }
 0xac9   :  { %2962 = vrot.lane.b32.xlu0 %v1615_v46, %s4062_s29  ;;  %2960 = vrot.lane.b32.xlu1 %v1614_v32, %s4062_s29  ;;  %v5758_v46 = vmax.f32 %v5109_v62, 0.0  ;;  %v5767_v62 = vmax.f32 %v5153_v17, 0.0 }
 0xacd   :  { %2966 = vrot.lane.b32.xlu0 %v1617_v59, %s4062_s29  ;;  %2964 = vrot.lane.b32.xlu1 %v1616_v54, %s4062_s29  ;;  %v5759_v59 = vmax.f32 %v5100_v48, 0.0  ;;  %v5765_v48 = vmax.f32 %v5141_v7, 0.0 }
 0xad1   :  { %3002 = vrot.lane.b32.xlu0 %v2408_v6, %s4063_s4  ;;  %2968 = vrot.lane.b32.xlu1 %v1618_v12, %s4062_s29  ;;  %v5761_v6 = vmax.f32 %v5113_v0, 0.0  ;;  %v5768_v0 = vmax.f32 %v5170_v14, 0.0 }
 0xad5   :  { %3006 = vrot.lane.b32.xlu0 %v2410_v9, %s4063_s4  ;;  %3004 = vrot.lane.b32.xlu1 %v2409_v23, %s4063_s4  ;;  %v5763_v23 = vmax.f32 %v5128_v30, 0.0  ;;  %v5766_v9 = vmax.f32 %v5163_v35, 0.0 }
 0xad9   :  { %3010 = vrot.lane.b32.xlu0 %v5758_v46, %s4063_s4  ;;  %3008 = vrot.lane.b32.xlu1 %v5759_v59, %s4063_s4 }
 0xadd   :  { %3014 = vrot.lane.b32.xlu0 %v5760_v31, %s4063_s4  ;;  %3012 = vrot.lane.b32.xlu1 %v5761_v6, %s4063_s4 }
 0xae1   :  { %3018 = vrot.lane.b32.xlu0 %v5762_v8, %s4063_s4  ;;  %3016 = vrot.lane.b32.xlu1 %v5763_v23, %s4063_s4 }
 0xae5   :  { %3022 = vrot.lane.b32.xlu0 %v5764_v24, %s4063_s4  ;;  %3020 = vrot.lane.b32.xlu1 %v5765_v48, %s4063_s4 }
 0xae9   :  { %3026 = vrot.lane.b32.xlu0 %v5766_v9, %s4063_s4  ;;  %3024 = vrot.lane.b32.xlu1 %v5767_v62, %s4063_s4 }
 0xaed   :  { %3028 = vrot.lane.b32.xlu1 %v5768_v0, %s4063_s4 }
 0xaf3   :  { %v2455_v12 = vpop.permute.xlu1 %2454 }
 0xaf4   :  { %3663 = vmatmul.mubr.msk.bf16.gmra.mrb[104].mxu0 %vm805_vm4, %v2455_v12 }
 0xaff   :  { %v2457_v29 = vpop.permute.xlu0 %2456 }
 0xb00   :  { %3666 = vmatprep.mubr.msk.bf16.mxu0 %vm805_vm4, %v2457_v29 }
 0xb03   :  { %v2459_v30 = vpop.permute.xlu1 %2458  ;;  %v2690_v21 = vpop.permute.xlu0 %2689 }
 0xb04   :  { %3667 = vmatmul.mubr.msk.bf16.gmra.mrb[108].mxu0 %vm805_vm4, %v2459_v30 }
 0xb07   :  { %v2692_v7 = vpop.permute.xlu1 %2691  ;;  %v2694_v3 = vpop.permute.xlu0 %2693 }
 0xb0b   :  { %v2696_v35 = vpop.permute.xlu1 %2695  ;;  %v2698_v54 = vpop.permute.xlu0 %2697 }
 0xb0f   :  { %v2700_v17 = vpop.permute.xlu1 %2699  ;;  %v2702_v4 = vpop.permute.xlu0 %2701 }
 0xb13   :  { %v2704_v49 = vpop.permute.xlu1 %2703  ;;  %v2706_v37 = vpop.permute.xlu0 %2705 }
 0xb17   :  { %v2708_v15 = vpop.permute.xlu1 %2707  ;;  %v2710_v50 = vpop.permute.xlu0 %2709 }
 0xb1b   :  { %v2712_v57 = vpop.permute.xlu1 %2711  ;;  %v2714_v51 = vpop.permute.xlu0 %2713 }
 0xb1f   :  { %v2716_v47 = vpop.permute.xlu1 %2715  ;;  %v2718_v31 = vpop.permute.xlu0 %2717 }
 0xb23   :  { %v2720_v23 = vpop.permute.xlu1 %2719  ;;  %v5411_v62 = vpop.permute.xlu0 %2938 }
 0xb27   :  { %v5414_v30 = vpop.permute.xlu1 %2940 }
 0xb4e   :  { %v3676_v20 = vpop.f32.mrb[96].mxu1 }
 0xb4f   :  { %v2804_v14 = vadd.f32 %v3676_v20, %v2694_v3  ;;  %v2795_v60 = vpop.f32.mrb[97].mxu1 }
 0xb50   :  { %v3677_v25 = vpop.f32.mrb[98].mxu1  ;;  %v2796_v44 = vadd.f32 %v2795_v60, %v2690_v21  ;;  %v5769_v60 = vmax.f32 %v5176_v55, 0.0 }
 0xb51   :  { %v2807_v5 = vadd.f32 %v3677_v25, %v2696_v35  ;;  %v2798_v56 = vpop.f32.mrb[99].mxu1  ;;  %2878 = vrot.lane.b32.xlu0 %v2804_v14, %s4064_s24  ;;  %v2945_v14 = vpop.permute.xlu1 %2944 }
 0xb52   :  { %v2799_v11 = vadd.f32 %v2798_v56, %v2692_v7 }
 0xb53   :  { %2880 = vrot.lane.b32.xlu1 %v2807_v5, %s4064_s24 }
 0xb55   :  { %2874 = vrot.lane.b32.xlu0 %v2796_v44, %s4064_s24 }
 0xb56   :  { %v3680_v18 = vpop.f32.mrb[100].mxu1 }
 0xb57   :  { %v2820_v41 = vadd.f32 %v3680_v18, %v2702_v4  ;;  %v2811_v28 = vpop.f32.mrb[101].mxu1  ;;  %2876 = vrot.lane.b32.xlu1 %v2799_v11, %s4064_s24  ;;  %v2943_v4 = vpop.permute.xlu0 %2942 }
 0xb58   :  { %v3681_v16 = vpop.f32.mrb[102].mxu1  ;;  %v2812_v40 = vadd.f32 %v2811_v28, %v2698_v54 }
 0xb59   :  { %v2823_v27 = vadd.f32 %v3681_v16, %v2704_v49  ;;  %v2814_v39 = vpop.f32.mrb[103].mxu1  ;;  %2886 = vrot.lane.b32.xlu0 %v2820_v41, %s4064_s24 }
 0xb5a   :  { %v2815_v53 = vadd.f32 %v2814_v39, %v2700_v17 }
 0xb5b   :  { %2888 = vrot.lane.b32.xlu1 %v2823_v27, %s4064_s24  ;;  %v5423_v5 = vpop.permute.xlu0 %2946 }
 0xb5d   :  { %2882 = vrot.lane.b32.xlu0 %v2812_v40, %s4064_s24 }
 0xb5f   :  { %2884 = vrot.lane.b32.xlu1 %v2815_v53, %s4064_s24  ;;  %v5430_v18 = vpop.permute.xlu0 %2950 }
 0xb62   :  { %v3684_v32 = vpop.f32.mrb[104].mxu1 }
 0xb63   :  { %v2836_v61 = vadd.f32 %v3684_v32, %v2710_v50  ;;  %v2827_v46 = vpop.f32.mrb[105].mxu1  ;;  %v5434_v28 = vpop.permute.xlu0 %2954 }
 0xb64   :  { %v3685_v59 = vpop.f32.mrb[106].mxu1  ;;  %v2828_v24 = vadd.f32 %v2827_v46, %v2706_v37  ;;  %v5770_v37 = vmax.f32 %v5183_v26, 0.0 }
 0xb65   :  { %v2839_v6 = vadd.f32 %v3685_v59, %v2712_v57  ;;  %2894 = vrot.lane.b32.xlu0 %v2836_v61, %s4064_s24  ;;  %v2830_v8 = vpop.f32.mrb[107].mxu1 }
 0xb66   :  { %v2831_v48 = vadd.f32 %v2830_v8, %v2708_v15  ;;  %v5428_v15 = vpop.permute.xlu1 %2948 }
 0xb67   :  { %2896 = vrot.lane.b32.xlu1 %v2839_v6, %s4064_s24  ;;  %v5438_v16 = vpop.permute.xlu0 %2958 }
 0xb69   :  { %2890 = vrot.lane.b32.xlu0 %v2828_v24, %s4064_s24 }
 0xb6a   :  { %v3688_v9 = vpop.f32.mrb[108].mxu1  ;;  %v5432_v41 = vpop.permute.xlu1 %2952 }
 0xb6b   :  { %v2852_v0 = vadd.f32 %v3688_v9, %v2718_v31  ;;  %v2843_v12 = vpop.f32.mrb[109].mxu1  ;;  %2892 = vrot.lane.b32.xlu1 %v2831_v48, %s4064_s24  ;;  %v5442_v27 = vpop.permute.xlu0 %2962 }
 0xb6c   :  { %v3689_v29 = vpop.f32.mrb[110].mxu1  ;;  %v2844_v35 = vadd.f32 %v2843_v12, %v2714_v51 }
 0xb6d   :  { %v2855_v21 = vadd.f32 %v3689_v29, %v2720_v23  ;;  %2902 = vrot.lane.b32.xlu0 %v2852_v0, %s4064_s24  ;;  %v2846_v7 = vpop.f32.mrb[111].mxu1 }
 0xb6e   :  { %v3656_v3 = vpop.f32.mrb[96].mxu0  ;;  %v2847_v20 = vadd.f32 %v2846_v7, %v2716_v47  ;;  %v5436_v55 = vpop.permute.xlu1 %2956 }
 0xb6f   :  { %v2530_v54 = vpop.f32.mrb[97].mxu0  ;;  %2904 = vrot.lane.b32.xlu1 %v2855_v21, %s4064_s24  ;;  %v5446_v39 = vpop.permute.xlu0 %2966  ;;  %v2539_v24 = vadd.f32 %v3656_v3, %v5743_v22 }
 0xb70   :  { %v3657_v17 = vpop.f32.mrb[98].mxu0  ;;  %v2531_v0 = vadd.f32 %v2530_v54, %v5742_v45 }
 0xb71   :  { %2898 = vrot.lane.b32.xlu0 %v2844_v35, %s4064_s24  ;;  %v2533_v49 = vpop.f32.mrb[99].mxu0  ;;  %v2542_v48 = vadd.f32 %v3657_v17, %v5746_v19  ;;  %vm2595_vm5 = vcmp.ne.f32.partialorder %v2539_v24, %v2539_v24 }
 0xb72   :  { %v5440_v50 = vpop.permute.xlu1 %2960  ;;  %v2534_v29 = vadd.f32 %v2533_v49, %v5744_v1  ;;  %v2611_v21 = vsel %vm2595_vm5, 0.0, %v2539_v24  ;;  %vm2593_vm9 = vcmp.ne.f32.partialorder %v2531_v0, %v2531_v0 }
 0xb73   :  { %2900 = vrot.lane.b32.xlu1 %v2847_v20, %s4064_s24  ;;  %v3003_v40 = vpop.permute.xlu0 %3002  ;;  %vm2596_vm7 = vcmp.ne.f32.partialorder %v2542_v48, %v2542_v48  ;;  %v2609_v20 = vsel %vm2593_vm9, 0.0, %v2531_v0 }
 0xb74   :  { %v2612_v19 = vsel %vm2596_vm7, 0.0, %v2542_v48  ;;  %vm2594_vm11 = vcmp.ne.f32.partialorder %v2534_v29, %v2534_v29 }
 0xb75   :  { %3030 = vrot.lane.b32.xlu0 %v5769_v60, %s4063_s4 }
 0xb76   :  { %v3660_v25 = vpop.f32.mrb[100].mxu0  ;;  %v5444_v26 = vpop.permute.xlu1 %2964 }
 0xb77   :  { %v2546_v56 = vpop.f32.mrb[101].mxu0  ;;  %3032 = vrot.lane.b32.xlu1 %v5770_v37, %s4063_s4  ;;  %v3007_v51 = vpop.permute.xlu0 %3006  ;;  %v2555_v35 = vadd.f32 %v3660_v25, %v5747_v58 }
 0xb78   :  { %v3661_v44 = vpop.f32.mrb[102].mxu0  ;;  %v2547_v25 = vadd.f32 %v2546_v56, %v5745_v34 }
 0xb79   :  { %v2549_v11 = vpop.f32.mrb[103].mxu0  ;;  %v2558_v45 = vadd.f32 %v3661_v44, %v5750_v43  ;;  %vm2599_vm12 = vcmp.ne.f32.partialorder %v2555_v35, %v2555_v35  ;;  %v2610_v43 = vsel %vm2594_vm11, 0.0, %v2534_v29 }
 0xb7a   :  { %v5448_v57 = vpop.permute.xlu1 %2968  ;;  %vm2597_vm14 = vcmp.ne.f32.partialorder %v2547_v25, %v2547_v25 }
 0xb7b   :  { %v5450_v32 = vpop.permute.xlu0 %3010  ;;  %vm2600_vm13 = vcmp.ne.f32.partialorder %v2558_v45, %v2558_v45 }
 0xb7e   :  { %v3005_v53 = vpop.permute.xlu1 %3004 }
 0xb7f   :  { %v3015_v46 = vpop.permute.xlu0 %3014 }
 0xb82   :  { %v3009_v47 = vpop.permute.xlu1 %3008 }
 0xb83   :  { %v5456_v31 = vpop.permute.xlu0 %3018 }
 0xb86   :  { %v5452_v61 = vpop.permute.xlu1 %3012 }
 0xb87   :  { %v5460_v8 = vpop.permute.xlu0 %3022 }
 0xb8a   :  { %v5454_v59 = vpop.permute.xlu1 %3016 }
 0xb8b   :  { %v5466_v9 = vpop.permute.xlu0 %3026 }
 0xb8e   :  { %v5458_v6 = vpop.permute.xlu1 %3020 }
 0xb92   :  { %v5462_v23 = vpop.permute.xlu1 %3024 }
 0xb96   :  { %v5469_v12 = vpop.permute.xlu1 %3028 }
 0xbc3   :  { %v2879_v7 = vpop.permute.xlu0 %2878 }
 0xbc4   :  { %v3053_v22 = vsel %vm3050_vm6, %v2611_v21, %v2879_v7 }
 0xbc5   :  { %v3070_v3 = vsel %vm3067_vm8, %v3053_v22, %v2943_v4  ;;  %v2881_v17 = vpop.permute.xlu1 %2880  ;;  %v2616_v22 = vsel %vm2600_vm13, 0.0, %v2558_v45 }
 0xbc6   :  { %v3086_v54 = vsel %vm533_vm3, %v3070_v3, %v3007_v51  ;;  %v3054_v1 = vsel %vm3050_vm6, %v2612_v19, %v2881_v17  ;;  %v2613_v19 = vsel %vm2597_vm14, 0.0, %v2547_v25 }
 0xbc7   :  { %3103 = vst.msk [vmem:[#allocation20 + $0x10] sm:$0xff] %vm3100_vm10, %v3086_v54  ;;  %v3071_v49 = vsel %vm3067_vm8, %v3054_v1, %v2945_v14  ;;  %v2875_v58 = vpop.permute.xlu0 %2874  ;;  %v3664_v60 = vpop.f32.mrb[104].mxu0  ;;  %v2550_v14 = vadd.f32 %v2549_v11, %v5748_v2 }
 0xbc8   :  { %v3087_v4 = vsel %vm533_vm3, %v3071_v49, %v3009_v47  ;;  %v3051_v37 = vsel %vm3050_vm6, %v2609_v20, %v2875_v58  ;;  %v2562_v24 = vpop.f32.mrb[105].mxu0  ;;  %v2615_v47 = vsel %vm2599_vm12, 0.0, %v2555_v35  ;;  %v2571_v3 = vadd.f32 %v3664_v60, %v5751_v42 }
 0xbc9   :  { %3104 = vst.msk [vmem:[#allocation20 + $0x18] sm:$0xff] %vm3100_vm10, %v3087_v4  ;;  %v3068_v44 = vsel %vm3067_vm8, %v3051_v37, %v5411_v62  ;;  %v3665_v51 = vpop.f32.mrb[106].mxu0  ;;  %v2877_v48 = vpop.permute.xlu1 %2876  ;;  %vm2598_vm15 = vcmp.ne.f32.partialorder %v2550_v14, %v2550_v14 }
 0xbca   :  { %v3084_v0 = vsel %vm533_vm3, %v3068_v44, %v3003_v40  ;;  %v3052_v34 = vsel %vm3050_vm6, %v2610_v43, %v2877_v48  ;;  %v2565_v56 = vpop.f32.mrb[107].mxu0  ;;  %v2614_v45 = vsel %vm2598_vm15, 0.0, %v2550_v14  ;;  %v2574_v1 = vadd.f32 %v3665_v51, %v5754_v36 }
 0xbcb   :  { %3101 = vst.msk [vmem:[#allocation20] sm:$0xff] %vm3100_vm10, %v3084_v0  ;;  %v3069_v29 = vsel %vm3067_vm8, %v3052_v34, %v5414_v30  ;;  %v2887_v21 = vpop.permute.xlu0 %2886  ;;  %vm2603_vm0 = vcmp.ne.f32.partialorder %v2571_v3, %v2571_v3  ;;  %v2566_v36 = vadd.f32 %v2565_v56, %v5752_v63 }
 0xbcc   :  { %v3085_v62 = vsel %vm533_vm3, %v3069_v29, %v3005_v53  ;;  %v3057_v7 = vsel %vm3050_vm6, %v2615_v47, %v2887_v21  ;;  %vm2604_vm1 = vcmp.ne.f32.partialorder %v2574_v1, %v2574_v1 }
 0xbcd   :  { %3102 = vst.msk [vmem:[#allocation20 + $0x8] sm:$0xff] %vm3100_vm10, %v3085_v62  ;;  %v3074_v2 = vsel %vm3067_vm8, %v3057_v7, %v5430_v18  ;;  %v2889_v11 = vpop.permute.xlu1 %2888  ;;  %v2620_v4 = vsel %vm2604_vm1, 0.0, %v2574_v1  ;;  %vm2602_vm4 = vcmp.ne.f32.partialorder %v2566_v36, %v2566_v36 }
 0xbce   :  { %v3090_v40 = vsel %vm533_vm3, %v3074_v2, %v3015_v46  ;;  %v3058_v35 = vsel %vm3050_vm6, %v2616_v22, %v2889_v11  ;;  %v2618_v0 = vsel %vm2602_vm4, 0.0, %v2566_v36 }
 0xbcf   :  { %3107 = vst.msk [vmem:[#allocation20 + $0x30] sm:$0xff] %vm3100_vm10, %v3090_v40  ;;  %v3075_v30 = vsel %vm3067_vm8, %v3058_v35, %v5432_v41  ;;  %v2883_v53 = vpop.permute.xlu0 %2882 }
 0xbd0   :  { %v3091_v17 = vsel %vm533_vm3, %v3075_v30, %v5454_v59  ;;  %v3055_v18 = vsel %vm3050_vm6, %v2613_v19, %v2883_v53  ;;  %v2563_v59 = vadd.f32 %v2562_v24, %v5749_v13 }
 0xbd1   :  { %3108 = vst.msk [vmem:[#allocation20 + $0x38] sm:$0xff] %vm3100_vm10, %v3091_v17  ;;  %v3072_v46 = vsel %vm3067_vm8, %v3055_v18, %v5423_v5  ;;  %v2885_v54 = vpop.permute.xlu1 %2884  ;;  %v2619_v5 = vsel %vm2603_vm0, 0.0, %v2571_v3 }
 0xbd2   :  { %v3088_v41 = vsel %vm533_vm3, %v3072_v46, %v5450_v32  ;;  %v3056_v20 = vsel %vm3050_vm6, %v2614_v45, %v2885_v54  ;;  %vm2601_vm2 = vcmp.ne.f32.partialorder %v2563_v59, %v2563_v59 }
 0xbd3   :  { %3105 = vst.msk [vmem:[#allocation20 + $0x20] sm:$0xff] %vm3100_vm10, %v3088_v41  ;;  %v3073_v42 = vsel %vm3067_vm8, %v3056_v20, %v5428_v15  ;;  %v2617_v51 = vsel %vm2601_vm2, 0.0, %v2563_v59 }
 0xbd4   :  { %v3089_v49 = vsel %vm533_vm3, %v3073_v42, %v5452_v61 }
 0xbd5   :  { %3106 = vst.msk [vmem:[#allocation20 + $0x28] sm:$0xff] %vm3100_vm10, %v3089_v49 }
 0xbd7   :  { %v2895_v32 = vpop.permute.xlu0 %2894  ;;  %v3668_v58 = vpop.f32.mrb[108].mxu0 }
 0xbd8   :  { %v3061_v60 = vsel %vm3050_vm6, %v2619_v5, %v2895_v32  ;;  %v2587_v25 = vadd.f32 %v3668_v58, %v5755_v33  ;;  %v2578_v15 = vpop.f32.mrb[109].mxu0 }
 0xbd9   :  { %v3078_v13 = vsel %vm3067_vm8, %v3061_v60, %v5438_v16  ;;  %v3669_v37 = vpop.f32.mrb[110].mxu0  ;;  %v2897_v61 = vpop.permute.xlu1 %2896  ;;  %v2579_v16 = vadd.f32 %v2578_v15, %v5753_v38 }
 0xbda   :  { %v3094_v24 = vsel %vm533_vm3, %v3078_v13, %v5460_v8  ;;  %v2590_v63 = vadd.f32 %v3669_v37, %v5757_v10  ;;  %v3062_v43 = vsel %vm3050_vm6, %v2620_v4, %v2897_v61  ;;  %v2581_v44 = vpop.f32.mrb[111].mxu0  ;;  %vm2607_vm5 = vcmp.ne.f32.partialorder %v2587_v25, %v2587_v25 }
 0xbdb   :  { %3111 = vst.msk [vmem:[#allocation20 + $0x50] sm:$0xff] %vm3100_vm10, %v3094_v24  ;;  %v3079_v33 = vsel %vm3067_vm8, %v3062_v43, %v5440_v50  ;;  %v2891_v48 = vpop.permute.xlu0 %2890  ;;  %v2582_v56 = vadd.f32 %v2581_v44, %v5756_v52  ;;  %v2623_v47 = vsel %vm2607_vm5, 0.0, %v2587_v25  ;;  %vm2605_vm9 = vcmp.ne.f32.partialorder %v2579_v16, %v2579_v16 }
 0xbdc   :  { %v3095_v14 = vsel %vm533_vm3, %v3079_v33, %v5462_v23  ;;  %v3059_v8 = vsel %vm3050_vm6, %v2617_v51, %v2891_v48  ;;  %vm2608_vm7 = vcmp.ne.f32.partialorder %v2590_v63, %v2590_v63  ;;  %v2621_v22 = vsel %vm2605_vm9, 0.0, %v2579_v16 }
 0xbdd   :  { %3112 = vst.msk [vmem:[#allocation20 + $0x58] sm:$0xff] %vm3100_vm10, %v3095_v14  ;;  %v3076_v10 = vsel %vm3067_vm8, %v3059_v8, %v5434_v28  ;;  %v2893_v34 = vpop.permute.xlu1 %2892  ;;  %v2624_v62 = vsel %vm2608_vm7, 0.0, %v2590_v63  ;;  %vm2606_vm11 = vcmp.ne.f32.partialorder %v2582_v56, %v2582_v56 }
 0xbde   :  { %v3092_v50 = vsel %vm533_vm3, %v3076_v10, %v5456_v31  ;;  %v3060_v38 = vsel %vm3050_vm6, %v2618_v0, %v2893_v34 }
 0xbdf   :  { %3109 = vst.msk [vmem:[#allocation20 + $0x40] sm:$0xff] %vm3100_vm10, %v3092_v50  ;;  %v3077_v23 = vsel %vm3067_vm8, %v3060_v38, %v5436_v55  ;;  %v2903_v29 = vpop.permute.xlu0 %2902 }
 0xbe0   :  { %v3093_v28 = vsel %vm533_vm3, %v3077_v23, %v5458_v6  ;;  %v3065_v21 = vsel %vm3050_vm6, %v2623_v47, %v2903_v29  ;;  %v2622_v6 = vsel %vm2606_vm11, 0.0, %v2582_v56 }
 0xbe1   :  { %3110 = vst.msk [vmem:[#allocation20 + $0x48] sm:$0xff] %vm3100_vm10, %v3093_v28  ;;  %v2905_v52 = vpop.permute.xlu1 %2904  ;;  %v3082_v31 = vsel %vm3067_vm8, %v3065_v21, %v5446_v39 }
 0xbe2   :  { %v3066_v7 = vsel %vm3050_vm6, %v2624_v62, %v2905_v52 }
 0xbe3   :  { %v2899_v2 = vpop.permute.xlu0 %2898  ;;  %v3083_v55 = vsel %vm3067_vm8, %v3066_v7, %v5448_v57 }
 0xbe4   :  { %v3063_v11 = vsel %vm3050_vm6, %v2621_v22, %v2899_v2 }
 0xbe5   :  { %v3080_v40 = vsel %vm3067_vm8, %v3063_v11, %v5442_v27  ;;  %v2901_v35 = vpop.permute.xlu1 %2900 }
 0xbe6   :  { %v3096_v19 = vsel %vm533_vm3, %v3080_v40, %v5466_v9  ;;  %v3064_v39 = vsel %vm3050_vm6, %v2622_v6, %v2901_v35 }
 0xbe7   :  { %3113 = vst.msk [vmem:[#allocation20 + $0x60] sm:$0xff] %vm3100_vm10, %v3096_v19  ;;  %v3081_v30 = vsel %vm3067_vm8, %v3064_v39, %v5444_v26  ;;  %v3031_v57 = vpop.permute.xlu0 %3030 }
 0xbe8   :  { %v3097_v53 = vsel %vm533_vm3, %v3081_v30, %v5469_v12  ;;  %v3098_v3 = vsel %vm533_vm3, %v3082_v31, %v3031_v57 }
 0xbe9   :  { %3114 = vst.msk [vmem:[#allocation20 + $0x68] sm:$0xff] %vm3100_vm10, %v3097_v53  ;;  %3115 = vst.msk [vmem:[#allocation20 + $0x70] sm:$0xff] %vm3100_vm10, %v3098_v3  ;;  %v3033_v27 = vpop.permute.xlu1 %3032 }
 0xbea   :  { %v3099_v9 = vsel %vm533_vm3, %v3083_v55, %v3033_v27 }
 0xbeb   :  { %3116 = vst.msk [vmem:[#allocation20 + $0x78] sm:$0xff] %vm3100_vm10, %v3099_v9 }
 0xbec   :  { %4017 = shalt.err (!%p4014_p8)
}
 0xbed   :  { %s4018_s14 = scalar_lea.hbm %s5594_s11, 2048 }
 0xbee   :  { %p4019_p9 = scmp.ne.s32.totalorder %s5594_s11, %s4018_s14  ;;  %p4022_p10 = scmp.lt.u32.totalorder %s4018_s14, %s5594_s11 }
 0xbf0   :  { %p4024_p11 = pnand %p4022_p10, %p4019_p9 }
 0xbf2   :  { %4027 = shalt.err (!%p4024_p11)
}
 0xbf3   :  { %s4066_s27 = smov 128   ;;  %s4067_s6 = smov 8  }
 0xbf4   :  { %3128 = dma.vmem_to_hbm [thread:$0]  %s3123_s28, 2048, %s5594_s11, [#allocation4], %s4066_s27, %s4066_s27, %s4067_s6  }
 0xbf5   :  { %4040 = dma.done.wait [#allocation4], 2048  }
 0xbf6   :  { %4041 = vsyncadd [#allocation4], 4294965248 }
 0xbf7   :  { %3132 = vsyncpa [#allocation3], 1 }
 0xbf8   :  { %3133 = vsyncpa [#allocation6], 1 }
 0xbf9   :  { %3134 = vsyncpa [#allocation9], 1 }
 0xbfa   :  { %3135 = vsyncpa [#allocation12], 1 }
 0xbfb   :  { %3136 = vsyncpa [#allocation15], 1 }
 0xbfc   :  { %3137 = vsyncpa [#allocation18], 1 }
 0xbfd   :  { %3138 = vsyncpa [#allocation4], 1 }

</bundles_post_ra>
